<compile_context>
chip_gen: v5e
topology: v5e:2x2
jax: 0.10.0
libtpu: 0.0.40
codegen_flags: <defaults>
</compile_context>

<pallas_src>
import functools

import jax
import jax.numpy as jnp
from jax.experimental import pallas as pl
from jax.experimental.pallas import tpu as pltpu

BN_EPS = 1e-5      # PyTorch BatchNorm1d default
LANE = 128         # TPU lane width; hidden / classes / radiomic dims pad to this


def _round_up(x, m):
    return (x + m - 1) // m * m


# ---------------------------------------------------------------------------
# Fused kernel: conv1 (K-packed dot) -> halo mask -> conv2 (K-packed dot)
#               -> ReLU -> GAP -> BN-folded fc -> split classifier.
# One batch element per grid step; everything stays in VMEM / registers.
# ---------------------------------------------------------------------------
def _fused_kernel(im1_ref, mask_ref, rad_ref,
                  w1_ref, b1_ref, w2_ref, b2_ref,
                  fcw_ref, fcb_ref, wci_ref, wcr_ref, bc_ref,
                  o_ref, y1e_ref, *, H, W, C1P):
    HP, WP = H + 2, W + 2
    R = HP * WP               # rows of the halo-padded output grid
    EXT = WP + 1              # largest |flat shift| of a 3x3 tap on that grid

    mask = mask_ref[...]      # [R, 1] f32, 1.0 on interior rows, 0.0 on halo

    # -------- stage 1: 3x3 conv + bias + ReLU (one MXU dot, K = 9*Cin) ----
    y1 = jnp.dot(im1_ref[0], w1_ref[...],
                 preferred_element_type=jnp.float32)          # [R, C1P]
    y1 = (jnp.maximum(y1 + b1_ref[...], 0.0) * mask)          # halo ring -> 0
    y1 = y1.astype(jnp.bfloat16)

    # Stage-1 activation stays in VMEM.  Zero-extended flat layout: every 3x3
    # tap of conv2 becomes a *contiguous* row window (no strided 3-D slices).
    zext = jnp.zeros((EXT, C1P), jnp.bfloat16)
    y1e_ref[...] = jnp.concatenate([zext, y1, zext], axis=0)  # [R + 2*EXT, C1P]

    # -------- stage 2: 3x3 conv + bias + ReLU + GAP (one dot, K = 9*C1P) --
    taps = []
    for kh in range(3):
        for kw in range(3):
            start = EXT + (kh - 1) * WP + (kw - 1)            # static, 0..2*EXT
            taps.append(y1e_ref[start:start + R, :])          # [R, C1P] bf16
    im2 = jnp.concatenate(taps, axis=-1)                      # [R, 9*C1P]
    z2 = jnp.dot(im2, w2_ref[...],
                 preferred_element_type=jnp.float32)          # [R, LANE]
    z2 = jnp.maximum(z2 + b2_ref[...], 0.0) * mask            # drop halo rows
    img_feat = jnp.sum(z2, axis=0, keepdims=True) * (1.0 / float(H * W))

    # -------- head: BN folded into fc; concat expressed as split weights ---
    rad = rad_ref[0]                                          # [1, LANE] f32
    rf = jnp.dot(rad, fcw_ref[...], preferred_element_type=jnp.float32)
    rf = jnp.maximum(rf + fcb_ref[...], 0.0)
    # TODO(synk): Dropout(0.5) is identity in eval mode.
    out = (jnp.dot(img_feat, wci_ref[...], preferred_element_type=jnp.float32)
           + jnp.dot(rf, wcr_ref[...], preferred_element_type=jnp.float32)
           + bc_ref[...])
    o_ref[0] = out.astype(o_ref.dtype)


# ---------------------------------------------------------------------------
# Parameter init (deterministic, synthetic, logical sizes).
# ---------------------------------------------------------------------------
def init_params(key, radiomic_feature_size, hidden_size, num_classes,
                c_stem, c_in=3):
    ks = jax.random.split(key, 8)

    def w(k, shape, fan_in):
        return jax.random.normal(k, shape, jnp.float32) / jnp.sqrt(float(fan_in))

    return dict(
        conv1_w=w(ks[0], (3, 3, c_in, c_stem), 9 * c_in),
        conv1_b=jnp.zeros((1, c_stem), jnp.float32),
        conv2_w=w(ks[1], (3, 3, c_stem, hidden_size), 9 * c_stem),
        conv2_b=jnp.zeros((1, hidden_size), jnp.float32),
        bn_gamma=jnp.ones((1, radiomic_feature_size), jnp.float32),
        bn_beta=jnp.zeros((1, radiomic_feature_size), jnp.float32),
        bn_mean=0.1 * jax.random.normal(ks[2], (1, radiomic_feature_size),
                                        jnp.float32),
        bn_var=1.0 + 0.1 * jnp.abs(
            jax.random.normal(ks[3], (1, radiomic_feature_size), jnp.float32)),
        fc_w=w(ks[4], (radiomic_feature_size, hidden_size),
               radiomic_feature_size),
        fc_b=0.01 * jax.random.normal(ks[5], (1, hidden_size), jnp.float32),
        cls_w=w(ks[6], (2 * hidden_size, num_classes), 2 * hidden_size),
        cls_b=0.01 * jax.random.normal(ks[7], (1, num_classes), jnp.float32),
    )


# ---------------------------------------------------------------------------
# Pack parameters into kernel layout: K-packed conv weights (taps folded into
# the contraction dim), eval-mode BN folded into the fc layer, classifier
# split for the concat, everything else zero-padded to 128 lanes.
# ---------------------------------------------------------------------------
def pack_params(p):
    c_in, c_stem = p["conv1_w"].shape[2], p["conv1_w"].shape[3]
    hidden = p["conv2_w"].shape[3]
    rad = p["fc_w"].shape[0]
    ncls = p["cls_w"].shape[1]
    assert max(hidden, rad, ncls) <= LANE

    K1P = _round_up(9 * c_in, 8)      # conv1 contraction (27 -> 32)
    C1P = _round_up(c_stem, 8)        # stage-1 channels

    def row_pad(v, n, fill=0.0):      # (1, m) -> (1, n)
        return jnp.pad(v, ((0, 0), (0, n - v.shape[1])), constant_values=fill)

    def mat_pad(m, r=LANE, c=LANE):   # (a, b) -> (r, c), zero fill
        return jnp.pad(m, ((0, r - m.shape[0]), (0, c - m.shape[1])))

    # conv1: (3,3,Cin,Cs) -> [9*Cin, Cs] -> pad -> bf16  (rows match im2col lanes)
    w1 = p["conv1_w"].reshape(9 * c_in, c_stem)
    w1 = mat_pad(w1, K1P, C1P).astype(jnp.bfloat16)

    # conv2: (3,3,Cs,hid) -> channel/lane pad -> taps folded into K: [9*C1P, 128]
    w2 = jnp.pad(p["conv2_w"],
                 ((0, 0), (0, 0), (0, C1P - c_stem), (0, LANE - hidden)))
    w2 = w2.reshape(9 * C1P, LANE).astype(jnp.bfloat16)

    # Eval-mode BatchNorm1d folded into the radiomic fc layer.
    scale = p["bn_gamma"][0] / jnp.sqrt(p["bn_var"][0] + BN_EPS)
    shift = p["bn_beta"][0] - p["bn_mean"][0] * scale
    fc_w = p["fc_w"] * scale[:, None]
    fc_b = p["fc_b"] + (shift @ p["fc_w"])[None, :]

    return dict(
        conv1_w=w1, conv1_b=row_pad(p["conv1_b"], C1P),
        conv2_w=w2, conv2_b=row_pad(p["conv2_b"], LANE),
        fc_w=mat_pad(fc_w), fc_b=row_pad(fc_b, LANE),
        cls_w_img=mat_pad(p["cls_w"][:hidden]),
        cls_w_rad=mat_pad(p["cls_w"][hidden:]),
        cls_b=row_pad(p["cls_b"], LANE),
    )


# ---------------------------------------------------------------------------
# Forward pass.
# ---------------------------------------------------------------------------
def deep_radiomics_forward(packed, image_nchw, radiomic_features, *, num_classes):
    B, c_in, H, W = image_nchw.shape
    HP, WP = H + 2, W + 2
    R = HP * WP
    EXT = WP + 1
    K1P, C1P = packed["conv1_w"].shape
    k1 = 9 * c_in

    # Tiny wrapper-side im2col for conv1, built over the halo-padded output
    # grid (image padded by 2) so the kernel's stage-1 result already includes
    # the zero halo that conv2 needs.  HBM input is a few KB per batch row.
    x = jnp.transpose(image_nchw, (0, 2, 3, 1)).astype(jnp.float32)
    xp = jnp.pad(x, ((0, 0), (2, 2), (2, 2), (0, 0)))
    cols = [xp[:, kh:kh + HP, kw:kw + WP, :]
            for kh in range(3) for kw in range(3)]
    im1 = jnp.concatenate(cols, axis=-1).reshape(B, R, k1)
    im1 = jnp.pad(im1, ((0, 0), (0, 0), (0, K1P - k1))).astype(jnp.bfloat16)

    # 0/1 interior mask of the padded grid (shared by both convs + GAP).
    ii = jnp.arange(HP)
    jj = jnp.arange(WP)
    m2d = ((ii >= 1) & (ii <= H))[:, None] & ((jj >= 1) & (jj <= W))[None, :]
    mask = m2d.reshape(R, 1).astype(jnp.float32)

    rad = radiomic_features.astype(jnp.float32)
    rad = jnp.pad(rad, ((0, 0), (0, LANE - rad.shape[1]))).reshape(B, 1, LANE)

    kernel = functools.partial(_fused_kernel, H=H, W=W, C1P=C1P)
    # Small B: keep all steps on one core so double-buffering hides the DMA;
    # larger B: shard the batch across TensorCores.
    sem = ("parallel",) if B >= 4 else ("arbitrary",)

    out = pl.pallas_call(
        kernel,
        out_shape=jax.ShapeDtypeStruct((B, 1, LANE), jnp.float32),
        grid=(B,),
        in_specs=[
            pl.BlockSpec((1, R, K1P), lambda b: (b, 0, 0)),     # conv1 im2col row
            pl.BlockSpec((R, 1), lambda b: (0, 0)),             # interior mask
            pl.BlockSpec((1, 1, LANE), lambda b: (b, 0, 0)),    # radiomic row
            pl.BlockSpec((K1P, C1P), lambda b: (0, 0)),         # conv1 w
            pl.BlockSpec((1, C1P), lambda b: (0, 0)),           # conv1 b
            pl.BlockSpec((9 * C1P, LANE), lambda b: (0, 0)),    # conv2 w (K-packed)
            pl.BlockSpec((1, LANE), lambda b: (0, 0)),          # conv2 b
            pl.BlockSpec((LANE, LANE), lambda b: (0, 0)),       # fc w (BN folded)
            pl.BlockSpec((1, LANE), lambda b: (0, 0)),          # fc b (BN folded)
            pl.BlockSpec((LANE, LANE), lambda b: (0, 0)),       # cls w (image half)
            pl.BlockSpec((LANE, LANE), lambda b: (0, 0)),       # cls w (radiomic half)
            pl.BlockSpec((1, LANE), lambda b: (0, 0)),          # cls b
        ],
        out_specs=pl.BlockSpec((1, 1, LANE), lambda b: (b, 0, 0)),
        scratch_shapes=[pltpu.VMEM((R + 2 * EXT, C1P), jnp.bfloat16)],
        compiler_params=pltpu.CompilerParams(dimension_semantics=sem),
    )(im1, mask, rad,
      packed["conv1_w"], packed["conv1_b"],
      packed["conv2_w"], packed["conv2_b"],
      packed["fc_w"], packed["fc_b"],
      packed["cls_w_img"], packed["cls_w_rad"], packed["cls_b"])

    return out.reshape(B, LANE)[:, :num_classes]


if __name__ == "__main__":
    B, C_IN, H, W = 2, 3, 16, 16
    RAD, HIDDEN, NUM_CLASSES, C_STEM = 8, 32, 4, 16

    key = jax.random.PRNGKey(0)
    k_img, k_rad = jax.random.split(key)
    image = jax.random.normal(k_img, (B, C_IN, H, W), jnp.float32)
    radiomic = jax.random.normal(k_rad, (B, RAD), jnp.float32)

    params = init_params(jax.random.PRNGKey(42), RAD, HIDDEN, NUM_CLASSES,
                         C_STEM, C_IN)
    packed = pack_params(params)

    fwd = jax.jit(deep_radiomics_forward, static_argnames=("num_classes",))
    out = fwd(packed, image, radiomic, num_classes=NUM_CLASSES)
    out = jax.block_until_ready(out)
    assert out.shape == (B, NUM_CLASSES), out.shape
    assert out.dtype == jnp.float32
    print("KERNEL_OK")
</pallas_src>

<mosaic_0001>
module attributes {stable_mosaic.version = 11 : i64} {
  func.func @_fused_kernel(%arg0: i32, %arg1: memref<1x324x32xbf16, #tpu.memory_space<vmem>>, %arg2: memref<324x1xf32, #tpu.memory_space<vmem>>, %arg3: memref<1x1x128xf32, #tpu.memory_space<vmem>>, %arg4: memref<32x16xbf16, #tpu.memory_space<vmem>>, %arg5: memref<1x16xf32, #tpu.memory_space<vmem>>, %arg6: memref<144x128xbf16, #tpu.memory_space<vmem>>, %arg7: memref<1x128xf32, #tpu.memory_space<vmem>>, %arg8: memref<128x128xf32, #tpu.memory_space<vmem>>, %arg9: memref<1x128xf32, #tpu.memory_space<vmem>>, %arg10: memref<128x128xf32, #tpu.memory_space<vmem>>, %arg11: memref<128x128xf32, #tpu.memory_space<vmem>>, %arg12: memref<1x128xf32, #tpu.memory_space<vmem>>, %arg13: memref<1x1x128xf32, #tpu.memory_space<vmem>>, %arg14: memref<362x16xbf16, #tpu.memory_space<vmem>>) attributes {dimension_semantics = [#tpu.dimension_semantics<arbitrary>], iteration_bounds = array<i64: 2>, scalar_prefetch = 0 : i64, scratch_operands = 1 : i64, tpu.core_type = #tpu.core_type<tc>, window_params = [{transform_indices = @transform_0, window_bounds = array<i64: 1, 324, 32>}, {pipeline_mode = #tpu.pipeline_mode<synchronous>, transform_indices = @transform_1, window_bounds = array<i64: 324, 1>}, {transform_indices = @transform_2, window_bounds = array<i64: 1, 1, 128>}, {pipeline_mode = #tpu.pipeline_mode<synchronous>, transform_indices = @transform_3, window_bounds = array<i64: 32, 16>}, {pipeline_mode = #tpu.pipeline_mode<synchronous>, transform_indices = @transform_4, window_bounds = array<i64: 1, 16>}, {pipeline_mode = #tpu.pipeline_mode<synchronous>, transform_indices = @transform_5, window_bounds = array<i64: 144, 128>}, {pipeline_mode = #tpu.pipeline_mode<synchronous>, transform_indices = @transform_6, window_bounds = array<i64: 1, 128>}, {pipeline_mode = #tpu.pipeline_mode<synchronous>, transform_indices = @transform_7, window_bounds = array<i64: 128, 128>}, {pipeline_mode = #tpu.pipeline_mode<synchronous>, transform_indices = @transform_8, window_bounds = array<i64: 1, 128>}, {pipeline_mode = #tpu.pipeline_mode<synchronous>, transform_indices = @transform_9, window_bounds = array<i64: 128, 128>}, {pipeline_mode = #tpu.pipeline_mode<synchronous>, transform_indices = @transform_10, window_bounds = array<i64: 128, 128>}, {pipeline_mode = #tpu.pipeline_mode<synchronous>, transform_indices = @transform_11, window_bounds = array<i64: 1, 128>}, {transform_indices = @transform_12, window_bounds = array<i64: 1, 1, 128>}]} {
    %c0 = arith.constant 0 : index
    %c0_0 = arith.constant 0 : index
    %0 = vector.load %arg2[%c0, %c0_0] : memref<324x1xf32, #tpu.memory_space<vmem>>, vector<324x1xf32>
    %c0_1 = arith.constant 0 : index
    %c0_2 = arith.constant 0 : index
    %c0_3 = arith.constant 0 : index
    %1 = vector.load %arg1[%c0_1, %c0_2, %c0_3] : memref<1x324x32xbf16, #tpu.memory_space<vmem>>, vector<1x324x32xbf16>
    %2 = vector.shape_cast %1 : vector<1x324x32xbf16> to vector<324x32xbf16>
    %c0_4 = arith.constant 0 : index
    %c0_5 = arith.constant 0 : index
    %3 = vector.load %arg4[%c0_4, %c0_5] : memref<32x16xbf16, #tpu.memory_space<vmem>>, vector<32x16xbf16>
    %cst = arith.constant dense<0.000000e+00> : vector<324x16xf32>
    %4 = tpu.matmul %2, %3, %cst {dimension_numbers = #tpu.dot_dimension_numbers<[1], [0], [0], [1], [0, 0, 1, 1], [], []>} : vector<324x32xbf16>, vector<32x16xbf16>, vector<324x16xf32> -> vector<324x16xf32>
    %c0_6 = arith.constant 0 : index
    %c0_7 = arith.constant 0 : index
    %5 = vector.load %arg5[%c0_6, %c0_7] : memref<1x16xf32, #tpu.memory_space<vmem>>, vector<1x16xf32>
    %6 = vector.broadcast %5 : vector<1x16xf32> to vector<324x16xf32>
    %7 = arith.addf %4, %6 : vector<324x16xf32>
    %cst_8 = arith.constant 0.000000e+00 : f32
    %8 = vector.broadcast %cst_8 : f32 to vector<324x16xf32>
    %9 = arith.maximumf %7, %8 : vector<324x16xf32>
    %10 = vector.broadcast %0 : vector<324x1xf32> to vector<324x16xf32>
    %11 = arith.mulf %9, %10 : vector<324x16xf32>
    %12 = arith.truncf %11 : vector<324x16xf32> to vector<324x16xbf16>
    %cst_9 = arith.constant 0.000000e+00 : bf16
    %13 = vector.broadcast %cst_9 : bf16 to vector<19x16xbf16>
    %14 = tpu.concatenate %13, %12, %13 in 0 : vector<19x16xbf16>, vector<324x16xbf16>, vector<19x16xbf16> -> vector<362x16xbf16>
    %c0_10 = arith.constant 0 : index
    %c0_11 = arith.constant 0 : index
    %15 = vector.load %arg14[%c0_10, %c0_11] : memref<362x16xbf16, #tpu.memory_space<vmem>>, vector<362x16xbf16>
    tpu.vector_store %arg14[%c0_10, %c0_11], %14 {strides = array<i32>} : memref<362x16xbf16, #tpu.memory_space<vmem>>, vector<362x16xbf16>,
    %c0_12 = arith.constant 0 : index
    %c0_13 = arith.constant 0 : index
    %16 = vector.load %arg14[%c0_12, %c0_13] : memref<362x16xbf16, #tpu.memory_space<vmem>>, vector<324x16xbf16>
    %c1 = arith.constant 1 : index
    %c0_14 = arith.constant 0 : index
    %17 = vector.load %arg14[%c1, %c0_14] : memref<362x16xbf16, #tpu.memory_space<vmem>>, vector<324x16xbf16>
    %c2 = arith.constant 2 : index
    %c0_15 = arith.constant 0 : index
    %18 = vector.load %arg14[%c2, %c0_15] : memref<362x16xbf16, #tpu.memory_space<vmem>>, vector<324x16xbf16>
    %c18 = arith.constant 18 : index
    %c0_16 = arith.constant 0 : index
    %19 = vector.load %arg14[%c18, %c0_16] : memref<362x16xbf16, #tpu.memory_space<vmem>>, vector<324x16xbf16>
    %c19 = arith.constant 19 : index
    %c0_17 = arith.constant 0 : index
    %20 = vector.load %arg14[%c19, %c0_17] : memref<362x16xbf16, #tpu.memory_space<vmem>>, vector<324x16xbf16>
    %c20 = arith.constant 20 : index
    %c0_18 = arith.constant 0 : index
    %21 = vector.load %arg14[%c20, %c0_18] : memref<362x16xbf16, #tpu.memory_space<vmem>>, vector<324x16xbf16>
    %c36 = arith.constant 36 : index
    %c0_19 = arith.constant 0 : index
    %22 = vector.load %arg14[%c36, %c0_19] : memref<362x16xbf16, #tpu.memory_space<vmem>>, vector<324x16xbf16>
    %c37 = arith.constant 37 : index
    %c0_20 = arith.constant 0 : index
    %23 = vector.load %arg14[%c37, %c0_20] : memref<362x16xbf16, #tpu.memory_space<vmem>>, vector<324x16xbf16>
    %c38 = arith.constant 38 : index
    %c0_21 = arith.constant 0 : index
    %24 = vector.load %arg14[%c38, %c0_21] : memref<362x16xbf16, #tpu.memory_space<vmem>>, vector<324x16xbf16>
    %25 = tpu.concatenate %16, %17, %18, %19, %20, %21, %22, %23, %24 in 1 : vector<324x16xbf16>, vector<324x16xbf16>, vector<324x16xbf16>, vector<324x16xbf16>, vector<324x16xbf16>, vector<324x16xbf16>, vector<324x16xbf16>, vector<324x16xbf16>, vector<324x16xbf16> -> vector<324x144xbf16>
    %c0_22 = arith.constant 0 : index
    %c0_23 = arith.constant 0 : index
    %26 = vector.load %arg6[%c0_22, %c0_23] : memref<144x128xbf16, #tpu.memory_space<vmem>>, vector<144x128xbf16>
    %cst_24 = arith.constant dense<0.000000e+00> : vector<324x128xf32>
    %27 = tpu.matmul %25, %26, %cst_24 {dimension_numbers = #tpu.dot_dimension_numbers<[1], [0], [0], [1], [0, 0, 1, 1], [], []>} : vector<324x144xbf16>, vector<144x128xbf16>, vector<324x128xf32> -> vector<324x128xf32>
    %c0_25 = arith.constant 0 : index
    %c0_26 = arith.constant 0 : index
    %28 = vector.load %arg7[%c0_25, %c0_26] : memref<1x128xf32, #tpu.memory_space<vmem>>, vector<1x128xf32>
    %29 = vector.broadcast %28 : vector<1x128xf32> to vector<324x128xf32>
    %30 = arith.addf %27, %29 : vector<324x128xf32>
    %cst_27 = arith.constant 0.000000e+00 : f32
    %31 = vector.broadcast %cst_27 : f32 to vector<324x128xf32>
    %32 = arith.maximumf %30, %31 : vector<324x128xf32>
    %33 = vector.broadcast %0 : vector<324x1xf32> to vector<324x128xf32>
    %34 = arith.mulf %32, %33 : vector<324x128xf32>
    %cst_28 = arith.constant dense<0.000000e+00> : vector<128xf32>
    %35 = vector.multi_reduction <add>, %34, %cst_28 [0] : vector<324x128xf32> to vector<128xf32>
    %36 = vector.shape_cast %35 : vector<128xf32> to vector<1x128xf32>
    %cst_29 = arith.constant 3.906250e-03 : f32
    %37 = vector.broadcast %cst_29 : f32 to vector<1x128xf32>
    %38 = arith.mulf %36, %37 : vector<1x128xf32>
    %c0_30 = arith.constant 0 : index
    %c0_31 = arith.constant 0 : index
    %c0_32 = arith.constant 0 : index
    %39 = vector.load %arg3[%c0_30, %c0_31, %c0_32] : memref<1x1x128xf32, #tpu.memory_space<vmem>>, vector<1x1x128xf32>
    %40 = vector.shape_cast %39 : vector<1x1x128xf32> to vector<1x128xf32>
    %c0_33 = arith.constant 0 : index
    %c0_34 = arith.constant 0 : index
    %41 = vector.load %arg8[%c0_33, %c0_34] : memref<128x128xf32, #tpu.memory_space<vmem>>, vector<128x128xf32>
    %cst_35 = arith.constant dense<0.000000e+00> : vector<1x128xf32>
    %42 = tpu.matmul %40, %41, %cst_35 {dimension_numbers = #tpu.dot_dimension_numbers<[1], [0], [0], [1], [0, 0, 1, 1], [], []>} : vector<1x128xf32>, vector<128x128xf32>, vector<1x128xf32> -> vector<1x128xf32>
    %c0_36 = arith.constant 0 : index
    %c0_37 = arith.constant 0 : index
    %43 = vector.load %arg9[%c0_36, %c0_37] : memref<1x128xf32, #tpu.memory_space<vmem>>, vector<1x128xf32>
    %44 = arith.addf %42, %43 : vector<1x128xf32>
    %cst_38 = arith.constant 0.000000e+00 : f32
    %45 = vector.broadcast %cst_38 : f32 to vector<1x128xf32>
    %46 = arith.maximumf %44, %45 : vector<1x128xf32>
    %c0_39 = arith.constant 0 : index
    %c0_40 = arith.constant 0 : index
    %47 = vector.load %arg10[%c0_39, %c0_40] : memref<128x128xf32, #tpu.memory_space<vmem>>, vector<128x128xf32>
    %cst_41 = arith.constant dense<0.000000e+00> : vector<1x128xf32>
    %48 = tpu.matmul %38, %47, %cst_41 {dimension_numbers = #tpu.dot_dimension_numbers<[1], [0], [0], [1], [0, 0, 1, 1], [], []>} : vector<1x128xf32>, vector<128x128xf32>, vector<1x128xf32> -> vector<1x128xf32>
    %c0_42 = arith.constant 0 : index
    %c0_43 = arith.constant 0 : index
    %49 = vector.load %arg11[%c0_42, %c0_43] : memref<128x128xf32, #tpu.memory_space<vmem>>, vector<128x128xf32>
    %cst_44 = arith.constant dense<0.000000e+00> : vector<1x128xf32>
    %50 = tpu.matmul %46, %49, %cst_44 {dimension_numbers = #tpu.dot_dimension_numbers<[1], [0], [0], [1], [0, 0, 1, 1], [], []>} : vector<1x128xf32>, vector<128x128xf32>, vector<1x128xf32> -> vector<1x128xf32>
    %51 = arith.addf %48, %50 : vector<1x128xf32>
    %c0_45 = arith.constant 0 : index
    %c0_46 = arith.constant 0 : index
    %52 = vector.load %arg12[%c0_45, %c0_46] : memref<1x128xf32, #tpu.memory_space<vmem>>, vector<1x128xf32>
    %53 = arith.addf %51, %52 : vector<1x128xf32>
    %c0_47 = arith.constant 0 : index
    %c0_48 = arith.constant 0 : index
    %c0_49 = arith.constant 0 : index
    %54 = vector.load %arg13[%c0_47, %c0_48, %c0_49] : memref<1x1x128xf32, #tpu.memory_space<vmem>>, vector<1x1x128xf32>
    %55 = vector.shape_cast %54 : vector<1x1x128xf32> to vector<1x128xf32>
    %56 = vector.shape_cast %53 : vector<1x128xf32> to vector<1x1x128xf32>
    tpu.vector_store %arg13[%c0_47, %c0_48, %c0_49], %56 {strides = array<i32>} : memref<1x1x128xf32, #tpu.memory_space<vmem>>, vector<1x1x128xf32>,
    return
  }
  func.func @transform_0(%arg0: i32) -> (i32, i32, i32) {
    %c0_i32 = arith.constant 0 : i32
    %c0_i32_0 = arith.constant 0 : i32
    %c0_i32_1 = arith.constant 0 : i32
    return %arg0, %c0_i32, %c0_i32_0 : i32, i32, i32
  }
  func.func @transform_1(%arg0: i32) -> (i32, i32) {
    %c0_i32 = arith.constant 0 : i32
    %c0_i32_0 = arith.constant 0 : i32
    %c0_i32_1 = arith.constant 0 : i32
    return %c0_i32, %c0_i32_0 : i32, i32
  }
  func.func @transform_2(%arg0: i32) -> (i32, i32, i32) {
    %c0_i32 = arith.constant 0 : i32
    %c0_i32_0 = arith.constant 0 : i32
    %c0_i32_1 = arith.constant 0 : i32
    return %arg0, %c0_i32, %c0_i32_0 : i32, i32, i32
  }
  func.func @transform_3(%arg0: i32) -> (i32, i32) {
    %c0_i32 = arith.constant 0 : i32
    %c0_i32_0 = arith.constant 0 : i32
    %c0_i32_1 = arith.constant 0 : i32
    return %c0_i32, %c0_i32_0 : i32, i32
  }
  func.func @transform_4(%arg0: i32) -> (i32, i32) {
    %c0_i32 = arith.constant 0 : i32
    %c0_i32_0 = arith.constant 0 : i32
    %c0_i32_1 = arith.constant 0 : i32
    return %c0_i32, %c0_i32_0 : i32, i32
  }
  func.func @transform_5(%arg0: i32) -> (i32, i32) {
    %c0_i32 = arith.constant 0 : i32
    %c0_i32_0 = arith.constant 0 : i32
    %c0_i32_1 = arith.constant 0 : i32
    return %c0_i32, %c0_i32_0 : i32, i32
  }
  func.func @transform_6(%arg0: i32) -> (i32, i32) {
    %c0_i32 = arith.constant 0 : i32
    %c0_i32_0 = arith.constant 0 : i32
    %c0_i32_1 = arith.constant 0 : i32
    return %c0_i32, %c0_i32_0 : i32, i32
  }
  func.func @transform_7(%arg0: i32) -> (i32, i32) {
    %c0_i32 = arith.constant 0 : i32
    %c0_i32_0 = arith.constant 0 : i32
    %c0_i32_1 = arith.constant 0 : i32
    return %c0_i32, %c0_i32_0 : i32, i32
  }
  func.func @transform_8(%arg0: i32) -> (i32, i32) {
    %c0_i32 = arith.constant 0 : i32
    %c0_i32_0 = arith.constant 0 : i32
    %c0_i32_1 = arith.constant 0 : i32
    return %c0_i32, %c0_i32_0 : i32, i32
  }
  func.func @transform_9(%arg0: i32) -> (i32, i32) {
    %c0_i32 = arith.constant 0 : i32
    %c0_i32_0 = arith.constant 0 : i32
    %c0_i32_1 = arith.constant 0 : i32
    return %c0_i32, %c0_i32_0 : i32, i32
  }
  func.func @transform_10(%arg0: i32) -> (i32, i32) {
    %c0_i32 = arith.constant 0 : i32
    %c0_i32_0 = arith.constant 0 : i32
    %c0_i32_1 = arith.constant 0 : i32
    return %c0_i32, %c0_i32_0 : i32, i32
  }
  func.func @transform_11(%arg0: i32) -> (i32, i32) {
    %c0_i32 = arith.constant 0 : i32
    %c0_i32_0 = arith.constant 0 : i32
    %c0_i32_1 = arith.constant 0 : i32
    return %c0_i32, %c0_i32_0 : i32, i32
  }
  func.func @transform_12(%arg0: i32) -> (i32, i32, i32) {
    %c0_i32 = arith.constant 0 : i32
    %c0_i32_0 = arith.constant 0 : i32
    %c0_i32_1 = arith.constant 0 : i32
    return %arg0, %c0_i32, %c0_i32_0 : i32, i32, i32
  }
}

</mosaic_0001>

<bundles_post_ra>
// kernel: deep_radiomics_forward.1
= control target key start
LH: loop header
LB: loop body
LE: loop exit
PB: predicated region body
PF: predicated region fallthrough
CT: control target
= control target key end

     0   :  { %s6576_s0 = inlined_call_operand.vmem [shape: bf16[2,324,32], index: 0, kind: input, shape index: {}]   ;;  %s6577_s1 = inlined_call_operand.vmem [shape: f32[324,1], index: 1, kind: input, shape index: {}]   ;;  %s6578_s2 = inlined_call_operand.vmem [shape: f32[2,1,128], index: 2, kind: input, shape index: {}]   ;;  %s6579_s3 = inlined_call_operand.vmem [shape: bf16[32,16], index: 3, kind: input, shape index: {}]   ;;  %s6580_s4 = inlined_call_operand.vmem [shape: f32[1,16], index: 4, kind: input, shape index: {}]   ;;  %s6581_s5 = inlined_call_operand.vmem [shape: bf16[144,128], index: 5, kind: input, shape index: {}]   ;;  %s6582_s6 = inlined_call_operand.vmem [shape: f32[1,128], index: 6, kind: input, shape index: {}]   ;;  %s6583_s7 = inlined_call_operand.vmem [shape: f32[128,128], index: 7, kind: input, shape index: {}]   ;;  %s6584_s8 = inlined_call_operand.vmem [shape: f32[1,128], index: 8, kind: input, shape index: {}]   ;;  %s6585_s9 = inlined_call_operand.vmem [shape: f32[128,128], index: 9, kind: input, shape index: {}]   ;;  %s6586_s10 = inlined_call_operand.vmem [shape: f32[128,128], index: 10, kind: input, shape index: {}]   ;;  %s6587_s11 = inlined_call_operand.vmem [shape: f32[1,128], index: 11, kind: input, shape index: {}]   ;;  %s6588_s12 = inlined_call_operand.hbm [shape: f32[2,1,128], index: 12, kind: output, shape index: {}]  }
   0x1   :  { %6686 = sst [smem:[#allocation68_spill]] %s6576_s0 }
   0x2   :  { %6687 = sst [smem:[#allocation69_spill]] %s6579_s3 }
   0x3   :  { %17 = vsyncpa [#allocation4], 0 }
   0x4   :  { %19 = vsyncpa [#allocation4 + $0x1], 0  ;;  %s4160_s21 = smov 0   ;;  %s4162_s22 = smov 0  }
   0x5   :  { %s4164_s23 = smov 0   ;;  %s4166_s24 = smov 0  }
   0x6 LB: > { %s4181_s25 = sadd.s32 4294967295, %s4085_s24   ;;  %s3622_s26 = sadd.s32 4294967294, %s4085_s24   ;;  %s4085_s24 = sphi %s4166_s24, %s6880_s24   ;;  %s4081_s23 = sphi %s4164_s23, %s6879_s23   ;;  %s4077_s22 = sphi %s4162_s22, %s6878_s22   ;;  %s4073_s21 = sphi %s4160_s21, %s6877_s21  }
   0x7   : > { %s4185_s27 = sadd.s32 1, %s4085_s24   ;;  %s294_s28 = sadd.s32 1, %s4081_s23 }
   0x8   : > { %s291_s29 = ssub.s32 %s4085_s24, %s4185_s27  ;;  %p304_p0 = scmp.ne.s32.totalorder %s4081_s23, %s4077_s22 }
   0x9   : > { %p292_p1 = scmp.eq.s32.totalorder %s291_s29, 0  ;;  %p305_p2 = scmp.eq.s32.totalorder %s4181_s25, 1 }
   0xa   : > { %p310_p3 = scmp.ne.s32.totalorder %s4077_s22, %s4073_s21  ;;  %p311_p4 = scmp.eq.s32.totalorder %s3622_s26, 1 }
   0xb   : > { %s4196_s30 = scalar_select %p292_p1, %s4081_s23, %s294_s28  }
   0xc   : > { %p4198_p5 = por %p305_p2, %p304_p0  ;;  %p4202_p6 = por %p311_p4, %p310_p3 }
   0xd   : > { %6688 = sst [smem:[#allocation6_spill]] %s4196_s30  ;;  %p3625_p7 = scmp.ge.s32.totalorder %s4085_s24, 1 }
   0xe   : > { %p373_p8 = scmp.lt.s32.totalorder %s4085_s24, 3 }
  0x10   : > { %p374_p9 = pnand %p3625_p7, %p373_p8 }
  0x12   : > { %377 = sbr.rel (%p374_p9) target bundleno = 1090 (0x442), region = 68 }
  0x17   : > { %v430_v0 = vld [vmem:[%s6577_s1 + $0x20] sm:$0xff]  ;;  %v428_v1 = vld [vmem:[%s6577_s1 + $0x10] sm:$0xff]  ;;  %v4087_v3 = vmov 0   ;;  %s6691_s3 = sld [smem:[#allocation69_spill]]  ;;  %p417_p10 = scmp.lt.s32.totalorder %s4181_s25, 1  ;;  %vm1572_vm0 = vcmask 125952  }
  0x18   : > { %v426_v2 = vld [vmem:[%s6577_s1] sm:$0xff]  ;;  %3999 = vset.pattern.permute.xlu2 %v4087_v3  ;;  %v1440_v4 = vunpack.c.l.b16 %v4087_v3  ;;  %v1441_v5 = vunpack.c.h.b16 %v4087_v3  ;;  %3998 = vset.pattern.permute.xlu1 %v4087_v3  ;;  %vm1618_vm1 = vcmask 122880   ;;  %v431_v10 = vld [vmem:[%s6577_s1 + $0x28] sm:$0xff]  ;;  %v429_v11 = vld [vmem:[%s6577_s1 + $0x18] sm:$0xff]  ;;  %s6692_s0 = sld [smem:[#allocation68_spill]]  ;;  %vm631_vm2 = vcmask 261120  }
  0x19   : > { %3997 = vset.pattern.permute.xlu0 %v4087_v3  ;;  %871 = vperm.xlu2 %3999, %v430_v0   ;;  %s4222_s29 = scalar_select %p417_p10, %s4181_s25, 1  ;;  %v427_v12 = vld [vmem:[%s6577_s1 + $0x8] sm:$0xff]  ;;  %v434_v15 = vld [vmem:[%s6577_s1 + $0x40] sm:$0xff]  ;;  %v433_v16 = vld [vmem:[%s6577_s1 + $0x38] sm:$0xff]  ;;  %vm1239_vm3 = vsmask.f32 1280 }
  0x1a   : > { %v1484_v7 = vpack.c.b16 %v1440_v4, %v1440_v4  ;;  %v1485_v8 = vpack.c.b16 %v1441_v5, %v1441_v5  ;;  %861 = vperm.xlu1 %3998, %v428_v1   ;;  %851 = vperm.xlu0 %3997, %v426_v2   ;;  %v432_v17 = vld [vmem:[%s6577_s1 + $0x30] sm:$0xff]  ;;  %v437_v18 = vld [vmem:[%s6577_s1 + $0x58] sm:$0xff]  ;;  %v435_v20 = vld [vmem:[%s6577_s1 + $0x48] sm:$0xff]  ;;  %vm1430_vm4 = vcmask 1041408   ;;  %vm1993_vm6 = vcmask 1046528   ;;  %s4090_s20 = smov 80  }
  0x1b   : > { %s3949_s17 = smul.u32 164, %s4222_s29  ;;  %v436_v19 = vld [vmem:[%s6577_s1 + $0x50] sm:$0xff]  ;;  %v439_v24 = vld [vmem:[%s6577_s1 + $0x68] sm:$0xff]  ;;  %v438_v25 = vld [vmem:[%s6577_s1 + $0x60] sm:$0xff]  ;;  %vm1780_vm7 = vsmask.f32 7424 }
  0x1c   : > { %1573 = vst.msk [vmem:[#allocation2] sm:$0xf] %vm1572_vm0, %v1484_v7  ;;  %v440_v23 = vld [vmem:[%s6577_s1 + $0x70] sm:$0xff]  ;;  %v455_v28 = vld [vmem:[%s6577_s1 + $0xe8] sm:$0xff]  ;;  %v441_v29 = vld [vmem:[%s6577_s1 + $0x78] sm:$0xff]  ;;  %vm2283_vm8 = vcmask 1045504  }
  0x1d   : > { %v3888_v6 = vld [vmem:[%s6691_s3 + $0x8] sm:$0xff]  ;;  %v3887_v9 = vld [vmem:[%s6691_s3] sm:$0xff]  ;;  %1574 = vst.msk [vmem:[#allocation2 + $0x4] sm:$0xf] %vm1572_vm0, %v1485_v8  ;;  %v444_v35 = vld [vmem:[%s6577_s1 + $0x90] sm:$0xff]  ;;  %s4089_s3 = smov 16  }
  0x1e   : > { %701 = vmatpush.bf16.msra.mxu0 %v3888_v6  ;;  %3938 = vmatpush.bf16.msra.mxu3 %v3888_v6  ;;  %1617 = vst.msk [vmem:[#allocation2 + $0xb0] sm:$0xf] %vm1572_vm0, %v1484_v7  ;;  %s4240_s15 = scalar_lea.vmem %s6692_s0, %s3949_s17  ;;  %v442_v30 = vld [vmem:[%s6577_s1 + $0x80] sm:$0xff]  ;;  %v459_v33 = vld [vmem:[%s6577_s1 + $0x108] sm:$0xff]  ;;  %v448_v36 = vld [vmem:[%s6577_s1 + $0xb0] sm:$0xff]  ;;  %s4088_s0 = smov 32  }
  0x1f   : > { %1619 = vst.msk [vmem:[#allocation2 + $0xb4] sm:$0x1] %vm1618_vm1, %v1485_v8  ;;  %v3867_v13 = vld [vmem:[%s4240_s15] sm:$0xff]  ;;  %v3885_v14 = vld [vmem:[%s4240_s15 + $0x90] sm:$0xff]  ;;  %v3868_v21 = vld [vmem:[%s4240_s15 + $0x8] sm:$0xff]  ;;  %s4091_s26 = smov 48  }
  0x20   : > { %v3886_v22 = vld [vmem:[%s4240_s15 + $0x98] sm:$0xff]  ;;  %v507_v26 = vld [vmem:[%s4240_s15 + $0xa0] sm:$0x3]  ;;  %v3869_v31 = vld [vmem:[%s4240_s15 + $0x10] sm:$0xff]  ;;  %vm2139_vm9 = vsmask.f32 6400 }
  0x21   : > { %876 = vperm.xlu2 %3999, %v431_v10   ;;  %v597_v27 = vunpack.c.l.b16 %v507_v26  ;;  %v443_v34 = vld [vmem:[%s6577_s1 + $0x88] sm:$0xff]  ;;  %v445_v37 = vld [vmem:[%s6577_s1 + $0x98] sm:$0xff]  ;;  %v446_v38 = vld [vmem:[%s6577_s1 + $0xa0] sm:$0xff]  ;;  %s4092_s28 = smov 64   ;;  %vm2571_vm10 = vcmask 1044480   ;;  %vm2613_vm11 = vcmask 130048  }
  0x22   : > { %702 = vmatpush.bf16.msra.mxu0 %v3887_v9  ;;  %3939 = vmatpush.bf16.msra.mxu3 %v3887_v9  ;;  %v3870_v39 = vld [vmem:[%s4240_s15 + $0x18] sm:$0xff]  ;;  %v463_v40 = vld [vmem:[%s6577_s1 + $0x128] sm:$0xff]  ;;  %v456_v42 = vld [vmem:[%s6577_s1 + $0xf0] sm:$0xff]  ;;  %vm2427_vm12 = vsmask.f32 5376  ;;  %s4093_s16 = smov 112  }
  0x23   : > { %866 = vperm.xlu1 %3998, %v429_v11   ;;  %856 = vperm.xlu0 %3997, %v427_v12   ;;  %v618_v32 = vpack.c.b16 %v597_v27, %v597_v27  ;;  %v447_v41 = vld [vmem:[%s6577_s1 + $0xa8] sm:$0xff]  ;;  %v454_v44 = vld [vmem:[%s6577_s1 + $0xe0] sm:$0xff]  ;;  %v460_v45 = vld [vmem:[%s6577_s1 + $0x110] sm:$0xff]  ;;  %vm1433_vm13 = vcmask 1043456   ;;  %vm1434_vm14 = vsmask.f32 3328 }
  0x24   : > { %v451_v43 = vld [vmem:[%s6577_s1 + $0xc8] sm:$0xff]  ;;  %v3871_v46 = vld [vmem:[%s4240_s15 + $0x20] sm:$0xff]  ;;  %v457_v48 = vld [vmem:[%s6577_s1 + $0xf8] sm:$0xff]  ;;  %s4094_s30 = smov 96   ;;  %vm2699_vm1 = vcmask 392192  }
  0x25   : > { %3715 = vmatmul.msk.bf16.vlgmr.msra.gmra.mxu0 %vm631_vm2, %v3867_v13  ;;  %3733 = vmatmul.msk.bf16.vlgmr.msra.gmra.mxu3 %vm631_vm2, %v3885_v14  ;;  %v466_v47 = vld [vmem:[%s6577_s1 + $0x140] sm:$0xf]  ;;  %v449_v49 = vld [vmem:[%s6577_s1 + $0xb8] sm:$0xff]  ;;  %v464_v51 = vld [vmem:[%s6577_s1 + $0x130] sm:$0xff] }
  0x26   : > { %v458_v50 = vld [vmem:[%s6577_s1 + $0x100] sm:$0xff]  ;;  %v3872_v52 = vld [vmem:[%s4240_s15 + $0x28] sm:$0xff]  ;;  %v461_v53 = vld [vmem:[%s6577_s1 + $0x118] sm:$0xff] }
  0x27   : > { %v452_v54 = vld [vmem:[%s6577_s1 + $0xd0] sm:$0xff]  ;;  %v462_v55 = vld [vmem:[%s6577_s1 + $0x120] sm:$0xff]  ;;  %v465_v60 = vld [vmem:[%s6577_s1 + $0x138] sm:$0xff] }
  0x28   : > { %v3873_v56 = vld [vmem:[%s4240_s15 + $0x30] sm:$0xff]  ;;  %v450_v57 = vld [vmem:[%s6577_s1 + $0xc0] sm:$0xff]  ;;  %v3874_v61 = vld [vmem:[%s4240_s15 + $0x38] sm:$0xff] }
  0x29   : > { %891 = vperm.xlu2 %3999, %v434_v15   ;;  %v453_v0 = vld [vmem:[%s6577_s1 + $0xd8] sm:$0xff]  ;;  %v4389_v4 = vld [vmem:[%s6580_s4] ss:$0 sm:$0xff]  ;;  %vm1431_vm5 = vmand %vm1430_vm4, %vm1239_vm3  ;;  %vm2742_vm4 = vcmask 523264  }
  0x2a   : > { %v3875_v5 = vld [vmem:[%s4240_s15 + $0x40] sm:$0xff]  ;;  %vm1435_vm15 = vmand %vm1433_vm13, %vm1434_vm14  ;;  %vm2828_vm14 = vcmask 785408  }
  0x2b   : > { %886 = vperm.xlu1 %3998, %v433_v16   ;;  %881 = vperm.xlu0 %3997, %v432_v17  }
  0x31   : > { %906 = vperm.xlu2 %3999, %v437_v18  }
  0x33   : > { %901 = vperm.xlu1 %3998, %v436_v19   ;;  %896 = vperm.xlu0 %3997, %v435_v20  }
  0x35   : > { %3716 = vmatmul.msk.bf16.gmra.mxu0 %vm631_vm2, %v3868_v21  ;;  %3734 = vmatmul.msk.bf16.gmra.mxu3 %vm631_vm2, %v3886_v22 }
  0x39   : > { %921 = vperm.xlu2 %3999, %v440_v23  }
  0x3b   : > { %916 = vperm.xlu1 %3998, %v439_v24   ;;  %911 = vperm.xlu0 %3997, %v438_v25   ;;  %v3876_v25 = vld [vmem:[%s4240_s15 + $0x48] sm:$0xff] }
  0x41   : > { %996 = vperm.xlu2 %3999, %v455_v28  }
  0x43   : > { %926 = vperm.xlu1 %3998, %v441_v29   ;;  %931 = vperm.xlu0 %3997, %v442_v30  }
  0x45   : > { %3717 = vmatmul.msk.bf16.gmra.mxu0 %vm631_vm2, %v3869_v31  ;;  %3735 = vmatmul.msk.bf16.gmra.mxu3 %vm631_vm2, %v618_v32 }
  0x49   : > { %1016 = vperm.xlu2 %3999, %v459_v33  }
  0x4b   : > { %936 = vperm.xlu1 %3998, %v443_v34   ;;  %941 = vperm.xlu0 %3997, %v444_v35  }
  0x51   : > { %961 = vperm.xlu2 %3999, %v448_v36  }
  0x53   : > { %946 = vperm.xlu1 %3998, %v445_v37   ;;  %951 = vperm.xlu0 %3997, %v446_v38  }
  0x55   : > { %3718 = vmatmul.msk.bf16.gmra.mxu0 %vm631_vm2, %v3870_v39 }
  0x59   : > { %1036 = vperm.xlu2 %3999, %v463_v40  }
  0x5b   : > { %956 = vperm.xlu1 %3998, %v447_v41   ;;  %1001 = vperm.xlu0 %3997, %v456_v42  }
  0x61   : > { %976 = vperm.xlu2 %3999, %v451_v43  }
  0x63   : > { %991 = vperm.xlu1 %3998, %v454_v44   ;;  %1021 = vperm.xlu0 %3997, %v460_v45  }
  0x65   : > { %3719 = vmatmul.msk.bf16.gmra.mxu0 %vm631_vm2, %v3871_v46 }
  0x69   : > { %1051 = vperm.xlu2 %3999, %v466_v47  }
  0x6b   : > { %1006 = vperm.xlu1 %3998, %v457_v48   ;;  %966 = vperm.xlu0 %3997, %v449_v49  }
  0x73   : > { %1011 = vperm.xlu1 %3998, %v458_v50   ;;  %1041 = vperm.xlu0 %3997, %v464_v51   ;;  %v4372_v62 = vpop.permute.xlu2 %871 }
  0x74   : > { %6693 = vst [vmem:[#allocation7_spill] sm:$0xff] %v4372_v62 }
  0x75   : > { %3720 = vmatmul.msk.bf16.gmra.mxu0 %vm631_vm2, %v3872_v52 }
  0x7b   : > { %1026 = vperm.xlu1 %3998, %v461_v53   ;;  %981 = vperm.xlu0 %3997, %v452_v54   ;;  %v4382_v2 = vpop.permute.xlu2 %876  ;;  %v3877_v54 = vld [vmem:[%s4240_s15 + $0x50] sm:$0xff] }
  0x7c   : > { %6695 = vst [vmem:[#allocation9_spill] sm:$0xff] %v4382_v2 }
  0x83   : > { %1031 = vperm.xlu1 %3998, %v462_v55   ;;  %v4398_v11 = vpop.permute.xlu2 %891  ;;  %v3917_v55 = vld [vmem:[#allocation2] sm:$0xff]  }
  0x84   : > { %6699 = vst [vmem:[#allocation13_spill] sm:$0xff] %v4398_v11 }
  0x85   : > { %3721 = vmatmul.msk.bf16.gmra.mxu0 %vm631_vm2, %v3873_v56 }
  0x8b   : > { %971 = vperm.xlu1 %3998, %v450_v57   ;;  %v4411_v22 = vpop.permute.xlu2 %906 }
  0x8c   : > { %v4364_v58 = vpop.permute.xlu1 %861  ;;  %v4366_v59 = vpop.permute.xlu0 %851  ;;  %6702 = vst [vmem:[#allocation16_spill] sm:$0xff] %v4411_v22 }
  0x93   : > { %1046 = vperm.xlu1 %3998, %v465_v60   ;;  %v4423_v39 = vpop.permute.xlu2 %921 }
  0x94   : > { %6705 = vst [vmem:[#allocation19_spill] sm:$0xff] %v4423_v39 }
  0x95   : > { %3722 = vmatmul.msk.bf16.gmra.mxu0 %vm631_vm2, %v3874_v61  ;;  %v4375_v63 = vpop.permute.xlu1 %866  ;;  %v4380_v1 = vpop.permute.xlu0 %856 }
  0x96   : > { %6694 = vst [vmem:[#allocation8_spill] sm:$0xff] %v4375_v63 }
  0x9b   : > { %986 = vperm.xlu1 %3998, %v453_v0  }
  0x9d   : > { %v4384_v3 = vpop.permute.xlu1 %886  ;;  %v4393_v8 = vpop.permute.xlu0 %881 }
  0x9e   : > { %6696 = vst [vmem:[#allocation10_spill] sm:$0xff] %v4384_v3 }
  0x9f   : > { %6697 = vst [vmem:[#allocation11_spill] sm:$0xff] %v4393_v8 }
  0xa2   : > { %v704_v6 = vpop.f32.mrf.mxu0 }
  0xa3   : > { %v705_v7 = vadd.f32 %v4389_v4, %v704_v6  ;;  %v3936_v6 = vld [vmem:[#allocation2] sm:$0xe] }
  0xa5   : > { %v808_v9 = vmax.f32 %v705_v7, 0.0  ;;  %3723 = vmatmul.msk.bf16.gmra.mxu0 %vm631_vm2, %v3875_v5  ;;  %v4396_v10 = vpop.permute.xlu1 %901  ;;  %v4406_v19 = vpop.permute.xlu0 %896  ;;  %v3935_v5 = vld [vmem:[#allocation2] sm:$0xf0]  ;;  %v1784_v7 = vshll.u32 %v3917_v55, 16 }
  0xa6   : > { %6698 = vst [vmem:[#allocation12_spill] sm:$0xff] %v4396_v10 }
  0xa7   : > { %v1054_v13 = vmul.f32 %v4366_v59, %v808_v9  ;;  %6701 = vst [vmem:[#allocation15_spill] sm:$0xff] %v4406_v19  ;;  %v4438_v9 = vpop.permute.xlu2 %996 }
  0xa8   : > { %v4400_v12 = vpop.f32.mrf.mxu3  ;;  %6708 = vst [vmem:[#allocation22_spill] sm:$0xff] %v4438_v9 }
  0xa9   : > { %v1095_v16 = vpack.c.bf16 %v1054_v13, %v1054_v13 }
  0xaa   : > { %v706_v14 = vpop.f32.mrf.mxu0 }
  0xab   : > { %v707_v15 = vadd.f32 %v4389_v4, %v706_v14  ;;  %v1177_v23 = vunpack.c.l.b16 %v1095_v16 }
  0xad   : > { %v809_v17 = vmax.f32 %v707_v15, 0.0  ;;  %v4404_v18 = vpop.permute.xlu1 %916  ;;  %v4420_v37 = vpop.permute.xlu0 %911  ;;  %v3937_v15 = vor.u32 %v3936_v6, %v3935_v5 }
  0xae   : > { %6700 = vst [vmem:[#allocation14_spill] sm:$0xff] %v4404_v18 }
  0xaf   : > { %v1055_v20 = vmul.f32 %v4380_v1, %v809_v17  ;;  %6704 = vst [vmem:[#allocation18_spill] sm:$0xff] %v4420_v37 }
  0xb0   : > { %v4409_v21 = vpop.f32.mrf.mxu3 }
  0xb1   : > { %v1096_v24 = vpack.c.bf16 %v1055_v20, %v1055_v20 }
  0xb2   : > { %v709_v26 = vpop.f32.mrf.mxu0 }
  0xb3   : > { %v1178_v27 = vunpack.c.l.b16 %v1096_v24  ;;  %v710_v28 = vadd.f32 %v4389_v4, %v709_v26  ;;  %v1782_v24 = vshrl.u32 %v3917_v55, 16 }
  0xb5   : > { %v1218_v29 = vpack.c.b16 %v1178_v27, %v1177_v23  ;;  %3724 = vmatmul.msk.bf16.gmra.mxu0 %vm631_vm2, %v3876_v25  ;;  %v4416_v30 = vpop.permute.xlu1 %926  ;;  %v810_v33 = vmax.f32 %v710_v28, 0.0  ;;  %v4435_v60 = vpop.permute.xlu0 %931  ;;  %v1786_v25 = vrot.slane %v1784_v7, 1  ;;  %v3878_v7 = vld [vmem:[%s4240_s15 + $0x58] sm:$0xff] }
  0xb6   : > { %6703 = vst [vmem:[#allocation17_spill] sm:$0xff] %v4416_v30 }
  0xb7   : > { %v1241_v31 = vshrl.u32 %v1218_v29, 16  ;;  %v1244_v32 = vshll.u32 %v1218_v29, 16  ;;  %v1056_v41 = vmul.f32 %v4364_v58, %v810_v33  ;;  %6707 = vst [vmem:[#allocation21_spill] sm:$0xff] %v4435_v60 }
  0xb8   : > { %v4418_v34 = vpop.f32.mrf.mxu3 }
  0xb9   : > { %v1243_v35 = vrot.slane %v1241_v31, 6  ;;  %v1246_v36 = vrot.slane %v1244_v32, 7  ;;  %v1097_v48 = vpack.c.bf16 %v1056_v41, %v1056_v41  ;;  %v1994_v31 = vrot.slane %v3937_v15, 1 }
  0xba   : > { %v711_v38 = vpop.f32.mrf.mxu0 }
  0xbb   : > { %v1247_v40 = vor.u32 %v1246_v36, %v1243_v35  ;;  %v712_v42 = vadd.f32 %v4389_v4, %v711_v38  ;;  %v1179_v57 = vunpack.c.l.b16 %v1097_v48  ;;  %v1787_v38 = vor.u32 %v1786_v25, %v1782_v24 }
  0xbd   : > { %v1432_v43 = vsel %vm1431_vm5, 0, %v1247_v40  ;;  %v811_v44 = vmax.f32 %v712_v42, 0.0  ;;  %v4427_v47 = vpop.permute.xlu1 %936  ;;  %v3915_v42 = vld [vmem:[%s6581_s5 + $0x40] sm:$0xff]  ;;  %vm2785_vm5 = vcmask 654336  }
  0xbe   : > { %v1442_v45 = vunpack.c.l.b16 %v1432_v43  ;;  %v1443_v46 = vunpack.c.h.b16 %v1432_v43  ;;  %6706 = vst [vmem:[#allocation20_spill] sm:$0xff] %v4427_v47  ;;  %3194 = vmatpush.bf16.msra.mxu2 %v3915_v42 }
  0xbf   : > { %v1057_v49 = vmul.f32 %v4375_v63, %v811_v44  ;;  %v4458_v44 = vpop.permute.xlu0 %941 }
  0xc0   : > { %v1486_v50 = vpack.c.b16 %v1442_v45, %v1442_v45  ;;  %v1487_v51 = vpack.c.b16 %v1443_v46, %v1443_v46  ;;  %v4430_v52 = vpop.f32.mrf.mxu3  ;;  %6710 = vst [vmem:[#allocation24_spill] sm:$0xff] %v4458_v44 }
  0xc1   : > { %v1098_v53 = vpack.c.bf16 %v1057_v49, %v1057_v49 }
  0xc2   : > { %1575 = vst.msk [vmem:[#allocation2 + $0x8] sm:$0xf] %vm1572_vm0, %v1486_v50  ;;  %v714_v56 = vpop.f32.mrf.mxu0 }
  0xc3   : > { %1576 = vst.msk [vmem:[#allocation2 + $0xc] sm:$0xf] %vm1572_vm0, %v1487_v51  ;;  %v1180_v61 = vunpack.c.l.b16 %v1098_v53  ;;  %v715_v0 = vadd.f32 %v4389_v4, %v714_v56  ;;  %v4467_v53 = vpop.permute.xlu2 %1016 }
  0xc4   : > { %6712 = vst [vmem:[#allocation26_spill] sm:$0xff] %v4467_v53 }
  0xc5   : > { %v1219_v13 = vpack.c.b16 %v1180_v61, %v1179_v57  ;;  %3725 = vmatmul.msk.bf16.gmra.mxu0 %vm631_vm2, %v3877_v54  ;;  %v4441_v14 = vpop.permute.xlu1 %946  ;;  %v812_v20 = vmax.f32 %v715_v0, 0.0 }
  0xc6   : > { %6709 = vst [vmem:[#allocation23_spill] sm:$0xff] %v4441_v14 }
  0xc7   : > { %v1249_v16 = vshrl.u32 %v1219_v13, 16  ;;  %v1252_v17 = vshll.u32 %v1219_v13, 16  ;;  %v1058_v33 = vmul.f32 %v4372_v62, %v812_v20 }
  0xc8   : > { %v4443_v23 = vpop.f32.mrf.mxu3 }
  0xc9   : > { %v1251_v26 = vrot.slane %v1249_v16, 6  ;;  %v1254_v27 = vrot.slane %v1252_v17, 7  ;;  %v1099_v54 = vpack.c.bf16 %v1058_v33, %v1058_v33  ;;  %v1668_v55 = vld [vmem:[#allocation2 + $0x8] sm:$0xc] }
  0xca   : > { %v716_v28 = vpop.f32.mrf.mxu0  ;;  %v4445_v29 = vld [vmem:[#allocation2 + $0x8] sm:$0xff]   ;;  %v2281_v16 = vunpack.c.l.b16 %v1668_v55 }
  0xcb   : > { %v4447_v32 = vor.u32 %v1254_v27, %v1251_v26  ;;  %v717_v35 = vadd.f32 %v4389_v4, %v716_v28  ;;  %v1995_v36 = vrot.slane %v4445_v29, 1  ;;  %v1789_v41 = vshll.u32 %v4445_v29, 16  ;;  %v1663_v56 = vld [vmem:[#allocation2 + $0x8] sm:$0xe]  ;;  %v4484_v42 = vpop.permute.xlu2 %961 }
  0xcc   : > { %v3923_v15 = vunpack.c.h.b16 %v4445_v29  ;;  %v2081_v17 = vunpack.c.l.b16 %v1663_v56  ;;  %v1181_v20 = vunpack.c.l.b16 %v1099_v54  ;;  %6715 = vst [vmem:[#allocation29_spill] sm:$0xff] %v4484_v42  ;;  %v1793_v55 = vshrl.u32 %v4445_v29, 16  ;;  %v3879_v29 = vld [vmem:[%s4240_s15 + $0x60] sm:$0xff] }
  0xcd   : > { %v1256_v43 = vsel %vm1239_vm3, %v1247_v40, %v4447_v32  ;;  %v813_v45 = vmax.f32 %v717_v35, 0.0  ;;  %v1996_v49 = vsel %vm1993_vm6, %v1994_v31, %v1995_v36  ;;  %v4463_v50 = vpop.permute.xlu1 %956  ;;  %v4465_v51 = vrot.slane %v1789_v41, 1  ;;  %v4482_v35 = vpop.permute.xlu0 %951 }
  0xce   : > { %v1444_v46 = vunpack.c.l.b16 %v1256_v43  ;;  %v1445_v48 = vunpack.c.h.b16 %v1256_v43  ;;  %6711 = vst [vmem:[#allocation25_spill] sm:$0xff] %v4463_v50  ;;  %2035 = vrot.lane.b32.xlu1 %v1996_v49, %s4088_s0  ;;  %v2282_v31 = vpack.c.b16 %v3923_v15, %v2281_v16  ;;  %v2085_v33 = vpack.c.b16 %v3923_v15, %v2081_v17 }
  0xcf   : > { %v1059_v40 = vmul.f32 %v4382_v2, %v813_v45  ;;  %v1792_v0 = vsel %vm1780_vm7, %v1787_v38, %v4465_v51  ;;  %6714 = vst [vmem:[#allocation28_spill] sm:$0xff] %v4482_v35 }
  0xd0   : > { %v1488_v57 = vpack.c.b16 %v1444_v46, %v1444_v46  ;;  %v1489_v61 = vpack.c.b16 %v1445_v48, %v1445_v48  ;;  %v806_v5 = vpop.f32.mrf.mxu3  ;;  %1948 = vrot.lane.b32.xlu0 %v1792_v0, %s4089_s3  ;;  %v2284_v54 = vrot.slane %v2282_v31, 2 }
  0xd1   : > { %v1100_v6 = vpack.c.bf16 %v1059_v40, %v1059_v40  ;;  %v2088_v40 = vrot.slane %v2085_v33, 1 }
  0xd2   : > { %1577 = vst.msk [vmem:[#allocation2 + $0x10] sm:$0xf] %vm1572_vm0, %v1488_v57  ;;  %v719_v13 = vpop.f32.mrf.mxu0 }
  0xd3   : > { %1578 = vst.msk [vmem:[#allocation2 + $0x14] sm:$0xf] %vm1572_vm0, %v1489_v61  ;;  %v1182_v24 = vunpack.c.l.b16 %v1100_v6  ;;  %v720_v25 = vadd.f32 %v4389_v4, %v719_v13  ;;  %v2144_v13 = vshll.u32 %v2085_v33, 16 }
  0xd5   : > { %v1220_v26 = vpack.c.b16 %v1182_v24, %v1181_v20  ;;  %3726 = vmatmul.msk.bf16.gmra.mxu0 %vm631_vm2, %v3878_v7  ;;  %v814_v27 = vmax.f32 %v720_v25, 0.0  ;;  %v4480_v28 = vpop.permute.xlu1 %991  ;;  %v2141_v7 = vshrl.u32 %v2085_v33, 16 }
  0xd6   : > { %6713 = vst [vmem:[#allocation27_spill] sm:$0xff] %v4480_v28 }
  0xd7   : > { %v1258_v38 = vshrl.u32 %v1220_v26, 16  ;;  %v1261_v41 = vshll.u32 %v1220_v26, 16  ;;  %v1060_v46 = vmul.f32 %v4393_v8, %v814_v27 }
  0xd9   : > { %v1260_v43 = vrot.slane %v1258_v38, 6  ;;  %v1263_v45 = vrot.slane %v1261_v41, 7  ;;  %v1101_v31 = vpack.c.bf16 %v1060_v46, %v1060_v46  ;;  %v1673_v46 = vld [vmem:[#allocation2 + $0x10] sm:$0x8] }
  0xda   : > { %v721_v48 = vpop.f32.mrf.mxu0  ;;  %v4487_v49 = vld [vmem:[#allocation2 + $0x10] sm:$0xff]  }
  0xdb   : > { %v4490_v56 = vor.u32 %v1263_v45, %v1260_v43  ;;  %v722_v57 = vadd.f32 %v4389_v4, %v721_v48  ;;  %v2285_v61 = vrot.slane %v4487_v49, 2  ;;  %v4495_v0 = vrot.slane %v4487_v49, 1 }
  0xdc   : > { %v1797_v5 = vshll.u32 %v4487_v49, 16  ;;  %v1801_v6 = vshrl.u32 %v4487_v49, 16  ;;  %v2143_v48 = vrot.slane %v2141_v7, 1 }
  0xdd   : > { %v1265_v15 = vsel %vm1239_vm3, %v4447_v32, %v4490_v56  ;;  %v815_v16 = vmax.f32 %v722_v57, 0.0  ;;  %v2286_v17 = vsel %vm2283_vm8, %v2284_v54, %v2285_v61  ;;  %v2089_v20 = vsel %vm1993_vm6, %v2088_v40, %v4495_v0  ;;  %v4513_v26 = vpop.permute.xlu1 %1006  ;;  %v4517_v40 = vpop.permute.xlu0 %1001 }
  0xde   : > { %v1446_v24 = vunpack.c.l.b16 %v1265_v15  ;;  %v1447_v25 = vunpack.c.h.b16 %v1265_v15  ;;  %2325 = vrot.lane.b32.xlu1 %v2286_v17, %s4090_s20  ;;  %2094 = vrot.lane.b32.xlu2 %v2089_v20, %s4091_s26  ;;  %v1998_v32 = vsel %vm1993_vm6, %v1995_v36, %v4495_v0  ;;  %6716 = vst [vmem:[#allocation30_spill] sm:$0xff] %v4513_v26  ;;  %v2148_v27 = vrot.slane %v1801_v6, 1  ;;  %v4525_v17 = vpop.permute.xlu2 %1036 }
  0xdf   : > { %v1061_v33 = vmul.f32 %v4384_v3, %v815_v16  ;;  %2037 = vrot.lane.b32.xlu0 %v1998_v32, %s4088_s0  ;;  %v2149_v38 = vrot.slane %v1797_v5, 2  ;;  %v1799_v41 = vrot.slane %v1797_v5, 1  ;;  %v2146_v54 = vrot.slane %v2144_v13, 2  ;;  %6717 = vst [vmem:[#allocation31_spill] sm:$0xff] %v4517_v40 }
  0xe0   : > { %v1490_v43 = vpack.c.b16 %v1446_v24, %v1446_v24  ;;  %v1491_v45 = vpack.c.b16 %v1447_v25, %v1447_v25  ;;  %6718 = vst [vmem:[#allocation32_spill] sm:$0xff] %v4525_v17  ;;  %v1183_v5 = vunpack.c.l.b16 %v1101_v31  ;;  %v1795_v20 = vor.u32 %v1793_v55, %v4465_v51  ;;  %v1669_v51 = vld [vmem:[#allocation2 + $0x10] sm:$0xc] }
  0xe1   : > { %v1102_v57 = vpack.c.bf16 %v1061_v33, %v1061_v33  ;;  %v4521_v15 = vor.u32 %v2149_v38, %v2148_v27  ;;  %v4523_v16 = vor.u32 %v1801_v6, %v1799_v41  ;;  %v2147_v24 = vor.u32 %v2146_v54, %v2143_v48 }
  0xe2   : > { %1579 = vst.msk [vmem:[#allocation2 + $0x18] sm:$0xf] %vm1572_vm0, %v1490_v43  ;;  %v724_v36 = vpop.f32.mrf.mxu0  ;;  %v1800_v32 = vsel %vm1780_vm7, %v1795_v20, %v1799_v41  ;;  %v3927_v27 = vunpack.c.h.b16 %v4487_v49  ;;  %v2569_v6 = vunpack.c.l.b16 %v1673_v46  ;;  %v4541_v54 = vadd.f32 %v4389_v4, %v4443_v23 }
  0xe3   : > { %1580 = vst.msk [vmem:[#allocation2 + $0x1c] sm:$0xf] %vm1572_vm0, %v1491_v45  ;;  %v1184_v7 = vunpack.c.l.b16 %v1102_v57  ;;  %v725_v13 = vadd.f32 %v4389_v4, %v724_v36  ;;  %v2151_v33 = vsel %vm2139_vm9, %v2147_v24, %v4521_v15 }
  0xe4   : > { %v2570_v41 = vpack.c.b16 %v3927_v27, %v2569_v6 }
  0xe5   : > { %v1221_v25 = vpack.c.b16 %v1184_v7, %v1183_v5  ;;  %3727 = vmatmul.msk.bf16.gmra.mxu0 %vm631_vm2, %v3879_v29  ;;  %v4536_v31 = vpop.permute.xlu1 %1011  ;;  %v816_v45 = vmax.f32 %v725_v13, 0.0  ;;  %v4545_v36 = vpop.permute.xlu0 %1021  ;;  %v2370_v13 = vunpack.c.l.b16 %v1669_v51 }
  0xe6   : > { %1950 = vrot.lane.b32.xlu2 %v1800_v32, %s4089_s3  ;;  %6719 = vst [vmem:[#allocation33_spill] sm:$0xff] %v4536_v31  ;;  %v4559_v32 = vpop.permute.xlu2 %976 }
  0xe7   : > { %v1267_v38 = vshrl.u32 %v1221_v25, 16  ;;  %v1270_v43 = vshll.u32 %v1221_v25, 16  ;;  %2238 = vrot.lane.b32.xlu0 %v2151_v33, %s4092_s28  ;;  %6720 = vst [vmem:[#allocation34_spill] sm:$0xff] %v4545_v36  ;;  %v1062_v5 = vmul.f32 %v4398_v11, %v816_v45  ;;  %v4581_v3 = vpack.c.b16 %v3927_v27, %v2370_v13 }
  0xe8   : > { %6721 = vst [vmem:[#allocation35_spill] sm:$0xff] %v4559_v32  ;;  %v795_v13 = vadd.f32 %v4389_v4, %v4400_v12 }
  0xe9   : > { %v1269_v55 = vrot.slane %v1267_v38, 6  ;;  %v1272_v48 = vrot.slane %v1270_v43, 7  ;;  %v2572_v38 = vrot.slane %v2570_v41, 3 }
  0xea   : > { %v726_v57 = vpop.f32.mrf.mxu0  ;;  %v4543_v29 = vld [vmem:[#allocation2 + $0x18] sm:$0xff] }
  0xeb   : > { %v4547_v46 = vor.u32 %v1272_v48, %v1269_v55  ;;  %v727_v7 = vadd.f32 %v4389_v4, %v726_v57  ;;  %v6591_v20 = vrot.slane %v4543_v29, 1  ;;  %v4553_v24 = vrot.slane %v4543_v29, 2 }
  0xec   : > { %v6592_v23 = vrot.slane %v4543_v29, 3  ;;  %v4557_v25 = vshll.u32 %v4543_v29, 16  ;;  %v1809_v43 = vshrl.u32 %v4543_v29, 16 }
  0xed   : > { %v1274_v6 = vsel %vm1239_vm3, %v4490_v56, %v4547_v46  ;;  %v817_v33 = vmax.f32 %v727_v7, 0.0  ;;  %v4565_v55 = vpop.permute.xlu1 %1026  ;;  %v2000_v48 = vsel %vm1993_vm6, %v4495_v0, %v6591_v20  ;;  %v2288_v57 = vsel %vm2283_vm8, %v2285_v61, %v4553_v24  ;;  %v3880_v0 = vld [vmem:[%s4240_s15 + $0x68] sm:$0xff] }
  0xee   : > { %v1448_v45 = vunpack.c.l.b16 %v1274_v6  ;;  %v1449_v51 = vunpack.c.h.b16 %v1274_v6  ;;  %6722 = vst [vmem:[#allocation36_spill] sm:$0xff] %v4565_v55  ;;  %v1103_v56 = vpack.c.bf16 %v1062_v5, %v1062_v5  ;;  %2096 = vrot.lane.b32.xlu1 %v2000_v48, %s4091_s26  ;;  %v2574_v7 = vsel %vm2571_vm10, %v2572_v38, %v6592_v23 }
  0xef   : > { %v1063_v41 = vmul.f32 %v4406_v19, %v817_v33  ;;  %2327 = vrot.lane.b32.xlu0 %v2288_v57, %s4090_s20  ;;  %3844 = vmatmul.msk.bf16.vlgmr.msra.gmra.mxu2 %vm2613_vm11, %v2574_v7  ;;  %v1807_v49 = vrot.slane %v4557_v25, 1  ;;  %v2152_v5 = vrot.slane %v1809_v43, 1  ;;  %v2153_v33 = vrot.slane %v4557_v25, 2 }
  0xf0   : > { %v1492_v6 = vpack.c.b16 %v1448_v45, %v1448_v45  ;;  %v1493_v11 = vpack.c.b16 %v1449_v51, %v1449_v51  ;;  %v797_v57 = vadd.f32 %v4389_v4, %v4409_v21  ;;  %v1185_v45 = vunpack.c.l.b16 %v1103_v56 }
  0xf1   : > { %v1104_v61 = vpack.c.bf16 %v1063_v41, %v1063_v41  ;;  %v4592_v38 = vsel %vm1780_vm7, %v4523_v16, %v1807_v49  ;;  %v4594_v27 = vor.u32 %v1809_v43, %v1807_v49  ;;  %v848_v21 = vmax.f32 %v4541_v54, 0.0  ;;  %v4605_v16 = vpop.permute.xlu0 %966 }
  0xf2   : > { %1581 = vst.msk [vmem:[#allocation2 + $0x20] sm:$0xf] %vm1572_vm0, %v1492_v6  ;;  %v729_v20 = vpop.f32.mrf.mxu0  ;;  %v2429_v7 = vshrl.u32 %v4581_v3, 16  ;;  %v2432_v6 = vshll.u32 %v4581_v3, 16  ;;  %v4603_v23 = vor.u32 %v2153_v33, %v2152_v5  ;;  %v845_v12 = vmax.f32 %v797_v57, 0.0 }
  0xf3   : > { %1582 = vst.msk [vmem:[#allocation2 + $0x24] sm:$0xf] %vm1572_vm0, %v1493_v11  ;;  %v1186_v51 = vunpack.c.l.b16 %v1104_v61  ;;  %v730_v41 = vadd.f32 %v4389_v4, %v729_v20  ;;  %v2436_v11 = vrot.slane %v1809_v43, 2  ;;  %v2437_v56 = vrot.slane %v4557_v25, 3  ;;  %v4616_v61 = vpop.permute.xlu2 %1051 }
  0xf4   : > { %6723 = vst [vmem:[#allocation37_spill] sm:$0xff] %v4605_v16  ;;  %v4614_v54 = vsel %vm2139_vm9, %v4521_v15, %v4603_v23  ;;  %v844_v20 = vmax.f32 %v795_v13, 0.0  ;;  %v2431_v57 = vrot.slane %v2429_v7, 2  ;;  %v800_v25 = vadd.f32 %v4389_v4, %v4418_v34 }
  0xf5   : > { %v1222_v49 = vpack.c.b16 %v1186_v51, %v1185_v45  ;;  %3728 = vmatmul.msk.bf16.gmra.mxu0 %vm631_vm2, %v3880_v0  ;;  %v4608_v19 = vpop.permute.xlu1 %1031  ;;  %6725 = vst [vmem:[#allocation39_spill] sm:$0xff] %v4616_v61  ;;  %v818_v8 = vmax.f32 %v730_v41, 0.0  ;;  %v1094_v0 = vmul.f32 %v4616_v61, %v848_v21  ;;  %v2434_v45 = vrot.slane %v2432_v6, 3 }
  0xf6   : > { %6724 = vst [vmem:[#allocation38_spill] sm:$0xff] %v4608_v19  ;;  %v1090_v15 = vmul.f32 %v4608_v19, %v844_v20  ;;  %v1091_v13 = vmul.f32 %v4525_v17, %v845_v12 }
  0xf7   : > { %v1276_v5 = vshrl.u32 %v1222_v49, 16  ;;  %v1279_v33 = vshll.u32 %v1222_v49, 16  ;;  %2039 = vrot.lane.b32.xlu0 %v2000_v48, %s4088_s0  ;;  %v4626_v49 = vor.u32 %v2437_v56, %v2436_v11  ;;  %v1064_v48 = vmul.f32 %v4396_v10, %v818_v8 }
  0xf8   : > { %v1135_v7 = vpack.c.bf16 %v1094_v0, %v1094_v0  ;;  %v2435_v6 = vor.u32 %v2434_v45, %v2431_v57  ;;  %v1131_v20 = vpack.c.bf16 %v1090_v15, %v1090_v15  ;;  %v1132_v57 = vpack.c.bf16 %v1091_v13, %v1091_v13 }
  0xf9   : > { %v1278_v43 = vrot.slane %v1276_v5, 6  ;;  %v1281_v51 = vrot.slane %v1279_v33, 7  ;;  %v846_v5 = vmax.f32 %v800_v25, 0.0  ;;  %v4645_v45 = vpop.permute.xlu0 %1041 }
  0xfa   : > { %v731_v2 = vpop.f32.mrf.mxu0  ;;  %v4624_v62 = vld [vmem:[#allocation2 + $0x20] sm:$0xff]  ;;  %v2439_v0 = vsel %vm2427_vm12, %v2435_v6, %v4626_v49  ;;  %6728 = vst [vmem:[#allocation41_spill] sm:$0xff] %v4645_v45  ;;  %v3881_v6 = vld [vmem:[%s4240_s15 + $0x70] sm:$0xff] }
  0xfb   : > { %v4628_v41 = vor.u32 %v1281_v51, %v1278_v43  ;;  %v732_v21 = vadd.f32 %v4389_v4, %v731_v2  ;;  %v6597_v34 = vrot.slane %v4624_v62, 3  ;;  %v6727_v2 = vrot.slane %v4543_v29, 3 }
  0xfc   : > { %v1217_v51 = vunpack.c.l.b16 %v1135_v7  ;;  %v1092_v13 = vmul.f32 %v4645_v45, %v846_v5 }
  0xfd   : > { %v1283_v12 = vsel %vm1239_vm3, %v4547_v46, %v4628_v41  ;;  %v819_v33 = vmax.f32 %v732_v21, 0.0  ;;  %v4636_v43 = vpop.permute.xlu1 %971  ;;  %v2576_v8 = vsel %vm2571_vm10, %v6727_v2, %v6597_v34  ;;  %v1105_v46 = vpack.c.bf16 %v1064_v48, %v1064_v48 }
  0xfe   : > { %v1450_v11 = vunpack.c.l.b16 %v1283_v12  ;;  %v1451_v56 = vunpack.c.h.b16 %v1283_v12  ;;  %6726 = vst [vmem:[#allocation40_spill] sm:$0xff] %v4636_v43  ;;  %v802_v12 = vadd.f32 %v4389_v4, %v4430_v52  ;;  %v1213_v2 = vunpack.c.l.b16 %v1131_v20 }
  0xff   : > { %v1065_v25 = vmul.f32 %v4411_v22, %v819_v33  ;;  %2526 = vrot.lane.b32.xlu0 %v2439_v0, %s4093_s16  ;;  %3845 = vmatmul.msk.bf16.gmra.mxu2 %vm2613_vm11, %v2576_v8  ;;  %v1214_v33 = vunpack.c.l.b16 %v1132_v57  ;;  %v1187_v0 = vunpack.c.l.b16 %v1105_v46  ;;  %v1133_v52 = vpack.c.bf16 %v1092_v13, %v1092_v13 }
 0x100   : > { %v1494_v15 = vpack.c.b16 %v1450_v11, %v1450_v11  ;;  %v1495_v21 = vpack.c.b16 %v1451_v56, %v1451_v56  ;;  %v1238_v56 = vpack.c.b16 %v1217_v51, %v1217_v51  ;;  %v847_v8 = vmax.f32 %v802_v12, 0.0 }
 0x101   : > { %v1106_v34 = vpack.c.bf16 %v1065_v25, %v1065_v25  ;;  %v1236_v61 = vpack.c.b16 %v1214_v33, %v1213_v2  ;;  %v1215_v51 = vunpack.c.l.b16 %v1133_v52 }
 0x102   : > { %1583 = vst.msk [vmem:[#allocation2 + $0x28] sm:$0xf] %vm1572_vm0, %v1494_v15  ;;  %v734_v48 = vpop.f32.mrf.mxu0  ;;  %v1420_v45 = vshrl.u32 %v1238_v56, 16 }
 0x103   : > { %1584 = vst.msk [vmem:[#allocation2 + $0x2c] sm:$0xf] %vm1572_vm0, %v1495_v21  ;;  %v1188_v7 = vunpack.c.l.b16 %v1106_v34  ;;  %v735_v11 = vadd.f32 %v4389_v4, %v734_v48  ;;  %v1423_v21 = vshll.u32 %v1238_v56, 16  ;;  %v1402_v46 = vshrl.u32 %v1236_v61, 16 }
 0x104   : > { %v1405_v12 = vshll.u32 %v1236_v61, 16 }
 0x105   : > { %v1223_v17 = vpack.c.b16 %v1188_v7, %v1187_v0  ;;  %3729 = vmatmul.msk.bf16.gmra.mxu0 %vm631_vm2, %v3881_v6  ;;  %v4658_v20 = vpop.permute.xlu1 %1046  ;;  %v820_v15 = vmax.f32 %v735_v11, 0.0  ;;  %v1422_v7 = vrot.slane %v1420_v45, 6  ;;  %v1425_v11 = vrot.slane %v1423_v21, 7 }
 0x106   : > { %6729 = vst [vmem:[#allocation42_spill] sm:$0xff] %v4658_v20  ;;  %v1093_v57 = vmul.f32 %v4658_v20, %v847_v8  ;;  %v1404_v8 = vrot.slane %v1402_v46, 6 }
 0x107   : > { %v1285_v5 = vshrl.u32 %v1223_v17, 16  ;;  %v1288_v25 = vshll.u32 %v1223_v17, 16  ;;  %v1066_v13 = vmul.f32 %v4420_v37, %v820_v15  ;;  %v6730_v15 = vrot.slane %v4624_v62, 3 }
 0x108   : > { %v1134_v48 = vpack.c.bf16 %v1093_v57, %v1093_v57 }
 0x109   : > { %v1287_v34 = vrot.slane %v1285_v5, 6  ;;  %v1290_v19 = vrot.slane %v1288_v25, 7  ;;  %v1407_v25 = vrot.slane %v1405_v12, 7  ;;  %v1107_v21 = vpack.c.bf16 %v1066_v13, %v1066_v13 }
 0x10a   : > { %v736_v2 = vpop.f32.mrf.mxu0  ;;  %v4661_v33 = vld [vmem:[#allocation2 + $0x28] sm:$0xff]  ;;  %v1216_v0 = vunpack.c.l.b16 %v1134_v48 }
 0x10b   : > { %v4663_v6 = vor.u32 %v1290_v19, %v1287_v34  ;;  %v737_v17 = vadd.f32 %v4389_v4, %v736_v2  ;;  %v6603_v56 = vrot.slane %v4661_v33, 3 }
 0x10c   : > { %v1237_v61 = vpack.c.b16 %v1216_v0, %v1215_v51  ;;  %v3882_v0 = vld [vmem:[%s4240_s15 + $0x78] sm:$0xff] }
 0x10d   : > { %v1292_v52 = vsel %vm1239_vm3, %v4628_v41, %v4663_v6  ;;  %v821_v5 = vmax.f32 %v737_v17, 0.0  ;;  %v2578_v45 = vsel %vm2571_vm10, %v6730_v15, %v6603_v56  ;;  %v1426_v17 = vor.u32 %v1425_v11, %v1422_v7 }
 0x10e   : > { %v1452_v19 = vunpack.c.l.b16 %v1292_v52  ;;  %v1453_v57 = vunpack.c.h.b16 %v1292_v52  ;;  %v1411_v34 = vshrl.u32 %v1237_v61, 16  ;;  %v1414_v48 = vshll.u32 %v1237_v61, 16 }
 0x10f   : > { %v1067_v46 = vmul.f32 %v4404_v18, %v821_v5  ;;  %3846 = vmatmul.msk.bf16.gmra.mxu2 %vm2613_vm11, %v2578_v45  ;;  %v4679_v52 = vor.u32 %v1407_v25, %v1404_v8  ;;  %v1189_v61 = vunpack.c.l.b16 %v1107_v21  ;;  %v2376_v18 = vrot.slane %v4581_v3, 2 }
 0x110   : > { %v1496_v2 = vpack.c.b16 %v1452_v19, %v1452_v19  ;;  %v1497_v20 = vpack.c.b16 %v1453_v57, %v1453_v57  ;;  %v1413_v41 = vrot.slane %v1411_v34, 6  ;;  %v1416_v51 = vrot.slane %v1414_v48, 7 }
 0x111   : > { %v1108_v12 = vpack.c.bf16 %v1067_v46, %v1067_v46 }
 0x112   : > { %1585 = vst.msk [vmem:[#allocation2 + $0x30] sm:$0xf] %vm1572_vm0, %v1496_v2  ;;  %v739_v13 = vpop.f32.mrf.mxu0  ;;  %v1417_v5 = vor.u32 %v1416_v51, %v1413_v41 }
 0x113   : > { %1586 = vst.msk [vmem:[#allocation2 + $0x34] sm:$0xf] %vm1572_vm0, %v1497_v20  ;;  %v1190_v19 = vunpack.c.l.b16 %v1108_v12  ;;  %v740_v57 = vadd.f32 %v4389_v4, %v739_v13 }
 0x114   : > { %v1418_v15 = vsel %vm1239_vm3, %v4679_v52, %v1417_v5  ;;  %v1427_v45 = vsel %vm1239_vm3, %v1417_v5, %v1426_v17 }
 0x115   : > { %v1224_v7 = vpack.c.b16 %v1190_v19, %v1189_v61  ;;  %3730 = vmatmul.msk.bf16.gmra.mxu0 %vm631_vm2, %v3882_v0  ;;  %v1436_v11 = vsel %vm1435_vm15, %v1427_v45, 0  ;;  %v1480_v8 = vunpack.c.l.b16 %v1418_v15  ;;  %v1481_v25 = vunpack.c.h.b16 %v1418_v15 }
 0x116   : > { %v822_v34 = vmax.f32 %v740_v57, 0.0  ;;  %v1482_v20 = vunpack.c.l.b16 %v1436_v11  ;;  %v1483_v21 = vunpack.c.h.b16 %v1436_v11  ;;  %vm2871_vm15 = vcmask 916480  }
 0x117   : > { %v1294_v48 = vshrl.u32 %v1224_v7, 16  ;;  %v1297_v46 = vshll.u32 %v1224_v7, 16  ;;  %v1524_v2 = vpack.c.b16 %v1480_v8, %v1480_v8  ;;  %v1525_v41 = vpack.c.b16 %v1481_v25, %v1481_v25 }
 0x118   : > { %v1526_v51 = vpack.c.b16 %v1482_v20, %v1482_v20  ;;  %v1527_v12 = vpack.c.b16 %v1483_v21, %v1483_v21  ;;  %v1068_v5 = vmul.f32 %v4423_v39, %v822_v34 }
 0x119   : > { %v1296_v13 = vrot.slane %v1294_v48, 6  ;;  %v1299_v56 = vrot.slane %v1297_v46, 7  ;;  %1613 = vst.msk [vmem:[#allocation2 + $0xa0] sm:$0xf] %vm1572_vm0, %v1524_v2  ;;  %v3883_v46 = vld [vmem:[%s4240_s15 + $0x80] sm:$0xff] }
 0x11a   : > { %v741_v17 = vpop.f32.mrf.mxu0  ;;  %v4690_v61 = vld [vmem:[#allocation2 + $0x30] sm:$0xff]  ;;  %1614 = vst.msk [vmem:[#allocation2 + $0xa4] sm:$0xf] %vm1572_vm0, %v1525_v41  ;;  %v1109_v25 = vpack.c.bf16 %v1068_v5, %v1068_v5 }
 0x11b   : > { %v4693_v0 = vor.u32 %v1299_v56, %v1296_v13  ;;  %v742_v19 = vadd.f32 %v4389_v4, %v741_v17  ;;  %1615 = vst.msk [vmem:[#allocation2 + $0xa8] sm:$0xf] %vm1572_vm0, %v1526_v51  ;;  %v6604_v57 = vrot.slane %v4690_v61, 3  ;;  %v6731_v56 = vrot.slane %v4661_v33, 3 }
 0x11c   : > { %1616 = vst.msk [vmem:[#allocation2 + $0xac] sm:$0xf] %vm1572_vm0, %v1527_v12  ;;  %v1191_v41 = vunpack.c.l.b16 %v1109_v25 }
 0x11d   : > { %v1301_v15 = vsel %vm1239_vm3, %v4663_v6, %v4693_v0  ;;  %v823_v45 = vmax.f32 %v742_v19, 0.0  ;;  %v2580_v8 = vsel %vm2571_vm10, %v6731_v56, %v6604_v57 }
 0x11e   : > { %v1454_v7 = vunpack.c.l.b16 %v1301_v15  ;;  %v1455_v11 = vunpack.c.h.b16 %v1301_v15 }
 0x11f   : > { %v1069_v34 = vmul.f32 %v4416_v30, %v823_v45  ;;  %3847 = vmatmul.msk.bf16.gmra.mxu2 %vm2613_vm11, %v2580_v8 }
 0x120   : > { %v1498_v20 = vpack.c.b16 %v1454_v7, %v1454_v7  ;;  %v1499_v21 = vpack.c.b16 %v1455_v11, %v1455_v11 }
 0x121   : > { %v1110_v48 = vpack.c.bf16 %v1069_v34, %v1069_v34  ;;  %v4712_v2 = vld [vmem:[#allocation2 + $0xa0] sm:$0xff] }
 0x122   : > { %1587 = vst.msk [vmem:[#allocation2 + $0x38] sm:$0xf] %vm1572_vm0, %v1498_v20  ;;  %v744_v6 = vpop.f32.mrf.mxu0  ;;  %v4719_v17 = vrot.slane %v4712_v2, 2  ;;  %v2221_v5 = vshrl.u32 %v4712_v2, 16  ;;  %v2224_v19 = vshll.u32 %v4712_v2, 16 }
 0x123   : > { %6732 = vst [vmem:[#allocation43_spill] sm:$0xff] %v4712_v2  ;;  %v1192_v51 = vunpack.c.l.b16 %v1110_v48  ;;  %v745_v12 = vadd.f32 %v4389_v4, %v744_v6  ;;  %v4716_v13 = vld [vmem:[#allocation2 + $0xa8] sm:$0xff]  }
 0x124   : > { %1588 = vst.msk [vmem:[#allocation2 + $0x3c] sm:$0xf] %vm1572_vm0, %v1499_v21  ;;  %v1666_v15 = vld [vmem:[#allocation2 + $0xa8] sm:$0x7]  ;;  %v6610_v11 = vrot.slane %v4716_v13, 2  ;;  %v2509_v56 = vshrl.u32 %v4716_v13, 16  ;;  %v3930_v20 = vunpack.c.l.b16 %v4716_v13 }
 0x125   : > { %6733 = vst [vmem:[#allocation44_spill] sm:$0xff] %v4716_v13  ;;  %v1225_v45 = vpack.c.b16 %v1192_v51, %v1191_v41  ;;  %v824_v7 = vmax.f32 %v745_v12, 0.0  ;;  %3731 = vmatmul.msk.bf16.gmra.mxu0 %vm631_vm2, %v3883_v46  ;;  %v2504_v8 = vrot.slane %v2221_v5, 2  ;;  %v2505_v25 = vrot.slane %v2224_v19, 3 }
 0x126   : > { %v2512_v34 = vshll.u32 %v4716_v13, 16  ;;  %v2379_v6 = vsel %vm2283_vm8, %v4719_v17, %v6610_v11  ;;  %v2084_v41 = vunpack.c.l.b16 %v1666_v15  ;;  %v2511_v51 = vrot.slane %v2509_v56, 2 }
 0x127   : > { %v1303_v21 = vshrl.u32 %v1225_v45, 16  ;;  %v1306_v48 = vshll.u32 %v1225_v45, 16  ;;  %2418 = vrot.lane.b32.xlu2 %v2379_v6, %s4094_s30  ;;  %v4733_v46 = vor.u32 %v2505_v25, %v2504_v8  ;;  %v4735_v57 = vpack.c.b16 %v3930_v20, %v3930_v20 }
 0x128   : > { %v2514_v12 = vrot.slane %v2512_v34, 3  ;;  %v1070_v45 = vmul.f32 %v4435_v60, %v824_v7  ;;  %v2223_v34 = vrot.slane %v2221_v5, 1  ;;  %v2226_v20 = vrot.slane %v2224_v19, 2 }
 0x129   : > { %6734 = vst [vmem:[#allocation45_spill] sm:$0xff] %v4733_v46  ;;  %v1305_v30 = vrot.slane %v1303_v21, 6  ;;  %v1308_v39 = vrot.slane %v1306_v48, 7  ;;  %v2230_v15 = vshrl.u32 %v4735_v57, 16  ;;  %v2233_v8 = vshll.u32 %v4735_v57, 16 }
 0x12a   : > { %6735 = vst [vmem:[#allocation46_spill] sm:$0xff] %v4735_v57  ;;  %v746_v37 = vpop.f32.mrf.mxu0  ;;  %v4739_v22 = vor.u32 %v2514_v12, %v2511_v51  ;;  %v4750_v48 = vpack.c.b16 %v2084_v41, %v2084_v41  ;;  %v6738_v5 = vrot.slane %v4690_v61, 3  ;;  %v2377_v41 = vsel %vm2283_vm8, %v2376_v18, %v4553_v24 }
 0x12b   : > { %v4741_v11 = vld [vmem:[#allocation2 + $0x38] sm:$0xff]  ;;  %v1309_v25 = vor.u32 %v1308_v39, %v1305_v30  ;;  %v747_v56 = vadd.f32 %v4389_v4, %v746_v37  ;;  %v2232_v21 = vrot.slane %v2230_v15, 1  ;;  %v2235_v30 = vrot.slane %v2233_v8, 2 }
 0x12c   : > { %6736 = vst [vmem:[#allocation47_spill] sm:$0xff] %v4739_v22  ;;  %v2516_v3 = vsel %vm2427_vm12, %v4733_v46, %v4739_v22  ;;  %v2581_v7 = vrot.slane %v4741_v11, 3  ;;  %v1111_v12 = vpack.c.bf16 %v1070_v45, %v1070_v45  ;;  %v3884_v45 = vld [vmem:[%s4240_s15 + $0x88] sm:$0xff]  ;;  %s415_s15 = sand.u32 1, %s4077_s22  }
 0x12d   : > { %6737 = vst [vmem:[#allocation48_spill] sm:$0xff] %v4750_v48  ;;  %v1310_v6 = vsel %vm1239_vm3, %v4693_v0, %v1309_v25  ;;  %v825_v51 = vmax.f32 %v747_v56, 0.0  ;;  %2562 = vrot.lane.b32.xlu1 %v2516_v3, %s4093_s16  ;;  %v4763_v0 = vor.u32 %v2226_v20, %v2223_v34  ;;  %v4765_v56 = vor.u32 %v2235_v30, %v2232_v21 }
 0x12e   : > { %v1456_v37 = vunpack.c.l.b16 %v1310_v6  ;;  %v1457_v39 = vunpack.c.h.b16 %v1310_v6  ;;  %v2582_v19 = vsel %vm2571_vm10, %v6738_v5, %v2581_v7  ;;  %v6613_v6 = vrot.slane %v4750_v48, 1 }
 0x12f   : > { %v1071_v15 = vmul.f32 %v4427_v47, %v825_v51  ;;  %6739 = vst [vmem:[#allocation49_spill] sm:$0xff] %v4765_v56  ;;  %3848 = vmatmul.msk.bf16.gmra.mxu2 %vm2613_vm11, %v2582_v19  ;;  %2382 = vrot.lane.b32.xlu2 %v2377_v41, %s4094_s30  ;;  %v2237_v18 = vsel %vm2139_vm9, %v4763_v0, %v4765_v56  ;;  %v6614_v20 = vrot.slane %v4712_v2, 1  ;;  %v1193_v21 = vunpack.c.l.b16 %v1111_v12  ;;  %v4007_v2 = vld [vmem:[#allocation2 + $0x18] sm:$0xff] }
 0x130   : > { %v1500_v8 = vpack.c.b16 %v1456_v37, %v1456_v37  ;;  %v1501_v3 = vpack.c.b16 %v1457_v39, %v1457_v39  ;;  %2276 = vrot.lane.b32.xlu0 %v2237_v18, %s4092_s28  ;;  %v6612_v37 = vrot.slane %v4735_v57, 2  ;;  %v2289_v19 = vrot.slane %v4624_v62, 2 }
 0x131   : > { %v1112_v60 = vpack.c.bf16 %v1071_v15, %v1071_v15  ;;  %v2093_v39 = vsel %vm1993_vm6, %v6614_v20, %v6613_v6 }
 0x132   : > { %1589 = vst.msk [vmem:[#allocation2 + $0x40] sm:$0xf] %vm1572_vm0, %v1500_v8  ;;  %v749_v34 = vpop.f32.mrf.mxu0 }
 0x133   : > { %1590 = vst.msk [vmem:[#allocation2 + $0x44] sm:$0xf] %vm1572_vm0, %v1501_v3  ;;  %v1194_v51 = vunpack.c.l.b16 %v1112_v60  ;;  %v750_v30 = vadd.f32 %v4389_v4, %v749_v34  ;;  %v2324_v4 = vsel %vm2283_vm8, %v4719_v17, %v6612_v37  ;;  %v2290_v3 = vsel %vm2283_vm8, %v4553_v24, %v2289_v19  ;;  %v1671_v34 = vld [vmem:[#allocation2 + $0xb0] sm:$0xf] }
 0x135   : > { %v1226_v5 = vpack.c.b16 %v1194_v51, %v1193_v21  ;;  %2132 = vrot.lane.b32.xlu1 %v2093_v39, %s4091_s26  ;;  %3732 = vmatmul.msk.bf16.gmra.mxu0 %vm631_vm2, %v3884_v45  ;;  %v826_v60 = vmax.f32 %v750_v30, 0.0  ;;  %v4802_v30 = vld [vmem:[%s6580_s4] ss:$0 sm:$0xff] }
 0x137   : > { %v1312_v41 = vshrl.u32 %v1226_v5, 16  ;;  %v1315_v12 = vshll.u32 %v1226_v5, 16  ;;  %2363 = vrot.lane.b32.xlu2 %v2324_v4, %s4090_s20  ;;  %v1072_v51 = vmul.f32 %v4458_v44, %v826_v60  ;;  %v1672_v5 = vld [vmem:[#allocation2 + $0xb4] sm:$0x1]  ;;  %v6620_v4 = vrot.slane %v4624_v62, 1 }
 0x138   : > { %2329 = vrot.lane.b32.xlu0 %v2290_v3, %s4090_s20  ;;  %v2425_v6 = vunpack.c.l.b16 %v1672_v5 }
 0x139   : > { %v1314_v15 = vrot.slane %v1312_v41, 6  ;;  %v1317_v8 = vrot.slane %v1315_v12, 7 }
 0x13a   : > { %v751_v18 = vpop.f32.mrf.mxu0  ;;  %v4796_v45 = vld [vmem:[#allocation2 + $0x40] sm:$0xff] }
 0x13b   : > { %v1318_v21 = vor.u32 %v1317_v8, %v1314_v15  ;;  %v752_v39 = vadd.f32 %v4802_v30, %v751_v18  ;;  %v2583_v41 = vrot.slane %v4796_v45, 3  ;;  %v4809_v15 = vunpack.c.l.b16 %v1671_v34 }
 0x13c   : > { %v1113_v18 = vpack.c.bf16 %v1072_v51, %v1072_v51 }
 0x13d   : > { %v1319_v24 = vsel %vm1239_vm3, %v1309_v25, %v1318_v21  ;;  %v827_v12 = vmax.f32 %v752_v39, 0.0  ;;  %2384 = vrot.lane.b32.xlu1 %v2290_v3, %s4094_s30  ;;  %v2584_v37 = vsel %vm2571_vm10, %v2581_v7, %v2583_v41  ;;  %v6740_v3 = vrot.slane %v4543_v29, 1 }
 0x13e   : > { %v1458_v60 = vunpack.c.l.b16 %v1319_v24  ;;  %v1459_v8 = vunpack.c.h.b16 %v1319_v24  ;;  %v4826_v51 = vpack.c.b16 %v2425_v6, %v4809_v15  ;;  %v6619_v29 = vrot.slane %v4661_v33, 2 }
 0x13f   : > { %v1073_v20 = vmul.f32 %v4441_v14, %v827_v12  ;;  %3849 = vmatmul.msk.bf16.gmra.mxu2 %vm2613_vm11, %v2584_v37  ;;  %1952 = vrot.lane.b32.xlu2 %v4592_v38, %s4089_s3  ;;  %v2002_v34 = vsel %vm1993_vm6, %v6740_v3, %v6620_v4  ;;  %v1195_v37 = vunpack.c.l.b16 %v1113_v18  ;;  %v4835_v6 = vshll.u32 %v4624_v62, 16 }
 0x140   : > { %v1502_v44 = vpack.c.b16 %v1458_v60, %v1458_v60  ;;  %v1503_v47 = vpack.c.b16 %v1459_v8, %v1459_v8  ;;  %2041 = vrot.lane.b32.xlu0 %v2002_v34, %s4088_s0  ;;  %v4850_v3 = vshrl.u32 %v4624_v62, 16 }
 0x141   : > { %v1114_v25 = vpack.c.bf16 %v1073_v20, %v1073_v20  ;;  %v6618_v20 = vrot.slane %v4716_v13, 3 }
 0x142   : > { %1591 = vst.msk [vmem:[#allocation2 + $0x48] sm:$0xf] %vm1572_vm0, %v1502_v44  ;;  %v754_v7 = vpop.f32.mrf.mxu0  ;;  %v6617_v44 = vrot.slane %v4826_v51, 3 }
 0x143   : > { %1592 = vst.msk [vmem:[#allocation2 + $0x4c] sm:$0xf] %vm1572_vm0, %v1503_v47  ;;  %v1196_v39 = vunpack.c.l.b16 %v1114_v25  ;;  %v755_v38 = vadd.f32 %v4802_v30, %v754_v7  ;;  %v2292_v25 = vsel %vm2283_vm8, %v2289_v19, %v6619_v29 }
 0x144   : > { %v4844_v47 = vsel %vm2571_vm10, %v6618_v20, %v6617_v44  ;;  %v2441_v20 = vrot.slane %v4835_v6, 3 }
 0x145   : > { %v1227_v5 = vpack.c.b16 %v1196_v39, %v1195_v37  ;;  %2098 = vrot.lane.b32.xlu1 %v2002_v34, %s4091_s26  ;;  %v828_v60 = vmax.f32 %v755_v38, 0.0  ;;  %6741 = vst [vmem:[#allocation50_spill] sm:$0xff] %v4844_v47  ;;  %v6623_v38 = vrot.slane %v4835_v6, 1 }
 0x147   : > { %v1321_v24 = vshrl.u32 %v1227_v5, 16  ;;  %v1324_v12 = vshll.u32 %v1227_v5, 16  ;;  %2240 = vrot.lane.b32.xlu2 %v4614_v54, %s4092_s28  ;;  %v1074_v37 = vmul.f32 %v4482_v35, %v828_v60  ;;  %v3912_v35 = vld [vmem:[%s6581_s5 + $0x28] sm:$0xff] }
 0x148   : > { %2331 = vrot.lane.b32.xlu0 %v2292_v25, %s4090_s20 }
 0x149   : > { %v1323_v8 = vrot.slane %v1321_v24, 6  ;;  %v1326_v18 = vrot.slane %v1324_v12, 7  ;;  %v1115_v29 = vpack.c.bf16 %v1074_v37, %v1074_v37  ;;  %v6742_v37 = vrot.slane %v4661_v33, 1 }
 0x14a   : > { %v756_v34 = vpop.f32.mrf.mxu0  ;;  %v4853_v54 = vld [vmem:[#allocation2 + $0x48] sm:$0xff] }
 0x14b   : > { %v4855_v7 = vor.u32 %v1326_v18, %v1323_v8  ;;  %v757_v39 = vadd.f32 %v4802_v30, %v756_v34  ;;  %v6621_v5 = vrot.slane %v4853_v54, 3  ;;  %v4862_v19 = vshll.u32 %v4853_v54, 16 }
 0x14c   : > { %v2440_v18 = vrot.slane %v4850_v3, 2 }
 0x14d   : > { %v1328_v24 = vsel %vm1239_vm3, %v1318_v21, %v4855_v7  ;;  %v829_v12 = vmax.f32 %v757_v39, 0.0  ;;  %2386 = vrot.lane.b32.xlu1 %v2292_v25, %s4094_s30  ;;  %v2586_v34 = vsel %vm2571_vm10, %v2583_v41, %v6621_v5  ;;  %v1816_v21 = vsel %vm1780_vm7, %v4594_v27, %v6623_v38 }
 0x14e   : > { %v1460_v60 = vunpack.c.l.b16 %v1328_v24  ;;  %v1461_v44 = vunpack.c.h.b16 %v1328_v24  ;;  %v6622_v25 = vrot.slane %v4862_v19, 1  ;;  %v4882_v41 = vshrl.u32 %v4853_v54, 16 }
 0x14f   : > { %v1075_v4 = vmul.f32 %v4463_v50, %v829_v12  ;;  %3850 = vmatmul.msk.bf16.gmra.mxu2 %vm2613_vm11, %v2586_v34  ;;  %1954 = vrot.lane.b32.xlu2 %v1816_v21, %s4089_s3  ;;  %v6743_v12 = vrot.slane %v4624_v62, 1  ;;  %v4898_v34 = vpop.permute.xlu0 %981 }
 0x150   : > { %v1504_v39 = vpack.c.b16 %v1460_v60, %v1460_v60  ;;  %v1505_v8 = vpack.c.b16 %v1461_v44, %v1461_v44  ;;  %v4891_v44 = vor.u32 %v2441_v20, %v2440_v18  ;;  %v4896_v60 = vor.u32 %v4882_v41, %v6622_v25  ;;  %6744 = vst [vmem:[#allocation51_spill] sm:$0xff] %v4898_v34 }
 0x151   : > { %v1116_v24 = vpack.c.bf16 %v1075_v4, %v1075_v4  ;;  %v2004_v5 = vsel %vm1993_vm6, %v6743_v12, %v6742_v37  ;;  %v1197_v4 = vunpack.c.l.b16 %v1115_v29  ;;  %v6625_v20 = vrot.slane %v4690_v61, 2 }
 0x152   : > { %1593 = vst.msk [vmem:[#allocation2 + $0x50] sm:$0xf] %vm1572_vm0, %v1504_v39  ;;  %2043 = vrot.lane.b32.xlu0 %v2004_v5, %s4088_s0  ;;  %v759_v27 = vpop.f32.mrf.mxu0  ;;  %v3914_v39 = vld [vmem:[%s6581_s5 + $0x38] sm:$0xff]  ;;  %v2443_v18 = vsel %vm2427_vm12, %v4626_v49, %v4891_v44  ;;  %v2156_v12 = vrot.slane %v4850_v3, 1  ;;  %v2157_v29 = vrot.slane %v4835_v6, 2  ;;  %v4913_v25 = vshll.u32 %v4661_v33, 16 }
 0x153   : > { %1594 = vst.msk [vmem:[#allocation2 + $0x54] sm:$0xf] %vm1572_vm0, %v1505_v8  ;;  %v1198_v62 = vunpack.c.l.b16 %v1116_v24  ;;  %v760_v21 = vadd.f32 %v4802_v30, %v759_v27  ;;  %3074 = vmatpush.bf16.msra.mxu1 %v3914_v39  ;;  %3940 = vmatpush.bf16.msrb.mxu3 %v3914_v39 }
 0x155   : > { %v1228_v37 = vpack.c.b16 %v1198_v62, %v1197_v4  ;;  %2100 = vrot.lane.b32.xlu1 %v2004_v5, %s4091_s26  ;;  %v830_v27 = vmax.f32 %v760_v21, 0.0  ;;  %v3913_v5 = vld [vmem:[%s6581_s5 + $0x30] sm:$0xff]  ;;  %v6745_v62 = vrot.slane %v4661_v33, 2 }
 0x157   : > { %v1330_v8 = vshrl.u32 %v1228_v37, 16  ;;  %v1333_v24 = vshll.u32 %v1228_v37, 16  ;;  %2528 = vrot.lane.b32.xlu2 %v2443_v18, %s4093_s16  ;;  %v2294_v39 = vsel %vm2283_vm8, %v6745_v62, %v6625_v20  ;;  %v4925_v37 = vshll.u32 %v4690_v61, 16  ;;  %3075 = vmatpush.bf16.msra.mxu1 %v3913_v5  ;;  %v4932_v50 = vpop.permute.xlu0 %1948 }
 0x158   : > { %v4930_v18 = vor.u32 %v2157_v29, %v2156_v12  ;;  %v1823_v62 = vrot.slane %v4913_v25, 1  ;;  %3941 = vmatpush.bf16.msrb.mxu3 %v3913_v5 }
 0x159   : > { %v1332_v4 = vrot.slane %v1330_v8, 6  ;;  %v1335_v49 = vrot.slane %v1333_v24, 7  ;;  %v1076_v24 = vmul.f32 %v4484_v42, %v830_v27  ;;  %v4948_v27 = vshrl.u32 %v4661_v33, 16 }
 0x15a   : > { %2333 = vrot.lane.b32.xlu0 %v2294_v39, %s4090_s20  ;;  %v761_v21 = vpop.f32.mrf.mxu0  ;;  %v4928_v38 = vld [vmem:[#allocation2 + $0x50] sm:$0xff] }
 0x15b   : > { %v4934_v8 = vor.u32 %v1335_v49, %v1332_v4  ;;  %v762_v47 = vadd.f32 %v4802_v30, %v761_v21  ;;  %v6630_v20 = vrot.slane %v4928_v38, 3  ;;  %v6746_v21 = vrot.slane %v4853_v54, 3  ;;  %3076 = vmatpush.bf16.msra.mxu1 %v3912_v35 }
 0x15c   : > { %v1117_v14 = vpack.c.bf16 %v1076_v24, %v1076_v24  ;;  %3942 = vmatpush.bf16.msrb.mxu3 %v3912_v35  ;;  %v3911_v24 = vld [vmem:[%s6581_s5 + $0x20] sm:$0xff] }
 0x15d   : > { %v1337_v12 = vsel %vm1239_vm3, %v4855_v7, %v4934_v8  ;;  %v831_v29 = vmax.f32 %v762_v47, 0.0  ;;  %2388 = vrot.lane.b32.xlu1 %v2294_v39, %s4094_s30  ;;  %v2588_v42 = vsel %vm2571_vm10, %v6746_v21, %v6630_v20  ;;  %v1827_v47 = vor.u32 %v4948_v27, %v1823_v62 }
 0x15e   : > { %v1462_v49 = vunpack.c.l.b16 %v1337_v12  ;;  %v1463_v5 = vunpack.c.h.b16 %v1337_v12  ;;  %v2159_v39 = vsel %vm2139_vm9, %v4603_v23, %v4930_v18  ;;  %v2005_v12 = vrot.slane %v4690_v61, 1 }
 0x15f   : > { %v1077_v7 = vmul.f32 %v4605_v16, %v831_v29  ;;  %3851 = vmatmul.msk.bf16.gmra.mxu2 %vm2613_vm11, %v2588_v42  ;;  %2242 = vrot.lane.b32.xlu2 %v2159_v39, %s4092_s28  ;;  %v6747_v21 = vrot.slane %v4925_v37, 1  ;;  %v4973_v42 = vpop.permute.xlu0 %2037  ;;  %v1199_v23 = vunpack.c.l.b16 %v1117_v14 }
 0x160   : > { %v1506_v4 = vpack.c.b16 %v1462_v49, %v1462_v49  ;;  %v1507_v10 = vpack.c.b16 %v1463_v5, %v1463_v5  ;;  %3077 = vmatpush.bf16.msra.mxu1 %v3911_v24  ;;  %3943 = vmatpush.bf16.msrb.mxu3 %v3911_v24  ;;  %v4994_v24 = vshrl.u32 %v4690_v61, 16 }
 0x161   : > { %v1118_v29 = vpack.c.bf16 %v1077_v7, %v1077_v7  ;;  %v1832_v20 = vsel %vm1780_vm7, %v1827_v47, %v6747_v21  ;;  %v6748_v7 = vrot.slane %v4661_v33, 1  ;;  %v6634_v47 = vrot.slane %v4741_v11, 1 }
 0x162   : > { %1595 = vst.msk [vmem:[#allocation2 + $0x58] sm:$0xf] %vm1572_vm0, %v1506_v4  ;;  %1958 = vrot.lane.b32.xlu0 %v1832_v20, %s4089_s3  ;;  %v764_v35 = vpop.f32.mrf.mxu0  ;;  %v3910_v20 = vld [vmem:[%s6581_s5 + $0x18] sm:$0xff]  ;;  %v4991_v33 = vshrl.u32 %v4741_v11, 16  ;;  %v2444_v21 = vrot.slane %v4948_v27, 2 }
 0x163   : > { %1596 = vst.msk [vmem:[#allocation2 + $0x5c] sm:$0xf] %vm1572_vm0, %v1507_v10  ;;  %v1200_v49 = vunpack.c.l.b16 %v1118_v29  ;;  %v765_v5 = vadd.f32 %v4802_v30, %v764_v35  ;;  %v2006_v39 = vsel %vm1993_vm6, %v6748_v7, %v2005_v12  ;;  %v6749_v10 = vrot.slane %v4835_v6, 1 }
 0x164   : > { %v4988_v29 = vshll.u32 %v4741_v11, 16  ;;  %v2445_v35 = vrot.slane %v4913_v25, 3  ;;  %3078 = vmatpush.bf16.msra.mxu1 %v3910_v20  ;;  %3944 = vmatpush.bf16.msrb.mxu3 %v3910_v20  ;;  %v2452_v56 = vrot.slane %v4991_v33, 2 }
 0x165   : > { %v1229_v4 = vpack.c.b16 %v1200_v49, %v1199_v23  ;;  %2102 = vrot.lane.b32.xlu1 %v2006_v39, %s4091_s26  ;;  %v1819_v14 = vor.u32 %v4850_v3, %v6749_v10  ;;  %v832_v7 = vmax.f32 %v765_v5, 0.0  ;;  %v5002_v3 = vsel %vm1993_vm6, %v2005_v12, %v6634_v47 }
 0x166   : > { %v2453_v46 = vrot.slane %v4988_v29, 3  ;;  %v5012_v20 = vor.u32 %v2445_v35, %v2444_v21 }
 0x167   : > { %v1339_v23 = vshrl.u32 %v1229_v4, 16  ;;  %v1342_v49 = vshll.u32 %v1229_v4, 16  ;;  %v1824_v6 = vsel %vm1780_vm7, %v1819_v14, %v1823_v62  ;;  %v2448_v62 = vrot.slane %v4994_v24, 2  ;;  %v5020_v47 = vpop.permute.xlu0 %2238 }
 0x168   : > { %1956 = vrot.lane.b32.xlu2 %v1824_v6, %s4089_s3  ;;  %v1078_v14 = vmul.f32 %v4636_v43, %v832_v7  ;;  %v5026_v21 = vor.u32 %v2453_v46, %v2452_v56  ;;  %v2161_v43 = vrot.slane %v4913_v25, 2  ;;  %v2447_v46 = vsel %vm2427_vm12, %v4891_v44, %v5012_v20  ;;  %v5041_v56 = vpop.permute.xlu2 %2094  ;;  %v3909_v44 = vld [vmem:[%s6581_s5 + $0x10] sm:$0xff] }
 0x169   : > { %v1341_v10 = vrot.slane %v1339_v23, 6  ;;  %v1344_v16 = vrot.slane %v1342_v49, 7  ;;  %v2449_v49 = vrot.slane %v4925_v37, 3  ;;  %3079 = vmatpush.bf16.msra.mxu1 %v3909_v44  ;;  %3945 = vmatpush.bf16.msrb.mxu3 %v3909_v44 }
 0x16a   : > { %2047 = vrot.lane.b32.xlu0 %v5002_v3, %s4088_s0  ;;  %v766_v5 = vpop.f32.mrf.mxu0  ;;  %v5009_v4 = vld [vmem:[#allocation2 + $0x58] sm:$0xff]  ;;  %v1119_v48 = vpack.c.bf16 %v1078_v14, %v1078_v14  ;;  %v2169_v14 = vrot.slane %v4988_v29, 2 }
 0x16b   : > { %v5014_v12 = vor.u32 %v1344_v16, %v1341_v10  ;;  %v767_v23 = vadd.f32 %v4802_v30, %v766_v5  ;;  %v6639_v6 = vrot.slane %v5009_v4, 3  ;;  %v2160_v16 = vrot.slane %v4948_v27, 1 }
 0x16c   : > { %v6750_v10 = vrot.slane %v4928_v38, 3 }
 0x16d   : > { %v1346_v57 = vsel %vm1239_vm3, %v4934_v8, %v5014_v12  ;;  %v833_v63 = vmax.f32 %v767_v23, 0.0  ;;  %2045 = vrot.lane.b32.xlu1 %v2006_v39, %s4088_s0  ;;  %v5036_v23 = vor.u32 %v2449_v49, %v2448_v62  ;;  %v6642_v39 = vrot.slane %v4741_v11, 2 }
 0x16e   : > { %v1464_v35 = vunpack.c.l.b16 %v1346_v57  ;;  %v1465_v7 = vunpack.c.h.b16 %v1346_v57  ;;  %v2590_v5 = vsel %vm2571_vm10, %v6750_v10, %v6639_v6  ;;  %v2168_v62 = vrot.slane %v4991_v33, 1 }
 0x16f   : > { %v1079_v8 = vmul.f32 %v4559_v32, %v833_v63  ;;  %3852 = vmatmul.msk.bf16.gmra.mxu2 %vm2613_vm11, %v2590_v5  ;;  %v2455_v63 = vsel %vm2427_vm12, %v5036_v23, %v5026_v21  ;;  %v1201_v10 = vunpack.c.l.b16 %v1119_v48 }
 0x170   : > { %v1508_v57 = vpack.c.b16 %v1464_v35, %v1464_v35  ;;  %v1509_v27 = vpack.c.b16 %v1465_v7, %v1465_v7  ;;  %2530 = vrot.lane.b32.xlu2 %v2447_v46, %s4093_s16  ;;  %v2164_v35 = vrot.slane %v4994_v24, 1  ;;  %v5057_v7 = vor.u32 %v2161_v43, %v2160_v16 }
 0x171   : > { %v1120_v25 = vpack.c.bf16 %v1079_v8, %v1079_v8  ;;  %v2165_v46 = vrot.slane %v4925_v37, 2  ;;  %v5074_v48 = vor.u32 %v2169_v14, %v2168_v62  ;;  %v6641_v62 = vrot.slane %v4796_v45, 1 }
 0x172   : > { %1597 = vst.msk [vmem:[#allocation2 + $0x60] sm:$0xf] %vm1572_vm0, %v1508_v57  ;;  %2534 = vrot.lane.b32.xlu0 %v2455_v63, %s4093_s16  ;;  %v769_v49 = vpop.f32.mrf.mxu0  ;;  %v3908_v57 = vld [vmem:[%s6581_s5 + $0x8] sm:$0xff]  ;;  %v6751_v63 = vrot.slane %v4690_v61, 2  ;;  %v5083_v61 = vpop.permute.xlu1 %986 }
 0x173   : > { %1598 = vst.msk [vmem:[#allocation2 + $0x64] sm:$0xf] %vm1572_vm0, %v1509_v27  ;;  %v1202_v5 = vunpack.c.l.b16 %v1120_v25  ;;  %v770_v8 = vadd.f32 %v4802_v30, %v769_v49  ;;  %v2163_v27 = vsel %vm2139_vm9, %v4930_v18, %v5057_v7  ;;  %v5079_v25 = vpop.permute.xlu0 %2327  ;;  %v5081_v32 = vor.u32 %v2165_v46, %v2164_v35  ;;  %3080 = vmatpush.bf16.msra.mxu1 %v3908_v57 }
 0x174   : > { %v5070_v43 = vsel %vm2283_vm8, %v6751_v63, %v6642_v39  ;;  %3946 = vmatpush.bf16.msrb.mxu3 %v3908_v57  ;;  %6752 = vst [vmem:[#allocation52_spill] sm:$0xff] %v5083_v61 }
 0x175   : > { %v1230_v16 = vpack.c.b16 %v1202_v5, %v1201_v10  ;;  %2335 = vrot.lane.b32.xlu1 %v5070_v43, %s4090_s20  ;;  %v834_v6 = vmax.f32 %v770_v8, 0.0  ;;  %v2171_v18 = vsel %vm2139_vm9, %v5081_v32, %v5074_v48  ;;  %v5090_v5 = vpop.permute.xlu2 %1950 }
 0x177   : > { %v1348_v44 = vshrl.u32 %v1230_v16, 16  ;;  %v1351_v49 = vshll.u32 %v1230_v16, 16  ;;  %v1080_v57 = vmul.f32 %v4898_v34, %v834_v6  ;;  %v6753_v16 = vrot.slane %v4741_v11, 1  ;;  %v4004_v6 = vld [vmem:[#allocation2] sm:$0xff]  }
 0x178   : > { %2244 = vrot.lane.b32.xlu2 %v2163_v27, %s4092_s28  ;;  %v2615_v22 = vsel %vm2613_vm11, %v4004_v6, %v4932_v50 }
 0x179   : > { %v1350_v14 = vrot.slane %v1348_v44, 6  ;;  %v1353_v10 = vrot.slane %v1351_v49, 7  ;;  %v2010_v27 = vsel %vm1993_vm6, %v6753_v16, %v6641_v62  ;;  %v3907_v49 = vld [vmem:[%s6581_s5] sm:$0xff]  ;;  %v6754_v16 = vrot.slane %v5009_v4, 3 }
 0x17a   : > { %2248 = vrot.lane.b32.xlu0 %v2171_v18, %s4092_s28  ;;  %v771_v35 = vpop.f32.mrf.mxu0  ;;  %v5093_v8 = vld [vmem:[#allocation2 + $0x60] sm:$0xff]  ;;  %3081 = vmatpush.bf16.msra.mxu1 %v3907_v49  ;;  %v1121_v39 = vpack.c.bf16 %v1080_v57, %v1080_v57 }
 0x17b   : > { %v5095_v46 = vor.u32 %v1353_v10, %v1350_v14  ;;  %v772_v63 = vadd.f32 %v4802_v30, %v771_v35  ;;  %v6645_v44 = vrot.slane %v5093_v8, 3  ;;  %3947 = vmatpush.bf16.msrb.mxu3 %v3907_v49  ;;  %v5129_v57 = vpop.permute.xlu0 %2039 }
 0x17d   : > { %v1355_v14 = vsel %vm1239_vm3, %v5014_v12, %v5095_v46  ;;  %v835_v10 = vmax.f32 %v772_v63, 0.0  ;;  %2106 = vrot.lane.b32.xlu1 %v2010_v27, %s4091_s26  ;;  %v2592_v62 = vsel %vm2571_vm10, %v6754_v16, %v6645_v44  ;;  %v2451_v12 = vsel %vm2427_vm12, %v5012_v20, %v5036_v23  ;;  %v4003_v63 = vld [vmem:[%s6581_s5 + $0x40] sm:$0xff] }
 0x17e   : > { %v1466_v18 = vunpack.c.l.b16 %v1355_v14  ;;  %v1467_v35 = vunpack.c.h.b16 %v1355_v14  ;;  %v2036_v14 = vpop.permute.xlu1 %2035  ;;  %v6755_v20 = vrot.slane %v4796_v45, 2  ;;  %v6756_v23 = vrot.slane %v4741_v11, 2 }
 0x17f   : > { %v1081_v34 = vmul.f32 %v5083_v61, %v835_v10  ;;  %3948 = vmatpush.bf16.msra.mxu3 %v4003_v63  ;;  %3853 = vmatmul.msk.bf16.gmra.mxu2 %vm2613_vm11, %v2592_v62  ;;  %v5139_v63 = vshll.u32 %v4796_v45, 16  ;;  %v2658_v6 = vsel %vm631_vm2, %v2615_v22, %v2036_v14  ;;  %v1203_v11 = vunpack.c.l.b16 %v1121_v39 }
 0x180   : > { %v1510_v16 = vpack.c.b16 %v1466_v18, %v1466_v18  ;;  %v1511_v44 = vpack.c.b16 %v1467_v35, %v1467_v35  ;;  %2532 = vrot.lane.b32.xlu2 %v2451_v12, %s4093_s16  ;;  %v5136_v10 = vsel %vm2283_vm8, %v6756_v23, %v6755_v20  ;;  %v5151_v12 = vshrl.u32 %v4796_v45, 16 }
 0x181   : > { %v1122_v49 = vpack.c.bf16 %v1081_v34, %v1081_v34  ;;  %v5144_v62 = vpop.permute.xlu2 %2418  ;;  %v6646_v34 = vrot.slane %v4988_v29, 1  ;;  %v6648_v20 = vrot.slane %v5139_v63, 1  ;;  %v2701_v23 = vsel %vm2699_vm1, %v2658_v6, %v5041_v56 }
 0x182   : > { %1599 = vst.msk [vmem:[#allocation2 + $0x68] sm:$0xf] %vm1572_vm0, %v1510_v16  ;;  %2337 = vrot.lane.b32.xlu0 %v5136_v10, %s4090_s20  ;;  %v774_v50 = vpop.f32.mrf.mxu0  ;;  %v2167_v39 = vsel %vm2139_vm9, %v5057_v7, %v5081_v32  ;;  %v6647_v56 = vrot.slane %v4853_v54, 2 }
 0x183   : > { %6757 = vst [vmem:[#allocation53_spill] sm:$0xff] %v5144_v62  ;;  %v1204_v18 = vunpack.c.l.b16 %v1122_v49  ;;  %v775_v35 = vadd.f32 %v4802_v30, %v774_v50  ;;  %v1843_v22 = vor.u32 %v4991_v33, %v6646_v34  ;;  %v2456_v50 = vrot.slane %v5151_v12, 2 }
 0x184   : > { %1600 = vst.msk [vmem:[#allocation2 + $0x6c] sm:$0xf] %vm1572_vm0, %v1511_v44  ;;  %v2744_v44 = vsel %vm2742_vm4, %v2701_v23, %v5020_v47  ;;  %v2457_v33 = vrot.slane %v5139_v63, 3  ;;  %v2527_v23 = vpop.permute.xlu0 %2526 }
 0x185   : > { %v1231_v16 = vpack.c.b16 %v1204_v18, %v1203_v11  ;;  %2049 = vrot.lane.b32.xlu1 %v2010_v27, %s4088_s0  ;;  %v836_v27 = vmax.f32 %v775_v35, 0.0  ;;  %v1848_v32 = vsel %vm1780_vm7, %v1843_v22, %v6648_v20  ;;  %v6758_v22 = vrot.slane %v4796_v45, 2 }
 0x186   : > { %v2326_v6 = vpop.permute.xlu1 %2325 }
 0x187   : > { %v1357_v14 = vshrl.u32 %v1231_v16, 16  ;;  %v1360_v49 = vshll.u32 %v1231_v16, 16  ;;  %v2787_v7 = vsel %vm2785_vm5, %v2744_v44, %v2326_v6  ;;  %v1082_v34 = vmul.f32 %v4480_v28, %v836_v27 }
 0x188   : > { %2246 = vrot.lane.b32.xlu2 %v2167_v39, %s4092_s28  ;;  %v5192_v27 = vor.u32 %v2457_v33, %v2456_v50 }
 0x189   : > { %v1359_v11 = vrot.slane %v1357_v14, 6  ;;  %v1362_v18 = vrot.slane %v1360_v49, 7  ;;  %v2383_v35 = vpop.permute.xlu2 %2382 }
 0x18a   : > { %1962 = vrot.lane.b32.xlu0 %v1848_v32, %s4089_s3  ;;  %v776_v47 = vpop.f32.mrf.mxu0  ;;  %v2830_v49 = vsel %vm2828_vm14, %v2787_v7, %v2383_v35  ;;  %v2300_v32 = vsel %vm2283_vm8, %v6758_v22, %v6647_v56  ;;  %v6759_v35 = vrot.slane %v5093_v8, 3  ;;  %v2459_v33 = vsel %vm2427_vm12, %v5026_v21, %v5192_v27 }
 0x18b   : > { %v5174_v16 = vld [vmem:[#allocation2 + $0x68] sm:$0xff]  ;;  %v5176_v39 = vor.u32 %v1362_v18, %v1359_v11  ;;  %v777_v14 = vadd.f32 %v4802_v30, %v776_v47  ;;  %v2873_v44 = vsel %vm2871_vm15, %v2830_v49, %v2527_v23  ;;  %v1123_v49 = vpack.c.bf16 %v1082_v34, %v1082_v34 }
 0x18c   : > { %v6649_v6 = vrot.slane %v5174_v16, 3  ;;  %3082 = vmatmul.bf16.vlgmr.msra.gmra.mxu1 %v2873_v44  ;;  %v2177_v34 = vrot.slane %v4862_v19, 2  ;;  %v2173_v21 = vrot.slane %v5139_v63, 2 }
 0x18d   : > { %v1364_v11 = vsel %vm1239_vm3, %v5095_v46, %v5176_v39  ;;  %v837_v18 = vmax.f32 %v777_v14, 0.0  ;;  %2394 = vrot.lane.b32.xlu1 %v2300_v32, %s4094_s30  ;;  %v5203_v46 = vpop.f32.mrf.mxu2  ;;  %v2176_v14 = vrot.slane %v4882_v41, 1 }
 0x18e   : > { %v1468_v47 = vunpack.c.l.b16 %v1364_v11  ;;  %v1469_v7 = vunpack.c.h.b16 %v1364_v11  ;;  %v2594_v23 = vsel %vm2571_vm10, %v6759_v35, %v6649_v6 }
 0x18f   : > { %v1083_v22 = vmul.f32 %v4438_v9, %v837_v18  ;;  %3854 = vmatmul.msk.bf16.gmra.mxu2 %vm2613_vm11, %v2594_v23  ;;  %v1205_v18 = vunpack.c.l.b16 %v1123_v49  ;;  %v5219_v23 = vor.u32 %v2177_v34, %v2176_v14  ;;  %v6761_v34 = vrot.slane %v5139_v63, 1 }
 0x190   : > { %v1512_v56 = vpack.c.b16 %v1468_v47, %v1468_v47  ;;  %v1513_v20 = vpack.c.b16 %v1469_v7, %v1469_v7  ;;  %2390 = vrot.lane.b32.xlu2 %v5070_v43, %s4094_s30  ;;  %v2172_v43 = vrot.slane %v5151_v12, 1 }
 0x191   : > { %v1124_v50 = vpack.c.bf16 %v1083_v22, %v1083_v22  ;;  %v5212_v11 = vpop.permute.xlu2 %2363 }
 0x192   : > { %1601 = vst.msk [vmem:[#allocation2 + $0x70] sm:$0xf] %vm1572_vm0, %v1512_v56  ;;  %2536 = vrot.lane.b32.xlu0 %v2459_v33, %s4093_s16  ;;  %v779_v44 = vpop.f32.mrf.mxu0  ;;  %v5221_v56 = vpop.permute.xlu1 %2096  ;;  %v5223_v9 = vor.u32 %v2173_v21, %v2172_v43  ;;  %v6762_v21 = vrot.slane %v4925_v37, 1  ;;  %v5260_v37 = vshrl.u32 %v4928_v38, 16 }
 0x193   : > { %6760 = vst [vmem:[#allocation54_spill] sm:$0xff] %v5212_v11  ;;  %v1206_v47 = vunpack.c.l.b16 %v1124_v50  ;;  %v780_v7 = vadd.f32 %v4802_v30, %v779_v44  ;;  %v1851_v44 = vor.u32 %v5151_v12, %v6761_v34  ;;  %v6764_v34 = vrot.slane %v5174_v16, 3 }
 0x194   : > { %1602 = vst.msk [vmem:[#allocation2 + $0x74] sm:$0xf] %vm1572_vm0, %v1513_v20  ;;  %v2179_v50 = vsel %vm2139_vm9, %v5223_v9, %v5219_v23 }
 0x195   : > { %v1232_v35 = vpack.c.b16 %v1206_v47, %v1205_v18  ;;  %2339 = vrot.lane.b32.xlu1 %v2300_v32, %s4090_s20  ;;  %v838_v6 = vmax.f32 %v780_v7, 0.0  ;;  %v5238_v18 = vpop.f32.mrf.mxu2 }
 0x197   : > { %v1366_v22 = vshrl.u32 %v1232_v35, 16  ;;  %v1369_v33 = vshll.u32 %v1232_v35, 16  ;;  %v1084_v47 = vmul.f32 %v4517_v40, %v838_v6  ;;  %v1835_v35 = vor.u32 %v4994_v24, %v6762_v21 }
 0x198   : > { %2104 = vrot.lane.b32.xlu2 %v5002_v3, %s4091_s26  ;;  %v6654_v21 = vrot.slane %v4853_v54, 1 }
 0x199   : > { %v1368_v20 = vrot.slane %v1366_v22, 6  ;;  %v1371_v49 = vrot.slane %v1369_v33, 7  ;;  %v5231_v14 = vpop.permute.xlu2 %1952  ;;  %v6763_v22 = vrot.slane %v4862_v19, 1 }
 0x19a   : > { %2252 = vrot.lane.b32.xlu0 %v2179_v50, %s4092_s28  ;;  %v781_v32 = vpop.f32.mrf.mxu0  ;;  %v5253_v50 = vshll.u32 %v4928_v38, 16 }
 0x19b   : > { %v5236_v43 = vld [vmem:[#allocation2 + $0x70] sm:$0xff]  ;;  %v5240_v3 = vor.u32 %v1371_v49, %v1368_v20  ;;  %v782_v7 = vadd.f32 %v4802_v30, %v781_v32  ;;  %v1856_v63 = vsel %vm1780_vm7, %v1851_v44, %v6763_v22 }
 0x19c   : > { %v6653_v12 = vrot.slane %v5236_v43, 3  ;;  %v5263_v24 = vshll.u32 %v5236_v43, 16 }
 0x19d   : > { %v1373_v6 = vsel %vm1239_vm3, %v5176_v39, %v5240_v3  ;;  %v839_v20 = vmax.f32 %v782_v7, 0.0  ;;  %1964 = vrot.lane.b32.xlu1 %v1856_v63, %s4089_s3  ;;  %v1125_v39 = vpack.c.bf16 %v1084_v47, %v1084_v47  ;;  %v6766_v63 = vrot.slane %v4988_v29, 1  ;;  %v5305_v61 = vpop.f32.mrf.mxu2 }
 0x19e   : > { %v1470_v49 = vunpack.c.l.b16 %v1373_v6  ;;  %v1471_v32 = vunpack.c.h.b16 %v1373_v6  ;;  %v2596_v44 = vsel %vm2571_vm10, %v6764_v34, %v6653_v12  ;;  %v6767_v6 = vrot.slane %v4928_v38, 1 }
 0x19f   : > { %v1085_v7 = vmul.f32 %v4513_v26, %v839_v20  ;;  %v5272_v22 = vpop.permute.xlu1 %2562  ;;  %v1840_v33 = vsel %vm1780_vm7, %v1835_v35, %v6766_v63  ;;  %3855 = vmatmul.msk.bf16.gmra.mxu2 %vm2613_vm11, %v2596_v44  ;;  %v2464_v20 = vrot.slane %v5260_v37, 2  ;;  %v2465_v12 = vrot.slane %v5253_v50, 3 }
 0x1a0   : > { %6765 = vst [vmem:[#allocation55_spill] sm:$0xff] %v5272_v22  ;;  %v1514_v40 = vpack.c.b16 %v1470_v49, %v1470_v49  ;;  %v1515_v28 = vpack.c.b16 %v1471_v32, %v1471_v32  ;;  %v2014_v34 = vsel %vm1993_vm6, %v6654_v21, %v6767_v6  ;;  %1960 = vrot.lane.b32.xlu2 %v1840_v33, %s4089_s3  ;;  %v2460_v32 = vrot.slane %v4882_v41, 2 }
 0x1a1   : > { %v1126_v47 = vpack.c.bf16 %v1085_v7, %v1085_v7  ;;  %v2241_v49 = vpop.permute.xlu2 %2240  ;;  %v5291_v44 = vshrl.u32 %v5236_v43, 16  ;;  %v1207_v33 = vunpack.c.l.b16 %v1125_v39  ;;  %v2461_v6 = vrot.slane %v4862_v19, 3 }
 0x1a2   : > { %1603 = vst.msk [vmem:[#allocation2 + $0x78] sm:$0xf] %vm1572_vm0, %v1514_v40  ;;  %2110 = vrot.lane.b32.xlu0 %v2014_v34, %s4091_s26  ;;  %v784_v35 = vpop.f32.mrf.mxu0  ;;  %v5296_v21 = vpop.permute.xlu0 %2276  ;;  %v2180_v40 = vrot.slane %v5260_v37, 1  ;;  %v2181_v29 = vrot.slane %v5253_v50, 2  ;;  %v6769_v26 = vrot.slane %v5263_v24, 1  ;;  %v5308_v39 = vor.u32 %v2465_v12, %v2464_v20 }
 0x1a3   : > { %1604 = vst.msk [vmem:[#allocation2 + $0x7c] sm:$0xf] %vm1572_vm0, %v1515_v28  ;;  %v1208_v7 = vunpack.c.l.b16 %v1126_v47  ;;  %v785_v63 = vadd.f32 %v4802_v30, %v784_v35 }
 0x1a4   : > { %6768 = vst [vmem:[#allocation56_spill] sm:$0xff] %v5296_v21  ;;  %v5303_v41 = vor.u32 %v5291_v44, %v6769_v26  ;;  %v5312_v21 = vor.u32 %v2461_v6, %v2460_v32  ;;  %v5316_v22 = vor.u32 %v2181_v29, %v2180_v40  ;;  %v4005_v32 = vld [vmem:[#allocation2 + $0x8] sm:$0xff]  }
 0x1a5   : > { %v1233_v28 = vpack.c.b16 %v1208_v7, %v1207_v33  ;;  %2053 = vrot.lane.b32.xlu1 %v2014_v34, %s4088_s0  ;;  %v840_v35 = vmax.f32 %v785_v63, 0.0  ;;  %v2617_v7 = vsel %vm2613_vm11, %v4005_v32, %v5090_v5 }
 0x1a6   : > { %6770 = vst [vmem:[#allocation57_spill] sm:$0xff] %v5303_v41  ;;  %v2467_v34 = vsel %vm2427_vm12, %v5312_v21, %v5308_v39  ;;  %v2660_v6 = vsel %vm631_vm2, %v2617_v7, %v4973_v42  ;;  %v6659_v42 = vrot.slane %v5009_v4, 2 }
 0x1a7   : > { %v1375_v47 = vshrl.u32 %v1233_v28, 16  ;;  %v1378_v19 = vshll.u32 %v1233_v28, 16  ;;  %v5310_v11 = vpop.permute.xlu1 %2132  ;;  %v1086_v29 = vmul.f32 %v4536_v31, %v840_v35  ;;  %v2183_v28 = vsel %vm2139_vm9, %v5219_v23, %v5316_v22 }
 0x1a8   : > { %6771 = vst [vmem:[#allocation58_spill] sm:$0xff] %v5310_v11  ;;  %2392 = vrot.lane.b32.xlu2 %v5136_v10, %s4094_s30  ;;  %v2703_v5 = vsel %vm2699_vm1, %v2660_v6, %v5221_v56  ;;  %v6772_v23 = vrot.slane %v5236_v43, 3  ;;  %v5353_v56 = vpop.f32.mrf.mxu2  ;;  %v2175_v6 = vsel %vm2139_vm9, %v5074_v48, %v5223_v9 }
 0x1a9   : > { %v1377_v26 = vrot.slane %v1375_v47, 6  ;;  %v1380_v62 = vrot.slane %v1378_v19, 7  ;;  %v5322_v20 = vpop.permute.xlu2 %1954  ;;  %6773 = vst [vmem:[#allocation59_spill] sm:$0xff] %v5353_v56  ;;  %v1127_v32 = vpack.c.bf16 %v1086_v29, %v1086_v29 }
 0x1aa   : > { %2540 = vrot.lane.b32.xlu0 %v2467_v34, %s4093_s16  ;;  %v786_v12 = vpop.f32.mrf.mxu0  ;;  %v5324_v33 = vld [vmem:[#allocation2 + $0x78] sm:$0xff]  ;;  %v5334_v40 = vpop.permute.xlu0 %2329  ;;  %v2746_v34 = vsel %vm2742_vm4, %v2703_v5, %v2241_v49 }
 0x1ab   : > { %v5328_v10 = vor.u32 %v1380_v62, %v1377_v26  ;;  %v787_v63 = vadd.f32 %v4802_v30, %v786_v12  ;;  %v6660_v47 = vrot.slane %v5324_v33, 3 }
 0x1ad   : > { %v1382_v62 = vsel %vm1239_vm3, %v5240_v3, %v5328_v10  ;;  %v841_v19 = vmax.f32 %v787_v63, 0.0  ;;  %2254 = vrot.lane.b32.xlu1 %v2183_v28, %s4092_s28  ;;  %v2598_v12 = vsel %vm2571_vm10, %v6772_v23, %v6660_v47  ;;  %v6657_v63 = vrot.slane %v4928_v38, 2 }
 0x1ae   : > { %v1472_v35 = vunpack.c.l.b16 %v1382_v62  ;;  %v1473_v26 = vunpack.c.h.b16 %v1382_v62  ;;  %v2789_v62 = vsel %vm2785_vm5, %v2746_v34, %v5079_v25 }
 0x1af   : > { %v1087_v3 = vmul.f32 %v4467_v53, %v841_v19  ;;  %v2385_v7 = vpop.permute.xlu1 %2384  ;;  %3856 = vmatmul.msk.bf16.gmra.mxu2 %vm2613_vm11, %v2598_v12  ;;  %v2304_v29 = vsel %vm2283_vm8, %v6657_v63, %v6659_v42  ;;  %v6658_v12 = vrot.slane %v5009_v4, 1 }
 0x1b0   : > { %v1516_v28 = vpack.c.b16 %v1472_v35, %v1472_v35  ;;  %v1517_v49 = vpack.c.b16 %v1473_v26, %v1473_v26  ;;  %2250 = vrot.lane.b32.xlu2 %v2175_v6, %s4092_s28  ;;  %v2832_v9 = vsel %vm2828_vm14, %v2789_v62, %v2385_v7  ;;  %v1209_v35 = vunpack.c.l.b16 %v1127_v32 }
 0x1b1   : > { %v1128_v5 = vpack.c.bf16 %v1087_v3, %v1087_v3  ;;  %v2529_v19 = vpop.permute.xlu2 %2528  ;;  %v5379_v3 = vshll.u32 %v5009_v4, 16  ;;  %v5383_v6 = vshrl.u32 %v5009_v4, 16  ;;  %v6663_v32 = vrot.slane %v5253_v50, 1 }
 0x1b2   : > { %1605 = vst.msk [vmem:[#allocation2 + $0x80] sm:$0xf] %vm1572_vm0, %v1516_v28  ;;  %2398 = vrot.lane.b32.xlu0 %v2304_v29, %s4094_s30  ;;  %v789_v48 = vpop.f32.mrf.mxu0  ;;  %v2876_v34 = vsel %vm2871_vm15, %v2832_v9, %v2529_v19  ;;  %v5375_v23 = vpop.permute.xlu0 %2041  ;;  %v6774_v9 = vrot.slane %v4853_v54, 1 }
 0x1b3   : > { %1606 = vst.msk [vmem:[#allocation2 + $0x84] sm:$0xf] %vm1572_vm0, %v1517_v49  ;;  %v1210_v26 = vunpack.c.l.b16 %v1128_v5  ;;  %v790_v25 = vadd.f32 %v4802_v30, %v789_v48  ;;  %3087 = vmatmul.bf16.gmra.mxu1 %v2876_v34  ;;  %v6775_v48 = vrot.slane %v4796_v45, 1  ;;  %v5398_v34 = vpop.f32.mrf.mxu2  ;;  %v2468_v63 = vrot.slane %v5383_v6, 2 }
 0x1b4   : > { %6777 = vst [vmem:[#allocation60_spill] sm:$0xff] %v5398_v34  ;;  %v2469_v45 = vrot.slane %v5379_v3, 3 }
 0x1b5   : > { %v1234_v7 = vpack.c.b16 %v1210_v26, %v1209_v35  ;;  %2343 = vrot.lane.b32.xlu1 %v2304_v29, %s4090_s20  ;;  %v842_v5 = vmax.f32 %v790_v25, 0.0  ;;  %v2012_v19 = vsel %vm1993_vm6, %v6775_v48, %v6774_v9  ;;  %v6776_v35 = vrot.slane %v4928_v38, 1 }
 0x1b6   : > { %v6664_v26 = vrot.slane %v5379_v3, 1 }
 0x1b7   : > { %v1384_v28 = vshrl.u32 %v1234_v7, 16  ;;  %v1387_v49 = vshll.u32 %v1234_v7, 16  ;;  %v2099_v62 = vpop.permute.xlu1 %2098  ;;  %v2016_v29 = vsel %vm1993_vm6, %v6776_v35, %v6658_v12  ;;  %v1867_v35 = vor.u32 %v5260_v37, %v6663_v32 }
 0x1b8   : > { %2108 = vrot.lane.b32.xlu2 %v2012_v19, %s4091_s26  ;;  %v1088_v47 = vmul.f32 %v4545_v36, %v842_v5 }
 0x1b9   : > { %v1386_v25 = vrot.slane %v1384_v28, 6  ;;  %v1389_v7 = vrot.slane %v1387_v49, 7  ;;  %v2243_v48 = vpop.permute.xlu2 %2242  ;;  %v1872_v53 = vsel %vm1780_vm7, %v1867_v35, %v6664_v26  ;;  %v6778_v35 = vrot.slane %v5324_v33, 3 }
 0x1ba   : > { %2112 = vrot.lane.b32.xlu0 %v2016_v29, %s4091_s26  ;;  %v791_v9 = vpop.f32.mrf.mxu0  ;;  %v5406_v12 = vld [vmem:[#allocation2 + $0x80] sm:$0xff]  ;;  %v5412_v49 = vpop.permute.xlu0 %2331  ;;  %v5436_v26 = vshll.u32 %v5093_v8, 16  ;;  %v1129_v36 = vpack.c.bf16 %v1088_v47, %v1088_v47 }
 0x1bb   : > { %v5408_v42 = vor.u32 %v1389_v7, %v1386_v25  ;;  %v792_v28 = vadd.f32 %v4802_v30, %v791_v9  ;;  %v6666_v31 = vrot.slane %v5406_v12, 3  ;;  %v5419_v11 = vshll.u32 %v5406_v12, 16 }
 0x1bc   : > { %v5422_v37 = vshrl.u32 %v5406_v12, 16  ;;  %v5428_v30 = vor.u32 %v2469_v45, %v2468_v63 }
 0x1bd   : > { %v1391_v5 = vsel %vm1239_vm3, %v5328_v10, %v5408_v42  ;;  %v843_v25 = vmax.f32 %v792_v28, 0.0  ;;  %1968 = vrot.lane.b32.xlu1 %v1872_v53, %s4089_s3  ;;  %v2600_v32 = vsel %vm2571_vm10, %v6778_v35, %v6666_v31  ;;  %v2489_v53 = vrot.slane %v5419_v11, 3  ;;  %v4006_v31 = vld [vmem:[#allocation2 + $0x10] sm:$0xff]  }
 0x1be   : > { %v1474_v7 = vunpack.c.l.b16 %v1391_v5  ;;  %v1475_v9 = vunpack.c.h.b16 %v1391_v5  ;;  %v2488_v28 = vrot.slane %v5422_v37, 2  ;;  %v5444_v5 = vshrl.u32 %v5093_v8, 16 }
 0x1bf   : > { %v1089_v41 = vmul.f32 %v4565_v55, %v843_v25  ;;  %v2387_v10 = vpop.permute.xlu1 %2386  ;;  %3857 = vmatmul.msk.bf16.gmra.mxu2 %vm2613_vm11, %v2600_v32  ;;  %v2204_v35 = vrot.slane %v5422_v37, 1  ;;  %v2619_v47 = vsel %vm2613_vm11, %v4006_v31, %v5231_v14  ;;  %v2205_v32 = vrot.slane %v5419_v11, 2  ;;  %v5460_v31 = vpop.f32.mrf.mxu2 }
 0x1c0   : > { %v1518_v63 = vpack.c.b16 %v1474_v7, %v1474_v7  ;;  %v1519_v45 = vpack.c.b16 %v1475_v9, %v1475_v9  ;;  %2051 = vrot.lane.b32.xlu2 %v2012_v19, %s4088_s0  ;;  %v5449_v55 = vor.u32 %v2489_v53, %v2488_v28  ;;  %v1211_v19 = vunpack.c.l.b16 %v1129_v36  ;;  %6779 = vst [vmem:[#allocation61_spill] sm:$0xff] %v5460_v31 }
 0x1c1   : > { %v1130_v25 = vpack.c.bf16 %v1089_v41, %v1089_v41  ;;  %v2471_v34 = vsel %vm2427_vm12, %v5308_v39, %v5428_v30  ;;  %v2662_v14 = vsel %vm631_vm2, %v2619_v47, %v5129_v57  ;;  %v2189_v28 = vrot.slane %v5436_v26, 2 }
 0x1c2   : > { %1607 = vst.msk [vmem:[#allocation2 + $0x88] sm:$0xf] %vm1572_vm0, %v1518_v63  ;;  %2055 = vrot.lane.b32.xlu0 %v2016_v29, %s4088_s0  ;;  %v5453_v7 = vpop.permute.xlu2 %1956  ;;  %v2188_v29 = vrot.slane %v5444_v5, 1  ;;  %v5468_v53 = vor.u32 %v2205_v32, %v2204_v35  ;;  %v2705_v36 = vsel %vm2699_vm1, %v2662_v14, %v2099_v62  ;;  %v6668_v39 = vrot.slane %v5093_v8, 2 }
 0x1c3   : > { %1608 = vst.msk [vmem:[#allocation2 + $0x8c] sm:$0xf] %vm1572_vm0, %v1519_v45  ;;  %v1212_v9 = vunpack.c.l.b16 %v1130_v25  ;;  %v2748_v45 = vsel %vm2742_vm4, %v2705_v36, %v2243_v48  ;;  %v2184_v25 = vrot.slane %v5383_v6, 1  ;;  %v2185_v57 = vrot.slane %v5379_v3, 2 }
 0x1c4   : > { %v5464_v41 = vpop.permute.xlu0 %2043  ;;  %v2463_v35 = vsel %vm2427_vm12, %v5192_v27, %v5312_v21  ;;  %v5480_v62 = vor.u32 %v2189_v28, %v2188_v29  ;;  %v2791_v48 = vsel %vm2785_vm5, %v2748_v45, %v5334_v40 }
 0x1c5   : > { %v1235_v63 = vpack.c.b16 %v1212_v9, %v1211_v19  ;;  %2542 = vrot.lane.b32.xlu1 %v2471_v34, %s4093_s16  ;;  %v6780_v19 = vrot.slane %v5009_v4, 2  ;;  %v2834_v14 = vsel %vm2828_vm14, %v2791_v48, %v2387_v10  ;;  %v5491_v21 = vor.u32 %v2185_v57, %v2184_v25 }
 0x1c7   : > { %v1393_v47 = vshrl.u32 %v1235_v63, 16  ;;  %v1396_v31 = vshll.u32 %v1235_v63, 16  ;;  %v2101_v56 = vpop.permute.xlu1 %2100  ;;  %v2306_v9 = vsel %vm2283_vm8, %v6780_v19, %v6668_v39  ;;  %v2191_v40 = vsel %vm2139_vm9, %v5491_v21, %v5480_v62 }
 0x1c8   : > { %2538 = vrot.lane.b32.xlu2 %v2463_v35, %s4093_s16 }
 0x1c9   : > { %v1395_v34 = vrot.slane %v1393_v47, 6  ;;  %v1398_v32 = vrot.slane %v1396_v31, 7  ;;  %v5513_v47 = vpop.f32.mrf.mxu2 }
 0x1ca   : > { %2400 = vrot.lane.b32.xlu0 %v2306_v9, %s4094_s30  ;;  %v2531_v27 = vpop.permute.xlu2 %2530  ;;  %v5493_v29 = vld [vmem:[#allocation2 + $0x88] sm:$0xff]  ;;  %6781 = vst [vmem:[#allocation62_spill] sm:$0xff] %v5513_v47  ;;  %v6672_v47 = vrot.slane %v5174_v16, 1 }
 0x1cb   : > { %v1399_v28 = vor.u32 %v1398_v32, %v1395_v34  ;;  %v2879_v31 = vsel %vm2871_vm15, %v2834_v14, %v2531_v27  ;;  %v2601_v63 = vrot.slane %v5493_v29, 3  ;;  %v5503_v10 = vshll.u32 %v5493_v29, 16 }
 0x1cc   : > { %v5496_v36 = vpop.permute.xlu0 %2333  ;;  %3092 = vmatmul.bf16.gmra.mxu1 %v2879_v31  ;;  %v5506_v45 = vshrl.u32 %v5493_v29, 16  ;;  %v6782_v14 = vrot.slane %v5406_v12, 3  ;;  %v6784_v31 = vrot.slane %v4853_v54, 2 }
 0x1cd   : > { %v1400_v25 = vsel %vm1239_vm3, %v5408_v42, %v1399_v28  ;;  %v1409_v57 = vsel %vm1239_vm3, %v1399_v28, %v4679_v52  ;;  %2258 = vrot.lane.b32.xlu1 %v2191_v40, %s4092_s28  ;;  %v6783_v42 = vrot.slane %v4928_v38, 2  ;;  %v2209_v40 = vrot.slane %v5503_v10, 2 }
 0x1ce   : > { %v1476_v35 = vunpack.c.l.b16 %v1400_v25  ;;  %v1477_v34 = vunpack.c.h.b16 %v1400_v25  ;;  %v1478_v32 = vunpack.c.l.b16 %v1409_v57  ;;  %v1479_v48 = vunpack.c.h.b16 %v1409_v57 }
 0x1cf   : > { %v2389_v19 = vpop.permute.xlu1 %2388  ;;  %v2602_v27 = vsel %vm2571_vm10, %v6782_v14, %v2601_v63  ;;  %v2302_v52 = vsel %vm2283_vm8, %v6784_v31, %v6783_v42  ;;  %v2208_v28 = vrot.slane %v5506_v45, 1  ;;  %v2621_v14 = vsel %vm2613_vm11, %v4007_v2, %v5322_v20 }
 0x1d0   : > { %v1520_v25 = vpack.c.b16 %v1476_v35, %v1476_v35  ;;  %v1521_v39 = vpack.c.b16 %v1477_v34, %v1477_v34  ;;  %v1522_v57 = vpack.c.b16 %v1478_v32, %v1478_v32  ;;  %3858 = vmatmul.msk.bf16.gmra.mxu2 %vm2613_vm11, %v2602_v27  ;;  %v1523_v38 = vpack.c.b16 %v1479_v48, %v1479_v48 }
 0x1d1   : > { %2396 = vrot.lane.b32.xlu2 %v2302_v52, %s4094_s30  ;;  %v5532_v54 = vor.u32 %v2209_v40, %v2208_v28  ;;  %v2664_v42 = vsel %vm631_vm2, %v2621_v14, %v5375_v23  ;;  %v6671_v34 = vrot.slane %v5093_v8, 1  ;;  %v2492_v32 = vrot.slane %v5506_v45, 2 }
 0x1d2   : > { %1609 = vst.msk [vmem:[#allocation2 + $0x90] sm:$0xf] %vm1572_vm0, %v1520_v25  ;;  %2345 = vrot.lane.b32.xlu0 %v2306_v9, %s4090_s20  ;;  %v2245_v35 = vpop.permute.xlu2 %2244  ;;  %v2493_v27 = vrot.slane %v5503_v10, 3  ;;  %v2707_v2 = vsel %vm2699_vm1, %v2664_v42, %v2101_v56  ;;  %v6670_v56 = vrot.slane %v5436_v26, 1  ;;  %v5561_v31 = vshll.u32 %v5174_v16, 16  ;;  %v5575_v42 = vpop.f32.mrf.mxu2 }
 0x1d3   : > { %1610 = vst.msk [vmem:[#allocation2 + $0x94] sm:$0xf] %vm1572_vm0, %v1521_v39  ;;  %v5546_v20 = vsel %vm2139_vm9, %v5468_v53, %v5532_v54  ;;  %v2750_v9 = vsel %vm2742_vm4, %v2707_v2, %v2245_v35  ;;  %v2020_v48 = vsel %vm1993_vm6, %v6671_v34, %v6672_v47  ;;  %v5564_v28 = vshrl.u32 %v5174_v16, 16  ;;  %v4008_v47 = vld [vmem:[#allocation2 + $0x20] sm:$0xff] }
 0x1d4   : > { %6785 = vst [vmem:[#allocation63_spill] sm:$0xff] %v5546_v20  ;;  %v5549_v23 = vpop.permute.xlu0 %1958  ;;  %v2494_v39 = vor.u32 %v2493_v27, %v2492_v32  ;;  %v2793_v25 = vsel %vm2785_vm5, %v2750_v9, %v5412_v49  ;;  %v6787_v14 = vrot.slane %v5379_v3, 1  ;;  %v2193_v27 = vrot.slane %v5561_v31, 2 }
 0x1d5   : > { %1611 = vst.msk [vmem:[#allocation2 + $0x98] sm:$0xf] %vm1572_vm0, %v1522_v57  ;;  %2116 = vrot.lane.b32.xlu1 %v2020_v48, %s4091_s26  ;;  %v2192_v32 = vrot.slane %v5564_v28, 1  ;;  %v2836_v2 = vsel %vm2828_vm14, %v2793_v25, %v2389_v19  ;;  %v2473_v25 = vrot.slane %v5436_v26, 3 }
 0x1d6   : > { %1612 = vst.msk [vmem:[#allocation2 + $0x9c] sm:$0xf] %vm1572_vm0, %v1523_v38  ;;  %v5568_v40 = vsel %vm2427_vm12, %v5449_v55, %v2494_v39  ;;  %v1875_v38 = vor.u32 %v5383_v6, %v6787_v14 }
 0x1d7   : > { %6786 = vst [vmem:[#allocation64_spill] sm:$0xff] %v5568_v40  ;;  %v2103_v57 = vpop.permute.xlu1 %2102  ;;  %v2623_v40 = vsel %vm2613_vm11, %v4008_v47, %v5453_v7  ;;  %v6673_v7 = vrot.slane %v5236_v43, 1 }
 0x1d8   : > { %v1880_v35 = vsel %vm1780_vm7, %v1875_v38, %v6670_v56  ;;  %v2477_v38 = vrot.slane %v5561_v31, 3  ;;  %v5594_v56 = vor.u32 %v2193_v27, %v2192_v32 }
 0x1d9   : > { %2341 = vrot.lane.b32.xlu2 %v2302_v52, %s4090_s20  ;;  %v2476_v52 = vrot.slane %v5564_v28, 2 }
 0x1da   : > { %1970 = vrot.lane.b32.xlu0 %v1880_v35, %s4089_s3  ;;  %v2533_v49 = vpop.permute.xlu2 %2532  ;;  %v5585_v3 = vld [vmem:[#allocation2 + $0x90] sm:$0xff]  ;;  %v2472_v35 = vrot.slane %v5444_v5, 2  ;;  %v5618_v34 = vpop.f32.mrf.mxu2 }
 0x1db   : > { %v2882_v6 = vsel %vm2871_vm15, %v2836_v2, %v2533_v49  ;;  %v2603_v14 = vrot.slane %v5585_v3, 3  ;;  %v5602_v49 = vshll.u32 %v5585_v3, 16  ;;  %v5605_v2 = vshrl.u32 %v5585_v3, 16 }
 0x1dc   : > { %v5588_v9 = vpop.permute.xlu0 %2047  ;;  %3097 = vmatmul.bf16.gmra.mxu1 %v2882_v6  ;;  %v2478_v27 = vor.u32 %v2477_v38, %v2476_v52 }
 0x1dd   : > { %2059 = vrot.lane.b32.xlu1 %v2020_v48, %s4088_s0  ;;  %v2604_v19 = vsel %vm2571_vm10, %v2601_v63, %v2603_v14  ;;  %v6788_v48 = vrot.slane %v5253_v50, 1  ;;  %v2195_v63 = vsel %vm2139_vm9, %v5480_v62, %v5594_v56  ;;  %v5623_v50 = vor.u32 %v2473_v25, %v2472_v35 }
 0x1de   : > { %v2497_v52 = vrot.slane %v5602_v49, 3 }
 0x1df   : > { %v5607_v6 = vpop.permute.xlu1 %2045  ;;  %v1864_v32 = vsel %vm1780_vm7, %v4896_v60, %v6788_v48  ;;  %v2496_v60 = vrot.slane %v5605_v2, 2  ;;  %v2479_v62 = vsel %vm2427_vm12, %v5623_v50, %v2478_v27 }
 0x1e0   : > { %3859 = vmatmul.msk.bf16.gmra.mxu2 %vm2613_vm11, %v2604_v19 }
 0x1e1   : > { %1966 = vrot.lane.b32.xlu2 %v1864_v32, %s4089_s3  ;;  %v5629_v48 = vor.u32 %v2497_v52, %v2496_v60  ;;  %v2666_v32 = vsel %vm631_vm2, %v2623_v40, %v5464_v41  ;;  %v2187_v41 = vsel %vm2139_vm9, %v5316_v22, %v5491_v21  ;;  %v6674_v40 = vrot.slane %v5236_v43, 2 }
 0x1e2   : > { %2260 = vrot.lane.b32.xlu0 %v2195_v63, %s4092_s28  ;;  %v2247_v19 = vpop.permute.xlu2 %2246  ;;  %v2709_v47 = vsel %vm2699_vm1, %v2666_v32, %v2103_v57  ;;  %v5639_v63 = vld [vmem:[#allocation2 + $0x98] sm:$0xff]  ;;  %v6790_v57 = vrot.slane %v5174_v16, 1  ;;  %v2480_v60 = vrot.slane %v5291_v44, 2  ;;  %v2307_v52 = vrot.slane %v5174_v16, 2 }
 0x1e3   : > { %v2752_v35 = vsel %vm2742_vm4, %v2709_v47, %v2247_v19  ;;  %v5643_v20 = vsel %vm2427_vm12, %v2494_v39, %v5629_v48  ;;  %v2481_v39 = vrot.slane %v5263_v24, 3  ;;  %v2605_v32 = vrot.slane %v5639_v63, 3  ;;  %v5666_v47 = vpop.f32.mrf.mxu2 }
 0x1e4   : > { %v2535_v38 = vpop.permute.xlu0 %2534  ;;  %6789 = vst [vmem:[#allocation65_spill] sm:$0xff] %v5643_v20  ;;  %v5654_v19 = vsel %vm1993_vm6, %v6790_v57, %v6673_v7  ;;  %v2795_v22 = vsel %vm2785_vm5, %v2752_v35, %v5496_v36  ;;  %v2310_v57 = vsel %vm2283_vm8, %v2307_v52, %v6674_v40  ;;  %v6677_v40 = vrot.slane %v5493_v29, 1 }
 0x1e5   : > { %2546 = vrot.lane.b32.xlu1 %v2479_v62, %s4093_s16  ;;  %v5673_v36 = vor.u32 %v2481_v39, %v2480_v60  ;;  %v2606_v16 = vsel %vm2571_vm10, %v2603_v14, %v2605_v32  ;;  %v6675_v60 = vrot.slane %v5419_v11, 1  ;;  %v6676_v14 = vrot.slane %v5503_v10, 1 }
 0x1e7   : > { %v5637_v25 = vpop.permute.xlu1 %2335 }
 0x1e9   : > { %2256 = vrot.lane.b32.xlu2 %v2187_v41, %s4092_s28 }
 0x1ea   : > { %2118 = vrot.lane.b32.xlu0 %v5654_v19, %s4091_s26  ;;  %v2391_v21 = vpop.permute.xlu2 %2390 }
 0x1eb   : > { %v2838_v62 = vsel %vm2828_vm14, %v2795_v22, %v2391_v21  ;;  %v6791_v22 = vrot.slane %v5093_v8, 1  ;;  %v6792_v21 = vrot.slane %v5009_v4, 1 }
 0x1ec   : > { %v2249_v41 = vpop.permute.xlu0 %2248  ;;  %v2885_v7 = vsel %vm2871_vm15, %v2838_v62, %v2535_v38  ;;  %v2483_v38 = vsel %vm2427_vm12, %v2478_v27, %v5673_v36  ;;  %v5693_v62 = vpop.f32.mrf.mxu2  ;;  %v1915_v27 = vor.u32 %v5422_v37, %v6675_v60 }
 0x1ed   : > { %2404 = vrot.lane.b32.xlu1 %v2310_v57, %s4094_s30  ;;  %3102 = vmatmul.bf16.gmra.mxu1 %v2885_v7  ;;  %v2018_v20 = vsel %vm1993_vm6, %v6792_v21, %v6791_v22  ;;  %6793 = vst [vmem:[#allocation66_spill] sm:$0xff] %v5693_v62  ;;  %v4009_v21 = vld [vmem:[#allocation2 + $0x28] sm:$0xff] }
 0x1ee   : > { %v1920_v22 = vsel %vm1780_vm7, %v1915_v27, %v6676_v14  ;;  %v5718_v27 = vld [vmem:[#allocation2 + $0xa0] sm:$0xff]  ;;  %v6680_v14 = vrot.slane %v5585_v3, 2 }
 0x1ef   : > { %v5675_v35 = vpop.permute.xlu1 %2106  ;;  %6794 = vst [vmem:[#allocation67_spill] sm:$0xff] %v5718_v27 }
 0x1f0   : > { %3860 = vmatmul.msk.bf16.gmra.mxu2 %vm2613_vm11, %v2606_v16  ;;  %v2029_v16 = vrot.slane %v5585_v3, 1 }
 0x1f1   : > { %2114 = vrot.lane.b32.xlu2 %v2018_v20, %s4091_s26 }
 0x1f2   : > { %2548 = vrot.lane.b32.xlu0 %v2483_v38, %s4093_s16  ;;  %v2105_v7 = vpop.permute.xlu2 %2104 }
 0x1f4   : > { %v5689_v39 = vpop.permute.xlu0 %2337 }
 0x1f5   : > { %2349 = vrot.lane.b32.xlu1 %v2310_v57, %s4090_s20  ;;  %v2625_v57 = vsel %vm2613_vm11, %v4009_v21, %v5549_v23  ;;  %v6678_v23 = vrot.slane %v5718_v27, 3 }
 0x1f6   : > { %v2668_v37 = vsel %vm631_vm2, %v2625_v57, %v5607_v6  ;;  %v5730_v57 = vpop.f32.mrf.mxu2 }
 0x1f7   : > { %v5695_v4 = vpop.permute.xlu1 %2049  ;;  %v2711_v60 = vsel %vm2699_vm1, %v2668_v37, %v2105_v7  ;;  %v2608_v7 = vsel %vm2571_vm10, %v2605_v32, %v6678_v23  ;;  %v2475_v37 = vsel %vm2427_vm12, %v5428_v30, %v5623_v50 }
 0x1f8   : > { %v2754_v21 = vsel %vm2742_vm4, %v2711_v60, %v2249_v41 }
 0x1f9   : > { %2057 = vrot.lane.b32.xlu2 %v2018_v20, %s4088_s0  ;;  %v2030_v20 = vsel %vm1993_vm6, %v6677_v40, %v2029_v16  ;;  %v2319_v40 = vrot.slane %v5639_v63, 2  ;;  %v2797_v32 = vsel %vm2785_vm5, %v2754_v21, %v5637_v25 }
 0x1fa   : > { %1980 = vrot.lane.b32.xlu0 %v1920_v22, %s4089_s3  ;;  %v1961_v38 = vpop.permute.xlu2 %1960  ;;  %v5722_v22 = vrot.slane %v5639_v63, 1 }
 0x1fb   : > { %v2320_v30 = vsel %vm2283_vm8, %v6680_v14, %v2319_v40  ;;  %v2322_v25 = vsel %vm2283_vm8, %v2319_v40, %v4719_v17  ;;  %v1887_v40 = vrot.slane %v5561_v31, 1  ;;  %v2196_v31 = vrot.slane %v5291_v44, 1 }
 0x1fc   : > { %v5712_v62 = vpop.permute.xlu0 %1962  ;;  %v2032_v41 = vsel %vm1993_vm6, %v2029_v16, %v5722_v22  ;;  %v2197_v14 = vrot.slane %v5263_v24, 2  ;;  %v6797_v44 = vrot.slane %v4716_v13, 2 }
 0x1fd   : > { %2126 = vrot.lane.b32.xlu1 %v2030_v20, %s4091_s26 }
 0x1ff   : > { %v5725_v6 = vpop.permute.xlu1 %2394 }
 0x200   : > { %3861 = vmatmul.msk.bf16.gmra.mxu2 %vm2613_vm11, %v2608_v7 }
 0x201   : > { %2544 = vrot.lane.b32.xlu2 %v2475_v37, %s4093_s16  ;;  %v6795_v37 = vrot.slane %v5093_v8, 2 }
 0x202   : > { %2128 = vrot.lane.b32.xlu0 %v2032_v41, %s4091_s26  ;;  %v2393_v60 = vpop.permute.xlu2 %2392 }
 0x203   : > { %v2840_v7 = vsel %vm2828_vm14, %v2797_v32, %v2393_v60  ;;  %v2308_v27 = vsel %vm2283_vm8, %v6795_v37, %v2307_v52  ;;  %v2375_v52 = vpack.c.b16 %v4809_v15, %v4809_v15  ;;  %v4011_v60 = vld [vmem:[#allocation2 + $0x30] sm:$0xff] }
 0x204   : > { %v2537_v23 = vpop.permute.xlu0 %2536 }
 0x205   : > { %2414 = vrot.lane.b32.xlu1 %v2320_v30, %s4094_s30  ;;  %v2888_v50 = vsel %vm2871_vm15, %v2840_v7, %v2537_v23  ;;  %v2627_v7 = vsel %vm2613_vm11, %v4011_v60, %v1961_v38  ;;  %v2212_v38 = vrot.slane %v5605_v2, 1 }
 0x206   : > { %3107 = vmatmul.bf16.gmra.mxu1 %v2888_v50  ;;  %v2670_v15 = vsel %vm631_vm2, %v2627_v7, %v5588_v9 }
 0x207   : > { %v5750_v16 = vpop.permute.xlu1 %2339  ;;  %v2713_v9 = vsel %vm2699_vm1, %v2670_v15, %v5675_v35  ;;  %v5809_v35 = vshrl.u32 %v5639_v63, 16 }
 0x209   : > { %2402 = vrot.lane.b32.xlu2 %v2308_v27, %s4094_s30 }
 0x20a   : > { %2416 = vrot.lane.b32.xlu0 %v2322_v25, %s4094_s30  ;;  %v2251_v21 = vpop.permute.xlu2 %2250 }
 0x20c   : > { %v5759_v32 = vpop.permute.xlu0 %2252 }
 0x20d   : > { %2069 = vrot.lane.b32.xlu1 %v2030_v20, %s4088_s0  ;;  %v6796_v20 = vrot.slane %v5436_v26, 1  ;;  %v2213_v26 = vrot.slane %v5602_v49, 2 }
 0x20f   : > { %v5762_v23 = vpop.permute.xlu1 %1964  ;;  %v1883_v50 = vor.u32 %v5444_v5, %v6796_v20  ;;  %v5800_v20 = vor.u32 %v2197_v14, %v2196_v31  ;;  %v2500_v31 = vrot.slane %v5809_v35, 2 }
 0x211   : > { %2347 = vrot.lane.b32.xlu2 %v2308_v27, %s4090_s20  ;;  %v1888_v37 = vsel %vm1780_vm7, %v1883_v50, %v1887_v40  ;;  %v5806_v50 = vshll.u32 %v5639_v63, 16  ;;  %v2199_v14 = vsel %vm2139_vm9, %v5594_v56, %v5800_v20 }
 0x212   : > { %2071 = vrot.lane.b32.xlu0 %v2032_v41, %s4088_s0  ;;  %v2109_v8 = vpop.permute.xlu2 %2108  ;;  %v5778_v41 = vrot.slane %v2375_v52, 2  ;;  %v2756_v52 = vsel %vm2742_vm4, %v2713_v9, %v2251_v21 }
 0x213   : > { %v2799_v21 = vsel %vm2785_vm5, %v2756_v52, %v5689_v39  ;;  %v1891_v39 = vor.u32 %v5564_v28, %v1887_v40 }
 0x214   : > { %v5768_v17 = vpop.permute.xlu0 %2110  ;;  %v2381_v7 = vsel %vm2283_vm8, %v6797_v44, %v5778_v41  ;;  %v2842_v9 = vsel %vm2828_vm14, %v2799_v21, %v5725_v6  ;;  %v5843_v6 = vld [vmem:[%s6582_s6] ss:$0 sm:$0xff] }
 0x215   : > { %2359 = vrot.lane.b32.xlu1 %v2320_v30, %s4090_s20  ;;  %v3083_v30 = vpop.f32.mrf.mxu1 }
 0x217   : > { %v5776_v27 = vpop.permute.xlu1 %2053 }
 0x219   : > { %1972 = vrot.lane.b32.xlu2 %v1888_v37, %s4089_s3 }
 0x21a   : > { %2361 = vrot.lane.b32.xlu0 %v2322_v25, %s4090_s20  ;;  %v5789_v5 = vpop.permute.xlu2 %2051  ;;  %v5803_v25 = vor.u32 %v2213_v26, %v2212_v38  ;;  %v2501_v38 = vrot.slane %v5806_v50, 3 }
 0x21c   : > { %v5794_v60 = vpop.permute.xlu0 %2540  ;;  %v2215_v37 = vsel %vm2139_vm9, %v5532_v54, %v5803_v25  ;;  %v6798_v54 = vrot.slane %v5263_v24, 1  ;;  %v5838_v28 = vor.u32 %v2501_v38, %v2500_v31  ;;  %v6682_v24 = vrot.slane %v5406_v12, 1 }
 0x21d   : > { %2420 = vrot.lane.b32.xlu1 %v2381_v7, %s4094_s30  ;;  %v1927_v7 = vrot.slane %v5602_v49, 1  ;;  %v3085_v13 = vpop.f32.mrf.mxu1 }
 0x21e   : > { %v1896_v44 = vsel %vm1780_vm7, %v1891_v39, %v6798_v54  ;;  %v3086_v21 = vadd.f32 %v5843_v6, %v3085_v13  ;;  %v2503_v13 = vsel %vm2427_vm12, %v5629_v48, %v5838_v28  ;;  %v2216_v54 = vrot.slane %v5809_v35, 1 }
 0x21f   : > { %v5813_v15 = vpop.permute.xlu1 %2254  ;;  %v1931_v38 = vor.u32 %v5605_v2, %v1927_v7 }
 0x220   : > { %v3199_v2 = vadd.f32 %v5238_v18, %v3086_v21 }
 0x221   : > { %2262 = vrot.lane.b32.xlu2 %v2199_v14, %s4092_s28  ;;  %v4012_v14 = vld [vmem:[#allocation2 + $0x38] sm:$0xff] }
 0x222   : > { %2270 = vrot.lane.b32.xlu0 %v2215_v37, %s4092_s28  ;;  %v2539_v26 = vpop.permute.xlu2 %2538  ;;  %v2629_v37 = vsel %vm2613_vm11, %v4012_v14, %v5712_v62  ;;  %v6799_v62 = vrot.slane %v5493_v29, 1  ;;  %v6684_v14 = vrot.slane %v5324_v33, 2 }
 0x223   : > { %v2891_v56 = vsel %vm2871_vm15, %v2842_v9, %v2539_v26  ;;  %v2672_v26 = vsel %vm631_vm2, %v2629_v37, %v5695_v4  ;;  %v3084_v4 = vadd.f32 %v5843_v6, %v3083_v30  ;;  %v6685_v9 = vrot.slane %v5806_v50, 1 }
 0x224   : > { %v5829_v52 = vpop.permute.xlu0 %2398  ;;  %3112 = vmatmul.bf16.gmra.mxu1 %v2891_v56  ;;  %v5856_v31 = vsel %vm1993_vm6, %v6682_v24, %v6799_v62  ;;  %v2715_v39 = vsel %vm2699_vm1, %v2672_v26, %v2109_v8  ;;  %v2217_v30 = vrot.slane %v5806_v50, 2  ;;  %v2518_v37 = vshrl.u32 %v4826_v51, 16 }
 0x225   : > { %1974 = vrot.lane.b32.xlu1 %v1896_v44, %s4089_s3  ;;  %v2758_v8 = vsel %vm2742_vm4, %v2715_v39, %v5759_v32  ;;  %v1936_v48 = vsel %vm1780_vm7, %v1931_v38, %v6685_v9  ;;  %v2521_v26 = vshll.u32 %v4826_v51, 16  ;;  %v3197_v18 = vadd.f32 %v5203_v46, %v3084_v4  ;;  %v1661_v46 = vld [vmem:[#allocation2 + $0xa0] sm:$0x7] }
 0x226   : > { %v6683_v32 = vrot.slane %v5493_v29, 2  ;;  %v2801_v21 = vsel %vm2785_vm5, %v2758_v8, %v5750_v16  ;;  %v3301_v38 = vmax.f32 %v3199_v2, 0.0  ;;  %v5898_v24 = vor.u32 %v2217_v30, %v2216_v54 }
 0x227   : > { %v5846_v40 = vpop.permute.xlu1 %2343  ;;  %v6801_v4 = vrot.slane %v5236_v43, 2  ;;  %v2520_v2 = vrot.slane %v2518_v37, 2  ;;  %v2523_v8 = vrot.slane %v2521_v26, 3 }
 0x228   : > { %v2228_v37 = vsel %vm2139_vm9, %v5898_v24, %v4763_v0 }
 0x229   : > { %2067 = vrot.lane.b32.xlu2 %v5856_v31, %s4088_s0  ;;  %v5905_v16 = vsel %vm2283_vm8, %v6801_v4, %v6684_v14  ;;  %v3342_v4 = vmul.f32 %v3301_v38, %v4380_v1  ;;  %v5922_v26 = vor.u32 %v2523_v8, %v2520_v2  ;;  %v5928_v1 = vshll.u32 %v5324_v33, 16  ;;  %v4013_v8 = vld [vmem:[#allocation2 + $0x40] sm:$0xff] }
 0x22a   : > { %2558 = vrot.lane.b32.xlu0 %v2503_v13, %s4093_s16  ;;  %v6800_v13 = vrot.slane %v5585_v3, 2  ;;  %v5936_v2 = vshrl.u32 %v5324_v33, 16 }
 0x22b   : > { %v2397_v56 = vpop.permute.xlu2 %2396 }
 0x22c   : > { %v5874_v44 = vpop.permute.xlu0 %2112  ;;  %v2844_v39 = vsel %vm2828_vm14, %v2801_v21, %v2397_v56  ;;  %v3300_v21 = vmax.f32 %v3197_v18, 0.0 }
 0x22d   : > { %1984 = vrot.lane.b32.xlu1 %v1936_v48, %s4089_s3  ;;  %v5896_v48 = vsel %vm2283_vm8, %v6683_v32, %v6800_v13  ;;  %v2894_v13 = vsel %vm2871_vm15, %v2844_v39, %v5794_v60  ;;  %v1778_v32 = vunpack.c.l.b16 %v1661_v46  ;;  %v6802_v46 = vld [vmem:[#allocation43_spill] sm:$0xff] }
 0x22e   : > { %v3341_v18 = vmul.f32 %v3300_v21, %v4366_v59  ;;  %v2631_v59 = vsel %vm2613_vm11, %v4013_v8, %v5762_v23  ;;  %v2201_v23 = vrot.slane %v5928_v1, 2 }
 0x22f   : > { %v5888_v62 = vpop.permute.xlu1 %1968  ;;  %v5925_v39 = vpack.c.b16 %v1778_v32, %v1778_v32 }
 0x230   : > { %v3088_v56 = vpop.f32.mrf.mxu1  ;;  %v3382_v38 = vadd.f32 %v3342_v4, %v3341_v18  ;;  %v2200_v18 = vrot.slane %v5936_v2, 1 }
 0x231   : > { %2357 = vrot.lane.b32.xlu2 %v5896_v48, %s4090_s20  ;;  %v3089_v54 = vadd.f32 %v5843_v6, %v3088_v56  ;;  %v2033_v4 = vrot.slane %v5925_v39, 1 }
 0x232   : > { %2406 = vrot.lane.b32.xlu0 %v5905_v16, %s4094_s30  ;;  %v5963_v8 = vor.u32 %v2201_v23, %v2200_v18  ;;  %v6807_v23 = vld [vmem:[#allocation48_spill] sm:$0xff] }
 0x233   : > { %v2342_v30 = vpop.permute.xlu2 %2341  ;;  %v3202_v9 = vadd.f32 %v5305_v61, %v3089_v54  ;;  %v6803_v54 = vrot.slane %v6802_v46, 1 }
 0x234   : > { %v5915_v14 = vpop.permute.xlu0 %2055  ;;  %3117 = vmatmul.bf16.gmra.mxu1 %v2894_v13 }
 0x235   : > { %2274 = vrot.lane.b32.xlu1 %v2228_v37, %s4092_s28  ;;  %v3302_v56 = vmax.f32 %v3202_v9, 0.0  ;;  %v2091_v0 = vsel %vm1993_vm6, %v5722_v22, %v6803_v54  ;;  %v6804_v9 = vld [vmem:[#allocation47_spill] sm:$0xff] }
 0x236   : > { %v2525_v32 = vsel %vm2427_vm12, %v6804_v9, %v5922_v26 }
 0x237   : > { %v2543_v60 = vpop.permute.xlu1 %2542  ;;  %v3343_v61 = vmul.f32 %v3302_v56, %v4364_v58  ;;  %v2674_v58 = vsel %vm631_vm2, %v2631_v59, %v5789_v5  ;;  %v6805_v59 = vld [vmem:[#allocation59_spill] sm:$0xff] }
 0x238   : > { %v2717_v56 = vsel %vm2699_vm1, %v2674_v58, %v5768_v17  ;;  %v3090_v46 = vpop.f32.mrf.mxu1  ;;  %v6806_v58 = vrot.slane %v5503_v10, 1  ;;  %v1941_v10 = vshll.u32 %v5925_v39, 16 }
 0x239   : > { %2130 = vrot.lane.b32.xlu2 %v2091_v0, %s4091_s26  ;;  %v3383_v21 = vadd.f32 %v3382_v38, %v3343_v61  ;;  %v2760_v5 = vsel %vm2742_vm4, %v2717_v56, %v5813_v15  ;;  %v3091_v54 = vadd.f32 %v5843_v6, %v3090_v46  ;;  %v2034_v0 = vsel %vm1993_vm6, %v5722_v22, %v2033_v4 }
 0x23a   : > { %2564 = vrot.lane.b32.xlu0 %v2525_v32, %s4093_s16  ;;  %v2803_v38 = vsel %vm2785_vm5, %v2760_v5, %v2342_v30  ;;  %v2203_v22 = vsel %vm2139_vm9, %v5800_v20, %v5963_v8  ;;  %v6808_v20 = vrot.slane %v6807_v23, 1  ;;  %v6814_v23 = vld [vmem:[#allocation7_spill] sm:$0xff] }
 0x23b   : > { %v1967_v13 = vpop.permute.xlu2 %1966  ;;  %v2846_v17 = vsel %vm2828_vm14, %v2803_v38, %v5829_v52  ;;  %v3204_v9 = vadd.f32 %v6805_v59, %v3091_v54  ;;  %v6810_v54 = vld [vmem:[#allocation60_spill] sm:$0xff] }
 0x23c   : > { %v5948_v37 = vpop.permute.xlu0 %2400  ;;  %v2897_v30 = vsel %vm2871_vm15, %v2846_v17, %v2543_v60  ;;  %v6813_v17 = vrot.slane %v5806_v50, 1  ;;  %v4014_v59 = vld [vmem:[#allocation2 + $0x48] sm:$0xff]  ;;  %v2219_v50 = vsel %vm2139_vm9, %v5803_v25, %v5898_v24 }
 0x23d   : > { %2075 = vrot.lane.b32.xlu1 %v2033_v4, %s4088_s0  ;;  %v3303_v52 = vmax.f32 %v3204_v9, 0.0  ;;  %v2633_v9 = vsel %vm2613_vm11, %v4014_v59, %v1967_v13  ;;  %v6815_v24 = vld [vmem:[#allocation61_spill] sm:$0xff] }
 0x23e   : > { %v6816_v59 = vld [vmem:[#allocation45_spill] sm:$0xff] }
 0x23f   : > { %v5958_v61 = vpop.permute.xlu1 %2258 }
 0x241   : > { %2073 = vrot.lane.b32.xlu2 %v2034_v0, %s4088_s0 }
 0x242   : > { %2061 = vrot.lane.b32.xlu0 %v5654_v19, %s4088_s0  ;;  %v1923_v19 = vor.u32 %v5506_v45, %v6806_v58  ;;  %v6809_v45 = vld [vmem:[#allocation8_spill] sm:$0xff]  ;;  %v2484_v58 = vrot.slane %v5936_v2, 2 }
 0x243   : > { %v2257_v15 = vpop.permute.xlu2 %2256  ;;  %v3344_v5 = vmul.f32 %v3303_v52, %v6809_v45 }
 0x244   : > { %v5972_v32 = vpop.permute.xlu0 %2345  ;;  %3122 = vmatmul.bf16.gmra.mxu1 %v2897_v30  ;;  %v1928_v60 = vsel %vm1780_vm7, %v1923_v19, %v1927_v7  ;;  %v6811_v7 = vld [vmem:[#allocation46_spill] sm:$0xff]  ;;  %v1939_v30 = vor.u32 %v5809_v35, %v6813_v17  ;;  %v2485_v19 = vrot.slane %v5928_v1, 3  ;;  %v2676_v35 = vsel %vm631_vm2, %v2633_v9, %v5776_v27 }
 0x245   : > { %2264 = vrot.lane.b32.xlu1 %v2203_v22, %s4092_s28  ;;  %v6812_v0 = vrot.slane %v6811_v7, 2  ;;  %v2023_v9 = vrot.slane %v5324_v33, 1 }
 0x247   : > { %v5981_v4 = vpop.permute.xlu1 %2116 }
 0x249   : > { %1982 = vrot.lane.b32.xlu2 %v1928_v60, %s4089_s3  ;;  %v3093_v18 = vpop.f32.mrf.mxu1  ;;  %v1943_v60 = vrot.slane %v1941_v10, 1 }
 0x24a   : > { %2134 = vrot.lane.b32.xlu0 %v6808_v20, %s4091_s26  ;;  %v3094_v56 = vadd.f32 %v5843_v6, %v3093_v18  ;;  %v3384_v18 = vadd.f32 %v3383_v21, %v3344_v5  ;;  %v2486_v21 = vor.u32 %v2485_v19, %v2484_v58 }
 0x24b   : > { %v2115_v46 = vpop.permute.xlu2 %2114  ;;  %v1944_v13 = vsel %vm1780_vm7, %v1939_v30, %v1943_v60 }
 0x24c   : > { %v5993_v38 = vpop.permute.xlu0 %1970  ;;  %v3207_v49 = vadd.f32 %v6810_v54, %v3094_v56  ;;  %v2719_v54 = vsel %vm2699_vm1, %v2676_v35, %v5874_v44  ;;  %v2507_v44 = vsel %vm2427_vm12, %v5838_v28, %v6816_v59 }
 0x24d   : > { %2365 = vrot.lane.b32.xlu1 %v6812_v0, %s4090_s20  ;;  %v2762_v7 = vsel %vm2742_vm4, %v2719_v54, %v2257_v15 }
 0x24e   : > { %v3304_v22 = vmax.f32 %v3207_v49, 0.0  ;;  %v2491_v49 = vsel %vm2427_vm12, %v2486_v21, %v5449_v55  ;;  %v2805_v17 = vsel %vm2785_vm5, %v2762_v7, %v5846_v40  ;;  %v6817_v40 = vld [vmem:[#allocation9_spill] sm:$0xff] }
 0x24f   : > { %v6005_v52 = vpop.permute.xlu1 %2059  ;;  %v2848_v58 = vsel %vm2828_vm14, %v2805_v17, %v5948_v37  ;;  %v2487_v37 = vsel %vm2427_vm12, %v5673_v36, %v2486_v21  ;;  %v6821_v21 = vrot.slane %v5324_v33, 2 }
 0x250   : > { %v3345_v20 = vmul.f32 %v3304_v22, %v6814_v23  ;;  %v6818_v23 = vld [vmem:[#allocation62_spill] sm:$0xff] }
 0x251   : > { %2272 = vrot.lane.b32.xlu2 %v2219_v50, %s4092_s28  ;;  %v3095_v56 = vpop.f32.mrf.mxu1 }
 0x252   : > { %v3385_v45 = vadd.f32 %v3384_v18, %v3345_v20  ;;  %1986 = vrot.lane.b32.xlu0 %v1944_v13, %s4089_s3  ;;  %v3096_v10 = vadd.f32 %v5843_v6, %v3095_v56  ;;  %v6819_v20 = vrot.slane %v5236_v43, 1  ;;  %v4015_v56 = vld [vmem:[#allocation2 + $0x50] sm:$0xff] }
 0x253   : > { %v6017_v5 = vpop.permute.xlu2 %2057 }
 0x254   : > { %v6021_v25 = vpop.permute.xlu0 %2260  ;;  %v3209_v27 = vadd.f32 %v6815_v24, %v3096_v10  ;;  %v2024_v50 = vsel %vm1993_vm6, %v6819_v20, %v2023_v9  ;;  %v2635_v10 = vsel %vm2613_vm11, %v4015_v56, %v5888_v62  ;;  %v6820_v24 = vld [vmem:[#allocation11_spill] sm:$0xff] }
 0x255   : > { %2552 = vrot.lane.b32.xlu1 %v2491_v49, %s4093_s16  ;;  %v2678_v49 = vsel %vm631_vm2, %v2635_v10, %v5915_v14  ;;  %v4016_v56 = vld [vmem:[#allocation2 + $0x58] sm:$0xff] }
 0x256   : > { %v3305_v30 = vmax.f32 %v3209_v27, 0.0  ;;  %v2313_v27 = vrot.slane %v5406_v12, 2  ;;  %v2721_v17 = vsel %vm2699_vm1, %v2678_v49, %v2115_v46  ;;  %v1903_v46 = vrot.slane %v5928_v1, 1 }
 0x257   : > { %v2547_v0 = vpop.permute.xlu1 %2546  ;;  %v2764_v14 = vsel %vm2742_vm4, %v2721_v17, %v5958_v61 }
 0x258   : > { %v3346_v19 = vmul.f32 %v3305_v30, %v6817_v40  ;;  %v2314_v59 = vsel %vm2283_vm8, %v6821_v21, %v2313_v27  ;;  %v1907_v1 = vor.u32 %v5936_v2, %v1903_v46  ;;  %v2637_v2 = vsel %vm2613_vm11, %v4016_v56, %v5993_v38 }
 0x259   : > { %2560 = vrot.lane.b32.xlu2 %v2507_v44, %s4093_s16  ;;  %v3098_v22 = vpop.f32.mrf.mxu1  ;;  %v2680_v10 = vsel %vm631_vm2, %v2637_v2, %v6017_v5 }
 0x25a   : > { %2351 = vrot.lane.b32.xlu0 %v5905_v16, %s4090_s20  ;;  %v3099_v55 = vadd.f32 %v5843_v6, %v3098_v22  ;;  %v3386_v54 = vadd.f32 %v3385_v45, %v3346_v19  ;;  %v6822_v19 = vld [vmem:[#allocation57_spill] sm:$0xff]  ;;  %v2723_v49 = vsel %vm2699_vm1, %v2680_v10, %v5981_v4 }
 0x25b   : > { %v2545_v15 = vpop.permute.xlu2 %2544  ;;  %v1904_v61 = vsel %vm1780_vm7, %v6822_v19, %v1903_v46  ;;  %v6830_v19 = vld [vmem:[#allocation65_spill] sm:$0xff] }
 0x25c   : > { %v6041_v18 = vpop.permute.xlu0 %2118  ;;  %v3212_v28 = vadd.f32 %v6818_v23, %v3099_v55  ;;  %v2900_v16 = vsel %vm2871_vm15, %v2848_v58, %v2545_v15  ;;  %v2807_v15 = vsel %vm2785_vm5, %v2764_v14, %v5972_v32  ;;  %v6823_v32 = vrot.slane %v5419_v11, 1 }
 0x25d   : > { %2063 = vrot.lane.b32.xlu1 %v2024_v50, %s4088_s0  ;;  %3127 = vmatmul.bf16.gmra.mxu1 %v2900_v16  ;;  %v6824_v16 = vld [vmem:[#allocation10_spill] sm:$0xff] }
 0x25e   : > { %v3306_v35 = vmax.f32 %v3212_v28, 0.0  ;;  %v1912_v28 = vsel %vm1780_vm7, %v1907_v1, %v6823_v32 }
 0x25f   : > { %v6051_v13 = vpop.permute.xlu1 %2404 }
 0x260   : > { %v3347_v43 = vmul.f32 %v3306_v35, %v6820_v24 }
 0x261   : > { %2550 = vrot.lane.b32.xlu2 %v2487_v37, %s4093_s16  ;;  %v3100_v7 = vpop.f32.mrf.mxu1 }
 0x262   : > { %v3387_v30 = vadd.f32 %v3386_v54, %v3347_v43  ;;  %2422 = vrot.lane.b32.xlu0 %v5778_v41, %s4094_s30  ;;  %v3101_v36 = vadd.f32 %v5843_v6, %v3100_v7  ;;  %v1945_v41 = vshrl.u32 %v5925_v39, 16  ;;  %v6825_v43 = vld [vmem:[#allocation13_spill] sm:$0xff] }
 0x263   : > { %v2403_v62 = vpop.permute.xlu2 %2402 }
 0x264   : > { %v2549_v45 = vpop.permute.xlu0 %2548  ;;  %v3214_v44 = vadd.f32 %v5575_v42, %v3101_v36  ;;  %v1947_v55 = vor.u32 %v1945_v41, %v1943_v60  ;;  %v2850_v40 = vsel %vm2828_vm14, %v2807_v15, %v2403_v62  ;;  %v6827_v41 = vld [vmem:[#allocation15_spill] sm:$0xff] }
 0x265   : > { %2353 = vrot.lane.b32.xlu1 %v2314_v59, %s4090_s20  ;;  %v2903_v20 = vsel %vm2871_vm15, %v2850_v40, %v2547_v0 }
 0x266   : > { %v3307_v58 = vmax.f32 %v3214_v44, 0.0 }
 0x267   : > { %v6077_v22 = vpop.permute.xlu1 %2349 }
 0x268   : > { %v3348_v35 = vmul.f32 %v3307_v58, %v6824_v16 }
 0x269   : > { %1988 = vrot.lane.b32.xlu2 %v1947_v55, %s4089_s3 }
 0x26a   : > { %1976 = vrot.lane.b32.xlu0 %v1904_v61, %s4089_s3  ;;  %v3103_v42 = vpop.f32.mrf.mxu1  ;;  %v3388_v24 = vadd.f32 %v3387_v30, %v3348_v35  ;;  %v4017_v30 = vld [vmem:[#allocation2 + $0x60] sm:$0xff] }
 0x26b   : > { %v3104_v39 = vadd.f32 %v5843_v6, %v3103_v42  ;;  %v2348_v23 = vpop.permute.xlu2 %2347 }
 0x26c   : > { %v6088_v60 = vpop.permute.xlu0 %1980 }
 0x26d   : > { %v3217_v37 = vadd.f32 %v5618_v34, %v3104_v39  ;;  %1978 = vrot.lane.b32.xlu1 %v1912_v28, %s4089_s3  ;;  %3132 = vmatmul.bf16.gmra.mxu1 %v2903_v20  ;;  %v2207_v34 = vsel %vm2139_vm9, %v5963_v8, %v5468_v53  ;;  %v2766_v53 = vsel %vm2742_vm4, %v2723_v49, %v6021_v25  ;;  %v6828_v25 = vld [vmem:[#allocation49_spill] sm:$0xff]  ;;  %v6832_v20 = vld [vmem:[#allocation12_spill] sm:$0xff]  ;;  %s424_s3 = scalar_lea.vmem %s6578_s2, %s4222_s29 }
 0x26e   : > { %v2809_v21 = vsel %vm2785_vm5, %v2766_v53, %v2348_v23  ;;  %v6831_v23 = vld [vmem:[#allocation66_spill] sm:$0xff] }
 0x26f   : > { %v3308_v54 = vmax.f32 %v3217_v37, 0.0  ;;  %v6101_v11 = vpop.permute.xlu1 %2126 }
 0x271   : > { %v3349_v0 = vmul.f32 %v3308_v54, %v6825_v43  ;;  %2120 = vrot.lane.b32.xlu2 %v2024_v50, %s4091_s26  ;;  %v6826_v50 = vld [vmem:[#allocation63_spill] sm:$0xff] }
 0x272   : > { %2266 = vrot.lane.b32.xlu0 %v2207_v34, %s4092_s28  ;;  %v3105_v38 = vpop.f32.mrf.mxu1  ;;  %v4018_v43 = vld [vmem:[#allocation2 + $0x80] sm:$0xff] }
 0x273   : > { %v3389_v7 = vadd.f32 %v3388_v24, %v3349_v0  ;;  %v3106_v5 = vadd.f32 %v5843_v6, %v3105_v38  ;;  %v1973_v17 = vpop.permute.xlu2 %1972  ;;  %v6833_v24 = vrot.slane %v5406_v12, 1  ;;  %v6834_v34 = vld [vmem:[#allocation16_spill] sm:$0xff] }
 0x274   : > { %v6112_v36 = vpop.permute.xlu0 %2128  ;;  %v2639_v62 = vsel %vm2613_vm11, %v4017_v30, %v1973_v17  ;;  %v3226_v30 = vpop.f32.mrf.mxu2 }
 0x275   : > { %v3219_v8 = vadd.f32 %v5666_v47, %v3106_v5  ;;  %v2682_v4 = vsel %vm631_vm2, %v2639_v62, %v6005_v52  ;;  %2268 = vrot.lane.b32.xlu1 %v6826_v50, %s4092_s28  ;;  %v2852_v47 = vsel %vm2828_vm14, %v2809_v21, %v6051_v13  ;;  %v6829_v52 = vld [vmem:[#allocation64_spill] sm:$0xff] }
 0x276   : > { %v6125_v14 = vsel %vm2699_vm1, %v2682_v4, %v6041_v18  ;;  %v2906_v18 = vsel %vm2871_vm15, %v2852_v47, %v2549_v45 }
 0x277   : > { %v3309_v44 = vmax.f32 %v3219_v8, 0.0  ;;  %v2415_v46 = vpop.permute.xlu1 %2414 }
 0x279   : > { %v3350_v55 = vmul.f32 %v3309_v44, %v6827_v41  ;;  %2278 = vrot.lane.b32.xlu2 %v6828_v25, %s4092_s28 }
 0x27a   : > { %2554 = vrot.lane.b32.xlu0 %v6829_v52, %s4093_s16  ;;  %v6836_v52 = vld [vmem:[#allocation18_spill] sm:$0xff] }
 0x27b   : > { %v3390_v15 = vadd.f32 %v3389_v7, %v3350_v55  ;;  %v6134_v58 = vpop.permute.xlu2 %2262 }
 0x27c   : > { %v6136_v40 = vpop.permute.xlu0 %2416 }
 0x27d   : > { %2556 = vrot.lane.b32.xlu1 %v6830_v19, %s4093_s16  ;;  %3137 = vmatmul.bf16.gmra.mxu1 %v2906_v18 }
 0x27f   : > { %v2070_v61 = vpop.permute.xlu1 %2069 }
 0x281   : > { %2408 = vrot.lane.b32.xlu2 %v2314_v59, %s4094_s30 }
 0x282   : > { %2124 = vrot.lane.b32.xlu0 %v5856_v31, %s4091_s26 }
 0x283   : > { %v3108_v13 = vpop.f32.mrf.mxu1  ;;  %v2068_v39 = vpop.permute.xlu2 %2067 }
 0x284   : > { %v6144_v42 = vpop.permute.xlu0 %2071  ;;  %v3109_v1 = vadd.f32 %v5843_v6, %v3108_v13 }
 0x286   : > { %v3222_v32 = vadd.f32 %v6831_v23, %v3109_v1 }
 0x287   : > { %v2360_v28 = vpop.permute.xlu1 %2359 }
 0x288   : > { %v3310_v45 = vmax.f32 %v3222_v32, 0.0 }
 0x289   : > { %2566 = vrot.lane.b32.xlu2 %v5922_v26, %s4093_s16  ;;  %v2026_v26 = vsel %vm1993_vm6, %v2023_v9, %v6833_v24  ;;  %v6835_v9 = vrot.slane %v5493_v29, 2 }
 0x28a   : > { %v3351_v16 = vmul.f32 %v3310_v45, %v6832_v20  ;;  %2412 = vrot.lane.b32.xlu0 %v5896_v48, %s4094_s30  ;;  %v2647_v48 = vsel %vm2613_vm11, %v4018_v43, %v6088_v60 }
 0x28b   : > { %v3110_v59 = vpop.f32.mrf.mxu1  ;;  %v2358_v56 = vpop.permute.xlu2 %2357  ;;  %v2690_v0 = vsel %vm631_vm2, %v2647_v48, %v2068_v39  ;;  %v2316_v60 = vsel %vm2283_vm8, %v2313_v27, %v6835_v9 }
 0x28c   : > { %v3391_v31 = vadd.f32 %v3390_v15, %v3351_v16  ;;  %v6153_v35 = vpop.permute.xlu0 %2361  ;;  %v3111_v37 = vadd.f32 %v5843_v6, %v3110_v59  ;;  %v2733_v5 = vsel %vm2699_vm1, %v2690_v0, %v6101_v11  ;;  %v3228_v27 = vpop.f32.mrf.mxu2  ;;  %v6837_v59 = vld [vmem:[#allocation14_spill] sm:$0xff] }
 0x28e   : > { %v3224_v2 = vadd.f32 %v5730_v57, %v3111_v37 }
 0x28f   : > { %v6157_v10 = vpop.permute.xlu1 %2420 }
 0x290   : > { %v3311_v54 = vmax.f32 %v3224_v2, 0.0 }
 0x291   : > { %2122 = vrot.lane.b32.xlu2 %v2026_v26, %s4091_s26  ;;  %s416_s26 = scalar_lea.vmem [#allocation3], %s415_s15 }
 0x292   : > { %v3352_v49 = vmul.f32 %v3311_v54, %v6834_v34  ;;  %s3556_s28 = sshll.u32 %s416_s26, 4  ;;  %s3557_s28 = int_to_ptr.vmem [resolvable:$true] %s3556_s28 }
 0x293   : > { %v2131_v7 = vpop.permute.xlu2 %2130 }
 0x294   : > { %v3392_v57 = vadd.f32 %v3391_v31, %v3352_v49  ;;  %v2271_v38 = vpop.permute.xlu0 %2270  ;;  %v3231_v45 = vpop.f32.mrf.mxu2  ;;  %v2768_v49 = vsel %vm2742_vm4, %v6125_v14, %v6134_v58 }
 0x295   : > { %v2776_v33 = vsel %vm2742_vm4, %v2733_v5, %v2271_v38  ;;  %v6838_v38 = vld [vmem:[#allocation19_spill] sm:$0xff]  ;;  %v2811_v9 = vsel %vm2785_vm5, %v2768_v49, %v6077_v22 }
 0x296   : > { %v2819_v62 = vsel %vm2785_vm5, %v2776_v33, %v2358_v56 }
 0x297   : > { %v6172_v17 = vpop.permute.xlu1 %1974  ;;  %v2862_v11 = vsel %vm2828_vm14, %v2819_v62, %v2415_v46 }
 0x299   : > { %2410 = vrot.lane.b32.xlu2 %v2316_v60, %s4094_s30  ;;  %s3546_s30 = scalar_lea.sflag [#allocation4], %s415_s15 }
 0x29b   : > { %v6181_v8 = vpop.permute.xlu2 %2073 }
 0x29c   : > { %v2559_v53 = vpop.permute.xlu0 %2558 }
 0x29d   : > { %v2921_v4 = vsel %vm2871_vm15, %v2862_v11, %v2559_v53 }
 0x29e   : > { %3162 = vmatmul.bf16.vlgmr.msrb.gmra.mxu3 %v2921_v4 }
 0x29f   : > { %v1985_v50 = vpop.permute.xlu1 %1984 }
 0x2a1   : > { %2065 = vrot.lane.b32.xlu2 %v2026_v26, %s4088_s0  ;;  %v3113_v21 = vpop.f32.mrf.mxu1  ;;  %s4043_s0 = scalar_lea.hbm %s6588_s12, 2 }
 0x2a2   : > { %v3114_v12 = vadd.f32 %v5843_v6, %v3113_v21  ;;  %v6839_v21 = vld [vmem:[#allocation17_spill] sm:$0xff] }
 0x2a3   : > { %v1983_v55 = vpop.permute.xlu2 %1982 }
 0x2a4   : > { %v2407_v44 = vpop.permute.xlu0 %2406  ;;  %v3227_v41 = vadd.f32 %v3226_v30, %v3114_v12  ;;  %v2649_v47 = vsel %vm2613_vm11, %v5493_v29, %v1983_v55 }
 0x2a5   : > { %v2692_v19 = vsel %vm631_vm2, %v2649_v47, %v2070_v61  ;;  %v2854_v30 = vsel %vm2828_vm14, %v2811_v9, %v2407_v44 }
 0x2a6   : > { %v3312_v25 = vmax.f32 %v3227_v41, 0.0  ;;  %v2735_v20 = vsel %vm2699_vm1, %v2692_v19, %v6112_v36  ;;  %v2651_v36 = vsel %vm2613_vm11, %v5585_v3, %v1985_v50  ;;  %v6840_v41 = vld [vmem:[#allocation53_spill] sm:$0xff] }
 0x2a7   : > { %v2275_v1 = vpop.permute.xlu1 %2274 }
 0x2a8   : > { %v3353_v15 = vmul.f32 %v3312_v25, %v6836_v52 }
 0x2a9   : > { %2355 = vrot.lane.b32.xlu2 %v2316_v60, %s4090_s20  ;;  %v3115_v46 = vpop.f32.mrf.mxu1 }
 0x2aa   : > { %v3393_v18 = vadd.f32 %v3392_v57, %v3353_v15  ;;  %v3116_v13 = vadd.f32 %v5843_v6, %v3115_v46  ;;  %v2694_v57 = vsel %vm631_vm2, %v2651_v36, %v6144_v42  ;;  %v6841_v46 = vld [vmem:[#allocation55_spill] sm:$0xff] }
 0x2ab   : > { %v2273_v32 = vpop.permute.xlu2 %2272  ;;  %v2737_v60 = vsel %vm2699_vm1, %v2694_v57, %v2131_v7  ;;  %v4019_v57 = vld [vmem:[#allocation2 + $0x68] sm:$0xff] }
 0x2ac   : > { %v6193_v39 = vpop.permute.xlu0 %2564  ;;  %v3229_v23 = vadd.f32 %v3228_v27, %v3116_v13  ;;  %v2778_v16 = vsel %vm2742_vm4, %v2735_v20, %v2273_v32  ;;  %v2780_v62 = vsel %vm2742_vm4, %v2737_v60, %v2275_v1  ;;  %v6842_v13 = vld [vmem:[#allocation21_spill] sm:$0xff]  ;;  %v6843_v32 = vld [vmem:[#allocation58_spill] sm:$0xff] }
 0x2ad   : > { %v2821_v37 = vsel %vm2785_vm5, %v2778_v16, %v2360_v28  ;;  %v3233_v28 = vpop.f32.mrf.mxu2  ;;  %v2823_v4 = vsel %vm2785_vm5, %v2780_v62, %v6153_v35 }
 0x2ae   : > { %v3313_v29 = vmax.f32 %v3229_v23, 0.0  ;;  %v2864_v43 = vsel %vm2828_vm14, %v2821_v37, %v6136_v40  ;;  %v2866_v55 = vsel %vm2828_vm14, %v2823_v4, %v6840_v41 }
 0x2af   : > { %v6207_v48 = vpop.permute.xlu1 %2075  ;;  %v2927_v35 = vsel %vm2871_vm15, %v2866_v55, %v6841_v46 }
 0x2b0   : > { %v3354_v31 = vmul.f32 %v3313_v29, %v6837_v59 }
 0x2b1   : > { %v3118_v56 = vpop.f32.mrf.mxu1 }
 0x2b2   : > { %v3394_v61 = vadd.f32 %v3393_v18, %v3354_v31  ;;  %v3119_v2 = vadd.f32 %v5843_v6, %v3118_v56  ;;  %v6844_v56 = vld [vmem:[#allocation56_spill] sm:$0xff] }
 0x2b3   : > { %v2561_v26 = vpop.permute.xlu2 %2560 }
 0x2b4   : > { %v6201_v54 = vpop.permute.xlu0 %2061  ;;  %v3232_v24 = vadd.f32 %v3231_v45, %v3119_v2  ;;  %v2924_v0 = vsel %vm2871_vm15, %v2864_v43, %v2561_v26  ;;  %v6846_v43 = vld [vmem:[#allocation20_spill] sm:$0xff] }
 0x2b5   : > { %3167 = vmatmul.bf16.gmra.mxu3 %v2924_v0  ;;  %v3236_v22 = vpop.f32.mrf.mxu2 }
 0x2b6   : > { %v3314_v34 = vmax.f32 %v3232_v24, 0.0  ;;  %v6845_v24 = vld [vmem:[#allocation54_spill] sm:$0xff] }
 0x2b7   : > { %v2265_v50 = vpop.permute.xlu1 %2264 }
 0x2b8   : > { %v3355_v5 = vmul.f32 %v3314_v34, %v6838_v38  ;;  %v2641_v38 = vsel %vm2613_vm11, %v4019_v57, %v6172_v17 }
 0x2b9   : > { %v3120_v40 = vpop.f32.mrf.mxu1 }
 0x2ba   : > { %v3395_v33 = vadd.f32 %v3394_v61, %v3355_v5  ;;  %v3121_v3 = vadd.f32 %v5843_v6, %v3120_v40 }
 0x2bb   : > { %v2551_v58 = vpop.permute.xlu2 %2550 }
 0x2bc   : > { %v2135_v53 = vpop.permute.xlu0 %2134  ;;  %v3234_v14 = vadd.f32 %v3233_v28, %v3121_v3  ;;  %v2909_v42 = vsel %vm2871_vm15, %v2854_v30, %v2551_v58 }
 0x2bd   : > { %3142 = vmatmul.bf16.gmra.mxu1 %v2909_v42  ;;  %v3238_v59 = vpop.f32.mrf.mxu2 }
 0x2be   : > { %v3315_v11 = vmax.f32 %v3234_v14, 0.0 }
 0x2bf   : > { %v2366_v23 = vpop.permute.xlu1 %2365 }
 0x2c0   : > { %v3356_v12 = vmul.f32 %v3315_v11, %v6839_v21 }
 0x2c1   : > { %v3123_v27 = vpop.f32.mrf.mxu1 }
 0x2c2   : > { %v3396_v7 = vadd.f32 %v3395_v33, %v3356_v12  ;;  %v3124_v44 = vadd.f32 %v5843_v6, %v3123_v27  ;;  %v2684_v33 = vsel %vm631_vm2, %v2641_v38, %v6201_v54  ;;  %v3447_v54 = vld [vmem:[%s6583_s7 + $0x78] sm:$0xff] }
 0x2c3   : > { %v1989_v52 = vpop.permute.xlu2 %1988  ;;  %3449 = vmatpush.msrb.mxu3 %v3447_v54  ;;  %v3439_v38 = vld [vmem:[%s6583_s7 + $0x38] sm:$0xff]  ;;  %v3437_v54 = vld [vmem:[%s6583_s7 + $0x28] sm:$0xff] }
 0x2c4   : > { %v1987_v25 = vpop.permute.xlu0 %1986  ;;  %v3237_v47 = vadd.f32 %v3236_v22, %v3124_v44  ;;  %v6847_v44 = vld [vmem:[#allocation24_spill] sm:$0xff] }
 0x2c5   : > { %v2653_v15 = vsel %vm2613_vm11, %v5639_v63, %v1987_v25  ;;  %3172 = vmatmul.bf16.gmra.mxu3 %v2927_v35  ;;  %v3445_v35 = vld [vmem:[%s6583_s7 + $0x68] sm:$0xff] }
 0x2c6   : > { %v2696_v18 = vsel %vm631_vm2, %v2653_v15, %v6181_v8  ;;  %v3316_v19 = vmax.f32 %v3237_v47, 0.0  ;;  %v1660_v8 = vld [vmem:[#allocation2 + $0xa0] sm:$0x3] }
 0x2c7   : > { %v2739_v45 = vsel %vm2699_vm1, %v2696_v18, %v6843_v32  ;;  %v1755_v0 = vunpack.c.l.b16 %v1660_v8  ;;  %v2553_v49 = vpop.permute.xlu1 %2552 }
 0x2c8   : > { %v3357_v1 = vmul.f32 %v3316_v19, %v6842_v13  ;;  %v2782_v61 = vsel %vm2742_vm4, %v2739_v45, %v6844_v56  ;;  %v3444_v13 = vld [vmem:[%s6583_s7 + $0x60] sm:$0xff]  ;;  %v3442_v56 = vld [vmem:[%s6583_s7 + $0x50] sm:$0xff] }
 0x2c9   : > { %v3125_v20 = vpop.f32.mrf.mxu1  ;;  %v2825_v26 = vsel %vm2785_vm5, %v2782_v61, %v6845_v24  ;;  %v1776_v3 = vpack.c.b16 %v1755_v0, %v1755_v0  ;;  %v6848_v45 = vld [vmem:[#allocation23_spill] sm:$0xff] }
 0x2ca   : > { %v3397_v29 = vadd.f32 %v3396_v7, %v3357_v1  ;;  %v3126_v16 = vadd.f32 %v5843_v6, %v3125_v20  ;;  %v2868_v28 = vsel %vm2828_vm14, %v2825_v26, %v6157_v10  ;;  %v3241_v10 = vpop.f32.mrf.mxu2  ;;  %v3441_v26 = vld [vmem:[%s6583_s7 + $0x48] sm:$0xff]  ;;  %v3440_v0 = vld [vmem:[%s6583_s7 + $0x40] sm:$0xff] }
 0x2cb   : > { %v2121_v37 = vpop.permute.xlu2 %2120  ;;  %v2930_v9 = vsel %vm2871_vm15, %v2868_v28, %v6193_v39  ;;  %v2656_v30 = vsel %vm2613_vm11, %v1776_v3, %v1989_v52  ;;  %v3446_v52 = vld [vmem:[%s6583_s7 + $0x70] sm:$0xff]  ;;  %v6849_v28 = vld [vmem:[#allocation28_spill] sm:$0xff] }
 0x2cc   : > { %v2352_v63 = vpop.permute.xlu0 %2351  ;;  %v3239_v31 = vadd.f32 %v3238_v59, %v3126_v16  ;;  %v2727_v60 = vsel %vm2699_vm1, %v2684_v33, %v2121_v37  ;;  %v2698_v17 = vsel %vm631_vm2, %v2656_v30, %v6207_v48  ;;  %3450 = vmatpush.msrb.mxu3 %v3446_v52  ;;  %v3443_v37 = vld [vmem:[%s6583_s7 + $0x58] sm:$0xff]  ;;  %v6850_v30 = vld [vmem:[#allocation44_spill] sm:$0xff] }
 0x2cd   : > { %v2770_v62 = vsel %vm2742_vm4, %v2727_v60, %v2265_v50  ;;  %v2741_v11 = vsel %vm2699_vm1, %v2698_v17, %v2135_v53 }
 0x2ce   : > { %v3317_v2 = vmax.f32 %v3239_v31, 0.0  ;;  %v2813_v39 = vsel %vm2785_vm5, %v2770_v62, %v2352_v63  ;;  %3451 = vmatpush.msrb.mxu3 %v3445_v35  ;;  %v6852_v62 = vld [vmem:[#allocation67_spill] sm:$0xff] }
 0x2cf   : > { %v2064_v12 = vpop.permute.xlu1 %2063  ;;  %v6853_v17 = vrot.slane %v6852_v62, 3  ;;  %v3432_v35 = vld [vmem:[%s6583_s7] sm:$0xff] }
 0x2d0   : > { %v3358_v36 = vmul.f32 %v3317_v2, %v6846_v43  ;;  %3452 = vmatpush.msrb.mxu3 %v3444_v13  ;;  %v6859_v62 = vld [vmem:[#allocation40_spill] sm:$0xff] }
 0x2d2   : > { %v3398_v34 = vadd.f32 %v3397_v29, %v3358_v36  ;;  %v3243_v55 = vpop.f32.mrf.mxu2  ;;  %v4020_v29 = vld [vmem:[#allocation2 + $0x70] sm:$0xff]  ;;  %3453 = vmatpush.msrb.mxu3 %v3443_v37 }
 0x2d3   : > { %v2279_v40 = vpop.permute.xlu2 %2278 }
 0x2d4   : > { %v2423_v5 = vpop.permute.xlu0 %2422  ;;  %v2784_v48 = vsel %vm2742_vm4, %v2741_v11, %v2279_v40  ;;  %3454 = vmatpush.msrb.mxu3 %v3442_v56 }
 0x2d5   : > { %3177 = vmatmul.bf16.gmra.mxu3 %v2930_v9  ;;  %v2827_v7 = vsel %vm2785_vm5, %v2784_v48, %v2366_v23  ;;  %v3438_v9 = vld [vmem:[%s6583_s7 + $0x30] sm:$0xff] }
 0x2d6   : > { %v2870_v46 = vsel %vm2828_vm14, %v2827_v7, %v2423_v5  ;;  %3455 = vmatpush.msrb.mxu3 %v3441_v26 }
 0x2d7   : > { %v2354_v32 = vpop.permute.xlu1 %2353 }
 0x2d8   : > { %3456 = vmatpush.msrb.mxu3 %v3440_v0 }
 0x2da   : > { %v3128_v14 = vpop.f32.mrf.mxu1  ;;  %v3246_v61 = vpop.f32.mrf.mxu2  ;;  %3457 = vmatpush.msrb.mxu3 %v3439_v38 }
 0x2db   : > { %v3129_v58 = vadd.f32 %v5843_v6, %v3128_v14  ;;  %v2409_v42 = vpop.permute.xlu2 %2408 }
 0x2dc   : > { %v1977_v4 = vpop.permute.xlu0 %1976  ;;  %v2856_v50 = vsel %vm2828_vm14, %v2813_v39, %v2409_v42  ;;  %3458 = vmatpush.msrb.mxu3 %v3438_v9  ;;  %v3436_v39 = vld [vmem:[%s6583_s7 + $0x20] sm:$0xff]  ;;  %v3435_v42 = vld [vmem:[%s6583_s7 + $0x18] sm:$0xff] }
 0x2dd   : > { %v3242_v21 = vadd.f32 %v3241_v10, %v3129_v58  ;;  %v2912_v22 = vsel %vm2871_vm15, %v2856_v50, %v2553_v49  ;;  %v2643_v16 = vsel %vm2613_vm11, %v4020_v29, %v1977_v4  ;;  %v6851_v10 = vrot.slane %v6850_v30, 3  ;;  %v3434_v50 = vld [vmem:[%s6583_s7 + $0x10] sm:$0xff] }
 0x2de   : > { %3147 = vmatmul.bf16.gmra.mxu1 %v2912_v22  ;;  %v2686_v24 = vsel %vm631_vm2, %v2643_v16, %v2064_v12  ;;  %3459 = vmatpush.msrb.mxu3 %v3437_v54  ;;  %v4021_v12 = vld [vmem:[#allocation2 + $0x78] sm:$0xff] }
 0x2df   : > { %v3318_v27 = vmax.f32 %v3242_v21, 0.0  ;;  %v1979_v5 = vpop.permute.xlu1 %1978  ;;  %v2610_v14 = vsel %vm2571_vm10, %v6853_v17, %v6851_v10 }
 0x2e0   : > { %3460 = vmatpush.msrb.mxu3 %v3436_v39  ;;  %v2645_v48 = vsel %vm2613_vm11, %v4021_v12, %v1979_v5  ;;  %v6858_v5 = vld [vmem:[#allocation37_spill] sm:$0xff] }
 0x2e1   : > { %v3359_v41 = vmul.f32 %v3318_v27, %v6847_v44 }
 0x2e2   : > { %v3130_v25 = vpop.f32.mrf.mxu1  ;;  %3461 = vmatpush.msrb.mxu3 %v3435_v42  ;;  %v3248_v52 = vpop.f32.mrf.mxu2 }
 0x2e3   : > { %v3399_v47 = vadd.f32 %v3398_v34, %v3359_v41  ;;  %v3131_v53 = vadd.f32 %v5843_v6, %v3130_v25  ;;  %v2567_v15 = vpop.permute.xlu2 %2566 }
 0x2e4   : > { %v2933_v19 = vsel %vm2871_vm15, %v2870_v46, %v2567_v15  ;;  %v2267_v1 = vpop.permute.xlu0 %2266  ;;  %3462 = vmatpush.msrb.mxu3 %v3434_v50  ;;  %v3433_v46 = vld [vmem:[%s6583_s7 + $0x8] sm:$0xff] }
 0x2e5   : > { %v3244_v18 = vadd.f32 %v3243_v55, %v3131_v53  ;;  %3182 = vmatmul.bf16.gmra.mxu3 %v2933_v19  ;;  %v6855_v19 = vrot.slane %v4826_v51, 3 }
 0x2e6   : > { %3463 = vmatpush.msrb.mxu3 %v3433_v46  ;;  %v3492_v46 = vld [vmem:[%s6586_s10 + $0x30] sm:$0xff] }
 0x2e7   : > { %v3319_v23 = vmax.f32 %v3244_v18, 0.0  ;;  %v2269_v4 = vpop.permute.xlu1 %2268 }
 0x2e8   : > { %3464 = vmatpush.msrb.mxu3 %v3432_v35 }
 0x2e9   : > { %v3360_v20 = vmul.f32 %v3319_v23, %v6848_v45  ;;  %v3431_v23 = vld [vmem:[%s424_s3] sm:$0x1]  ;;  %s3554_s3 = scalar_lea.hbm %s6588_s12, %s4181_s25 }
 0x2ea   : > { %v3133_v59 = vpop.f32.mrf.mxu1  ;;  %v3251_v18 = vpop.f32.mrf.mxu2  ;;  %s3558_s16 = sshll.u32 %s3554_s3, 4  ;;  %s3559_s16 = int_to_ptr.hbm [resolvable:$true] %s3558_s16 }
 0x2eb   : > { %v3400_v63 = vadd.f32 %v3399_v47, %v3360_v20  ;;  %v3134_v31 = vadd.f32 %v5843_v6, %v3133_v59  ;;  %v2123_v8 = vpop.permute.xlu2 %2122  ;;  %v6854_v47 = vld [vmem:[#allocation50_spill] sm:$0xff]  ;;  %s4037_s18 = sshra.s32 %s3559_s16, 4  ;;  %s4038_s18 = int_to_ptr.hbm [resolvable:$true] %s4037_s18 }
 0x2ec   : > { %v2729_v43 = vsel %vm2699_vm1, %v2686_v24, %v2123_v8  ;;  %v2555_v34 = vpop.permute.xlu0 %2554  ;;  %s4039_s19 = scalar_lea.hbm %s4038_s18, 1  ;;  %p4044_p0 = scmp.lt.s32.totalorder %s4038_s18, %s6588_s12 }
 0x2ed   : > { %v3247_v2 = vadd.f32 %v3246_v61, %v3134_v31  ;;  %v2772_v57 = vsel %vm2742_vm4, %v2729_v43, %v2267_v1  ;;  %v6856_v43 = vld [vmem:[#allocation25_spill] sm:$0xff]  ;;  %p4040_p11 = scmp.ne.s32.totalorder %s4038_s18, %s4039_s19  ;;  %p4045_p1 = scmp.lt.s32.totalorder %s4043_s0, %s4039_s19 }
 0x2ee   : > { %v2815_v33 = vsel %vm2785_vm5, %v2772_v57, %v2354_v32 }
 0x2ef   : > { %v3320_v36 = vmax.f32 %v3247_v2, 0.0  ;;  %v2557_v25 = vpop.permute.xlu1 %2556  ;;  %p4041_p12 = pnand %p4040_p11, %p4198_p5  ;;  %p4046_p2 = por %p4045_p1, %p4044_p0 }
 0x2f1   : > { %v3361_v49 = vmul.f32 %v3320_v36, %v6849_v28  ;;  %v6857_v28 = vld [vmem:[#allocation29_spill] sm:$0xff]  ;;  %p4042_p13 = pneg %p4041_p12 }
 0x2f2   : > { %v3253_v13 = vpop.f32.mrf.mxu2  ;;  %v3135_v1 = vpop.f32.mrf.mxu1 }
 0x2f3   : > { %v6302_v40 = vadd.f32 %v3400_v63, %v3361_v49  ;;  %v2411_v3 = vpop.permute.xlu2 %2410  ;;  %v3136_v29 = vadd.f32 %v5843_v6, %v3135_v1  ;;  %p4047_p3 = pnand %p4046_p2, %p4042_p13 }
 0x2f4   : > { %v2858_v60 = vsel %vm2828_vm14, %v2815_v33, %v2411_v3  ;;  %v2125_v11 = vpop.permute.xlu0 %2124 }
 0x2f5   : > { %3862 = vmatmul.msk.bf16.vlgmr.msra.gmra.mxu3 %vm2613_vm11, %v2610_v14  ;;  %v2915_v58 = vsel %vm2871_vm15, %v2858_v60, %v2555_v34  ;;  %v3249_v31 = vadd.f32 %v3248_v52, %v3136_v29  ;;  %v3490_v29 = vld [vmem:[%s6586_s10 + $0x20] sm:$0xff] }
 0x2f6   : > { %3152 = vmatmul.bf16.gmra.mxu1 %v2915_v58 }
 0x2f7   : > { %v3321_v61 = vmax.f32 %v3249_v31, 0.0 }
 0x2f9   : > { %v3362_v36 = vmul.f32 %v3321_v61, %v6856_v43 }
 0x2fa   : > { %v3256_v32 = vpop.f32.mrf.mxu2  ;;  %v3138_v45 = vpop.f32.mrf.mxu1 }
 0x2fb   : > { %v2066_v21 = vpop.permute.xlu2 %2065  ;;  %v3139_v51 = vadd.f32 %v5843_v6, %v3138_v45  ;;  %v3402_v38 = vadd.f32 %v6302_v40, %v3362_v36  ;;  %v3491_v45 = vld [vmem:[%s6586_s10 + $0x28] sm:$0xff] }
 0x2fc   : > { %v2688_v22 = vsel %vm631_vm2, %v2645_v48, %v2066_v21  ;;  %v2413_v41 = vpop.permute.xlu0 %2412  ;;  %v3500_v48 = vld [vmem:[%s6586_s10 + $0x70] sm:$0xff] }
 0x2fd   : > { %v2731_v27 = vsel %vm2699_vm1, %v2688_v22, %v2125_v11  ;;  %v3252_v56 = vadd.f32 %v3251_v18, %v3139_v51  ;;  %v3499_v22 = vld [vmem:[%s6586_s10 + $0x68] sm:$0xff] }
 0x2fe   : > { %v2774_v7 = vsel %vm2742_vm4, %v2731_v27, %v2269_v4  ;;  %v3501_v4 = vld [vmem:[%s6586_s10 + $0x78] sm:$0xff]  ;;  %v3498_v27 = vld [vmem:[%s6586_s10 + $0x60] sm:$0xff] }
 0x2ff   : > { %v3322_v2 = vmax.f32 %v3252_v56, 0.0  ;;  %3502 = vmatpush.msra.mxu3 %v3501_v4 }
 0x301   : > { %v3363_v49 = vmul.f32 %v3322_v2, %v6857_v28  ;;  %3503 = vmatpush.msra.mxu3 %v3500_v48  ;;  %v6860_v28 = vld [vmem:[#allocation35_spill] sm:$0xff] }
 0x302   : > { %v6353_v16 = vpop.f32.mrf.mxu2  ;;  %v3140_v59 = vpop.f32.mrf.mxu1 }
 0x303   : > { %v2356_v44 = vpop.permute.xlu2 %2355  ;;  %v3141_v37 = vadd.f32 %v5843_v6, %v3140_v59  ;;  %v3403_v9 = vadd.f32 %v3402_v38, %v3363_v49  ;;  %3504 = vmatpush.msra.mxu3 %v3499_v22  ;;  %v6863_v22 = vld [vmem:[#allocation27_spill] sm:$0xff] }
 0x304   : > { %v2817_v55 = vsel %vm2785_vm5, %v2774_v7, %v2356_v44  ;;  %v3497_v44 = vld [vmem:[%s6586_s10 + $0x58] sm:$0xff] }
 0x305   : > { %3863 = vmatmul.msk.bf16.gmra.mxu3 %vm2613_vm11, %v6854_v47  ;;  %v2860_v53 = vsel %vm2828_vm14, %v2817_v55, %v2413_v41  ;;  %v3254_v8 = vadd.f32 %v3253_v13, %v3141_v37  ;;  %v3496_v55 = vld [vmem:[%s6586_s10 + $0x50] sm:$0xff]  ;;  %v3495_v47 = vld [vmem:[%s6586_s10 + $0x48] sm:$0xff]  ;;  %v6420_v13 = vld [vmem:[%s6582_s6] ss:$0 sm:$0xff] }
 0x306   : > { %v2918_v15 = vsel %vm2871_vm15, %v2860_v53, %v2557_v25  ;;  %3505 = vmatpush.msra.mxu3 %v3498_v27  ;;  %v3494_v53 = vld [vmem:[%s6586_s10 + $0x40] sm:$0xff] }
 0x307   : > { %3157 = vmatmul.bf16.gmra.mxu1 %v2918_v15  ;;  %v3323_v0 = vmax.f32 %v3254_v8, 0.0  ;;  %v3493_v15 = vld [vmem:[%s6586_s10 + $0x38] sm:$0xff] }
 0x308   : > { %3506 = vmatpush.msra.mxu3 %v3497_v44 }
 0x309   : > { %v3364_v33 = vmul.f32 %v3323_v0, %v6858_v5  ;;  %v3488_v5 = vld [vmem:[%s6586_s10 + $0x10] sm:$0xff] }
 0x30a   : > { %v6359_v24 = vpop.f32.mrf.mxu2  ;;  %3507 = vmatpush.msra.mxu3 %v3496_v55 }
 0x30b   : > { %v3404_v10 = vadd.f32 %v3403_v9, %v3364_v33  ;;  %v6861_v33 = vld [vmem:[#allocation51_spill] sm:$0xff] }
 0x30c   : > { %3508 = vmatpush.msra.mxu3 %v3495_v47  ;;  %v6864_v47 = vld [vmem:[#allocation22_spill] sm:$0xff] }
 0x30e   : > { %3509 = vmatpush.msra.mxu3 %v3494_v53 }
 0x310   : > { %3510 = vmatpush.msra.mxu3 %v3493_v15 }
 0x312   : > { %v3263_v14 = vpop.f32.mrf.mxu2  ;;  %3511 = vmatpush.msra.mxu3 %v3492_v46 }
 0x314   : > { %3512 = vmatpush.msra.mxu3 %v3491_v45 }
 0x315   : > { %3864 = vmatmul.msk.bf16.gmra.mxu3 %vm2613_vm11, %v6855_v19 }
 0x316   : > { %3513 = vmatpush.msra.mxu3 %v3490_v29 }
 0x31a   : > { %v3266_v39 = vpop.f32.mrf.mxu2 }
 0x321   : > { %v6350_v20 = vpop.f32.mrf.mxu3 }
 0x325   : > { %3465 = vmatmul.f32.vlgmr.msrb.gmra.mxu3 %v3431_v23 }
 0x329   : > { %v6356_v63 = vpop.f32.mrf.mxu3 }
 0x338   : > { %v6361_v26 = vpop.f32.mrf.mxu3 }
 0x33a   : > { %v3143_v34 = vpop.f32.mrf.mxu1 }
 0x33b   : > { %v3144_v57 = vadd.f32 %v5843_v6, %v3143_v34  ;;  %v3268_v6 = vpop.f32.mrf.mxu2 }
 0x33d   : > { %v3257_v3 = vadd.f32 %v3256_v32, %v3144_v57 }
 0x33f   : > { %v3324_v60 = vmax.f32 %v3257_v3, 0.0 }
 0x340   : > { %v6368_v30 = vpop.f32.mrf.mxu3 }
 0x341   : > { %v3365_v17 = vmul.f32 %v3324_v60, %v6859_v62 }
 0x342   : > { %v3145_v11 = vpop.f32.mrf.mxu1 }
 0x343   : > { %v6371_v58 = vadd.f32 %v3404_v10, %v3365_v17  ;;  %v3271_v21 = vpop.f32.mrf.mxu2  ;;  %v3146_v1 = vadd.f32 %v6420_v13, %v3145_v11  ;;  %v3487_v10 = vld [vmem:[%s6586_s10 + $0x8] sm:$0xff] }
 0x345   : > { %v3259_v59 = vadd.f32 %v6353_v16, %v3146_v1 }
 0x347   : > { %v3325_v8 = vmax.f32 %v3259_v59, 0.0 }
 0x348   : > { %v6373_v54 = vpop.f32.mrf.mxu3 }
 0x349   : > { %v3366_v49 = vmul.f32 %v3325_v8, %v6860_v28  ;;  %v6866_v8 = vld [vmem:[#allocation30_spill] sm:$0xff] }
 0x34b   : > { %v6398_v41 = vpop.f32.mrf.mxu2 }
 0x350   : > { %v6375_v42 = vpop.f32.mrf.mxu3 }
 0x353   : > { %v3276_v18 = vpop.f32.mrf.mxu2 }
 0x358   : > { %v6377_v40 = vpop.f32.mrf.mxu3 }
 0x35b   : > { %v3148_v12 = vpop.f32.mrf.mxu1  ;;  %v3278_v31 = vpop.f32.mrf.mxu2 }
 0x35c   : > { %v3149_v23 = vadd.f32 %v6420_v13, %v3148_v12  ;;  %v3486_v12 = vld [vmem:[%s6586_s10] sm:$0xff] }
 0x35e   : > { %v3262_v37 = vadd.f32 %v6359_v24, %v3149_v23  ;;  %v3489_v24 = vld [vmem:[%s6586_s10 + $0x18] sm:$0xff] }
 0x35f   : > { %3514 = vmatpush.msra.mxu3 %v3489_v24  ;;  %v3179_v24 = vadd.f32 %v6420_v13, %v6377_v40 }
 0x360   : > { %v6382_v50 = vpop.f32.mrf.mxu3  ;;  %v3326_v36 = vmax.f32 %v3262_v37, 0.0 }
 0x361   : > { %3515 = vmatpush.msra.mxu3 %v3488_v5 }
 0x362   : > { %v3367_v3 = vmul.f32 %v3326_v36, %v6861_v33  ;;  %v6867_v36 = vld [vmem:[#allocation33_spill] sm:$0xff] }
 0x363   : > { %v3150_v25 = vpop.f32.mrf.mxu1  ;;  %v3281_v62 = vpop.f32.mrf.mxu2  ;;  %3516 = vmatpush.msra.mxu3 %v3487_v10  ;;  %v3181_v10 = vadd.f32 %v6420_v13, %v6382_v50  ;;  %v6871_v50 = vld [vmem:[#allocation38_spill] sm:$0xff] }
 0x364   : > { %v3151_v51 = vadd.f32 %v6420_v13, %v3150_v25 }
 0x365   : > { %3517 = vmatpush.msra.mxu3 %v3486_v12 }
 0x366   : > { %v3264_v2 = vadd.f32 %v3263_v14, %v3151_v51  ;;  %v3164_v14 = vadd.f32 %v6420_v13, %v6350_v20  ;;  %v3169_v20 = vadd.f32 %v6420_v13, %v6361_v26 }
 0x368   : > { %v6393_v7 = vpop.f32.mrf.mxu3  ;;  %v3327_v16 = vmax.f32 %v3264_v2, 0.0 }
 0x370   : > { %v3185_v52 = vpop.f32.mrf.mxu3 }
 0x373   : > { %v3153_v35 = vpop.f32.mrf.mxu1 }
 0x374   : > { %v3154_v56 = vadd.f32 %v6420_v13, %v3153_v35  ;;  %v6865_v35 = vld [vmem:[#allocation31_spill] sm:$0xff] }
 0x376   : > { %v3267_v0 = vadd.f32 %v3266_v39, %v3154_v56  ;;  %v3406_v39 = vadd.f32 %v6371_v58, %v3366_v49  ;;  %v3277_v58 = vadd.f32 %v3276_v18, %v3164_v14  ;;  %v3283_v18 = vpop.f32.mrf.mxu2  ;;  %v3174_v56 = vadd.f32 %v6420_v13, %v6373_v54  ;;  %v3483_v49 = vld [vmem:[%s6585_s9 + $0x68] sm:$0xff] }
 0x378   : > { %v6415_v19 = vpop.f32.mrf.mxu3  ;;  %v3328_v9 = vmax.f32 %v3267_v0, 0.0  ;;  %v3407_v48 = vadd.f32 %v3406_v39, %v3367_v3  ;;  %v3332_v26 = vmax.f32 %v3277_v58, 0.0 }
 0x379   : > { %v3287_v54 = vadd.f32 %v6415_v19, %v3174_v56  ;;  %v6869_v19 = vld [vmem:[#allocation34_spill] sm:$0xff] }
 0x37a   : > { %v3369_v27 = vmul.f32 %v3328_v9, %v6863_v22  ;;  %v3373_v0 = vmul.f32 %v3332_v26, %v6867_v36  ;;  %v3184_v9 = vadd.f32 %v6420_v13, %v6393_v7  ;;  %v3480_v7 = vld [vmem:[%s6585_s9 + $0x50] sm:$0xff]  ;;  %v3479_v22 = vld [vmem:[%s6585_s9 + $0x48] sm:$0xff] }
 0x37b   : > { %v3155_v32 = vpop.f32.mrf.mxu1 }
 0x37c   : > { %v3156_v43 = vadd.f32 %v6420_v13, %v3155_v32  ;;  %v3282_v32 = vadd.f32 %v3281_v62, %v3169_v20  ;;  %v3336_v62 = vmax.f32 %v3287_v54, 0.0  ;;  %v3470_v54 = vld [vmem:[%s6585_s9] sm:$0xff] }
 0x37e   : > { %v3269_v57 = vadd.f32 %v3268_v6, %v3156_v43  ;;  %v6862_v6 = vld [vmem:[#allocation52_spill] sm:$0xff]  ;;  %v3334_v43 = vmax.f32 %v3282_v32, 0.0 }
 0x37f   : > { %v3368_v11 = vmul.f32 %v3327_v16, %v6862_v6  ;;  %v6868_v16 = vld [vmem:[#allocation26_spill] sm:$0xff]  ;;  %v6870_v6 = vld [vmem:[#allocation36_spill] sm:$0xff] }
 0x380   : > { %v6434_v61 = vpop.f32.mrf.mxu3  ;;  %v3329_v4 = vmax.f32 %v3269_v57, 0.0  ;;  %v3375_v3 = vmul.f32 %v3334_v43, %v6869_v19  ;;  %v3472_v43 = vld [vmem:[%s6585_s9 + $0x10] sm:$0xff] }
 0x381   : > { %v3408_v25 = vadd.f32 %v3407_v48, %v3368_v11 }
 0x382   : > { %v3370_v53 = vmul.f32 %v3329_v4, %v6864_v47 }
 0x383   : > { %v3409_v46 = vadd.f32 %v3408_v25, %v3369_v27  ;;  %v3478_v25 = vld [vmem:[%s6585_s9 + $0x40] sm:$0xff] }
 0x384   : > { %v3158_v34 = vpop.f32.mrf.mxu1 }
 0x385   : > { %v3159_v38 = vadd.f32 %v6420_v13, %v3158_v34  ;;  %v3410_v29 = vadd.f32 %v3409_v46, %v3370_v53  ;;  %v3176_v34 = vadd.f32 %v6420_v13, %v6375_v42  ;;  %v3482_v42 = vld [vmem:[%s6585_s9 + $0x60] sm:$0xff]  ;;  %v6873_v53 = vld [vmem:[#allocation41_spill] sm:$0xff] }
 0x386   : > { %v6874_v46 = vld [vmem:[#allocation39_spill] sm:$0xff] }
 0x387   : > { %v3272_v60 = vadd.f32 %v3271_v21, %v3159_v38  ;;  %v3166_v21 = vadd.f32 %v6420_v13, %v6356_v63  ;;  %v3171_v63 = vadd.f32 %v6420_v13, %v6368_v30  ;;  %v3485_v30 = vld [vmem:[%s6585_s9 + $0x78] sm:$0xff]  ;;  %v3289_v5 = vadd.f32 %v6434_v61, %v3176_v34 }
 0x388   : > { %v3291_v17 = vpop.f32.mrf.mxu3  ;;  %3522 = vmatpush.msrb.mxu3 %v3485_v30  ;;  %v3481_v61 = vld [vmem:[%s6585_s9 + $0x58] sm:$0xff] }
 0x389   : > { %v3330_v44 = vmax.f32 %v3272_v60, 0.0  ;;  %v3279_v15 = vadd.f32 %v3278_v31, %v3166_v21  ;;  %v3284_v37 = vadd.f32 %v3283_v18, %v3171_v63  ;;  %v3292_v14 = vadd.f32 %v3291_v17, %v3179_v24  ;;  %v3477_v63 = vld [vmem:[%s6585_s9 + $0x38] sm:$0xff]  ;;  %v3448_v18 = vld [vmem:[%s6584_s8] sm:$0x1] }
 0x38a   : > { %v3337_v4 = vmax.f32 %v3289_v5, 0.0  ;;  %v3542_v24 = vld [vmem:[%s6587_s11] sm:$0x1] }
 0x38b   : > { %v3371_v1 = vmul.f32 %v3330_v44, %v6865_v35  ;;  %v3333_v51 = vmax.f32 %v3279_v15, 0.0  ;;  %v3335_v38 = vmax.f32 %v3284_v37, 0.0  ;;  %v3338_v17 = vmax.f32 %v3292_v14, 0.0  ;;  %v6872_v44 = vld [vmem:[#allocation32_spill] sm:$0xff] }
 0x38c   : > { %v3160_v55 = vpop.f32.mrf.mxu1  ;;  %v3378_v20 = vmul.f32 %v3337_v4, %v6872_v44  ;;  %v3474_v37 = vld [vmem:[%s6585_s9 + $0x20] sm:$0xff] }
 0x38d   : > { %v3161_v52 = vadd.f32 %v6420_v13, %v3160_v55  ;;  %v3411_v31 = vadd.f32 %v3410_v29, %v3371_v1  ;;  %v3374_v57 = vmul.f32 %v3333_v51, %v6868_v16  ;;  %v3376_v11 = vmul.f32 %v3335_v38, %v6870_v6  ;;  %v6875_v1 = vld [vmem:[#allocation42_spill] sm:$0xff]  ;;  %v3475_v29 = vld [vmem:[%s6585_s9 + $0x28] sm:$0xff] }
 0x38e   : > { %v3377_v13 = vmul.f32 %v3336_v62, %v6871_v50 }
 0x38f   : > { %v3274_v23 = vadd.f32 %v6398_v41, %v3161_v52  ;;  %v3484_v41 = vld [vmem:[%s6585_s9 + $0x70] sm:$0xff]  ;;  %v3379_v52 = vmul.f32 %v3338_v17, %v6873_v53 }
 0x390   : > { %v3293_v45 = vpop.f32.mrf.mxu3  ;;  %3523 = vmatpush.msrb.mxu3 %v3484_v41 }
 0x391   : > { %v3331_v59 = vmax.f32 %v3274_v23, 0.0  ;;  %v3294_v21 = vadd.f32 %v3293_v45, %v3181_v10  ;;  %v3476_v45 = vld [vmem:[%s6585_s9 + $0x30] sm:$0xff] }
 0x392   : > { %3524 = vmatpush.msrb.mxu3 %v3483_v49 }
 0x393   : > { %v3372_v2 = vmul.f32 %v3331_v59, %v6866_v8  ;;  %v3339_v55 = vmax.f32 %v3294_v21, 0.0 }
 0x394   : > { %3525 = vmatpush.msrb.mxu3 %v3482_v42 }
 0x395   : > { %v3412_v28 = vadd.f32 %v3411_v31, %v3372_v2  ;;  %v3380_v23 = vmul.f32 %v3339_v55, %v6875_v1  ;;  %v3473_v2 = vld [vmem:[%s6585_s9 + $0x18] sm:$0xff] }
 0x396   : > { %3526 = vmatpush.msrb.mxu3 %v3481_v61 }
 0x397   : > { %v3413_v33 = vadd.f32 %v3412_v28, %v3373_v0  ;;  %v3471_v0 = vld [vmem:[%s6585_s9 + $0x8] sm:$0xff] }
 0x398   : > { %v3296_v60 = vpop.f32.mrf.mxu3  ;;  %3527 = vmatpush.msrb.mxu3 %v3480_v7 }
 0x399   : > { %v3414_v40 = vadd.f32 %v3413_v33, %v3374_v57  ;;  %v3297_v39 = vadd.f32 %v3296_v60, %v3184_v9 }
 0x39a   : > { %3528 = vmatpush.msrb.mxu3 %v3479_v22 }
 0x39b   : > { %v3415_v12 = vadd.f32 %v3414_v40, %v3375_v3  ;;  %v3340_v27 = vmax.f32 %v3297_v39, 0.0 }
 0x39c   : > { %3529 = vmatpush.msrb.mxu3 %v3478_v25 }
 0x39d   : > { %v3416_v48 = vadd.f32 %v3415_v12, %v3376_v11  ;;  %v3381_v35 = vmul.f32 %v3340_v27, %v6874_v46 }
 0x39e   : > { %3530 = vmatpush.msrb.mxu3 %v3477_v63 }
 0x39f   : > { %v3417_v58 = vadd.f32 %v3416_v48, %v3377_v13  ;;  %v3422_v59 = vsel %vm1433_vm13, %v3381_v35, 0.0 }
 0x3a0   : > { %v3298_v47 = vpop.f32.mrf.mxu3  ;;  %3531 = vmatpush.msrb.mxu3 %v3476_v45 }
 0x3a1   : > { %v3418_v15 = vadd.f32 %v3417_v58, %v3378_v20 }
 0x3a2   : > { %3532 = vmatpush.msrb.mxu3 %v3475_v29 }
 0x3a3   : > { %v3419_v32 = vadd.f32 %v3418_v15, %v3379_v52 }
 0x3a4   : > { %3533 = vmatpush.msrb.mxu3 %v3474_v37 }
 0x3a5   : > { %v3420_v26 = vadd.f32 %v3419_v32, %v3380_v23 }
 0x3a6   : > { %3534 = vmatpush.msrb.mxu3 %v3473_v2 }
 0x3a7   : > { %v3423_v51 = vadd.f32 %v3422_v59, %v3420_v26 }
 0x3a8   : > { %v3466_v56 = vpop.f32.mrf.mxu3  ;;  %3535 = vmatpush.msrb.mxu3 %v3472_v43 }
 0x3a9   : > { %v3424_v31 = vrot.slane %v3423_v51, 4  ;;  %v3467_v8 = vadd.f32 %v3466_v56, %v3448_v18 }
 0x3aa   : > { %3536 = vmatpush.msrb.mxu3 %v3471_v0 }
 0x3ab   : > { %v3425_v30 = vadd.f32 %v3424_v31, %v3423_v51  ;;  %v3469_v41 = vmax.f32 %v3467_v8, 0.0 }
 0x3ac   : > { %3537 = vmatpush.msrb.mxu3 %v3470_v54 }
 0x3ad   : > { %v3426_v36 = vrot.slane %v3425_v30, 2  ;;  %3518 = vmatmul.f32.vlgmr.msra.gmra.mxu3 %v3469_v41 }
 0x3af   : > { %v3427_v34 = vadd.f32 %v3426_v36, %v3425_v30 }
 0x3b1   : > { %v3428_v28 = vrot.slane %v3427_v34, 1 }
 0x3b3   : > { %v3429_v49 = vadd.f32 %v3428_v28, %v3427_v34 }
 0x3b5   : > { %v3430_v16 = vmul.f32 0.00390625, %v3429_v49 }
 0x3b7   : > { %3538 = vmatmul.f32.vlgmr.msrb.gmra.mxu3 %v3430_v16 }
 0x430   : > { %v3519_v57 = vpop.f32.mrf.mxu3 }
 0x43a   : > { %v3539_v38 = vpop.f32.mrf.mxu3 }
 0x43b   : > { %v3540_v5 = vadd.f32 %v3539_v38, %v3519_v57 }
 0x43d   : > { %v3543_v33 = vadd.f32 %v3542_v24, %v3540_v5 }
 0x43f   : > { %3544 = vst [vmem:[%s416_s26] sm:$0x1] %v3543_v33 }
 0x440   : > { %4050 = shalt.err (!%p4047_p3)
}
 0x441   : > { %3950 = dma.vmem_to_hbm [thread:$0]  (%p4198_p5), %s3557_s28, 16, %s3559_s16, %s3546_s30  }
 0x442 PF: > { %p3956_p4 = scmp.ge.s32.totalorder %s4085_s24, 2  ;;  %s3570_s15 = sand.u32 1, %s4073_s21  }
 0x443   : > { %s3571_s3 = scalar_lea.sflag [#allocation4], %s3570_s15 }
 0x444   : > { %p3953_p7 = pnand %p3956_p4, %p4202_p6 }
 0x446   : > { %p3954_p8 = pneg %p3953_p7 }
 0x448   : > { %4068 = dma.done.wait (%p3954_p8), %s3571_s3, 16  }
 0x449   : > { %4070 = vsyncadd (%p3954_p8), %s3571_s3, 4294967280  ;;  %s6876_s26 = sld [smem:[#allocation6_spill]]  ;;  %p22_p9 = scmp.ge.s32.totalorder %s4185_s27, 4  }
 0x44a   : > { %s6877_s21 = smov %s4077_s22  ;;  %s6878_s22 = smov %s4081_s23 }
 0x44b   : > { %s6880_s24 = smov %s4185_s27  ;;  %24 = sbr.rel (!%p22_p9) target bundleno = 6 (0x6), region = 106 }
 0x44f   : > { %s6879_s23 = smov %s6876_s26 }
 0x450   :  { %3576 = vsyncpa [#allocation4], 1 }
 0x451   :  { %3578 = vsyncpa [#allocation4 + $0x1], 1 }

</bundles_post_ra>
